<compile_context>
chip_gen: v6e
topology: v6e:2x2x1
jax: 0.10.0
libtpu: 0.0.40
codegen_flags: <defaults>
</compile_context>

<pallas_src>
import functools
import math

import numpy as np
import jax
import jax.numpy as jnp
from jax.experimental import pallas as pl
from jax.experimental.pallas import tpu as pltpu

_VMEM = pl.BlockSpec(memory_space=pltpu.MemorySpace.VMEM)
_LN_EPS = 1e-5
_NEG_BIG = -1.0e30      # pre-softmax "other head" block bias (exp underflows to 0)
_MASK_FILL = -1.0e9     # reference post-softmax causal fill value


# --------------------------- fused Pallas kernel -----------------------------

def _transformer_kernel(
    enc_x_ref, dec_x_ref, masks_ref,
    e_wmat_ref, e_wf2_ref, e_vec_ref, e_wow_ref,
    d_wmat_ref, d_wf2_ref, d_vec_ref, d_wow_ref,
    gen_ref, out_ref,
    *, n_layers, num_heads, d_model, d_ff, e_offs, d_offs,
):
    H, D, F = num_heads, d_model, d_ff
    S = D // H                                   # head dim == sequence length
    inv_root_dk = 1.0 / math.sqrt(d_model)       # reference scales by 1/sqrt(d_model)

    block_bias = masks_ref[0]                    # (D, D): 0 on same-head pairs, -1e30 else
    causal_fill = masks_ref[1]                   # (D, D): 1.0 where causal fill applies

    def layer_norm(z, g, b):
        mu = jnp.mean(z, axis=-1, keepdims=True)
        var = jnp.mean((z - mu) * (z - mu), axis=-1, keepdims=True)
        return (z - mu) * jax.lax.rsqrt(var + _LN_EPS) * g + b

    def attention(q, k, v, wo_wide, *, causal):
        # q, k: (S, D) projections whose feature columns were pre-permuted at init
        # so that the reference's transpose/reshape head split becomes a fixed
        # block pattern of ONE (D, D) score matrix (all heads in one matmul).
        s = jnp.dot(q.T, k, preferred_element_type=jnp.float32)          # (D, D)
        s = s * inv_root_dk + block_bias                                  # kill cross-head pairs
        m = jnp.max(s, axis=-1, keepdims=True)
        e = jnp.exp(s - m)
        p = e * pl.reciprocal(jnp.sum(e, axis=-1, keepdims=True), approx=True)
        if causal:
            # reference bug: causal mask applied AFTER softmax with -1e9 fill
            p = jnp.where(causal_fill != 0.0, jnp.float32(_MASK_FILL), p)
        # reference "V.reshape(H, S, d_h)" head split == stacking V's lane blocks
        vstack = jnp.concatenate([v[:, j * S:(j + 1) * S] for j in range(H)], axis=0)
        z = jnp.dot(p, vstack, preferred_element_type=jnp.float32)        # (D, S)
        # reference "att.reshape(S, d_model) @ W_o" == block-diagonal sum of
        # z @ wo_wide, where wo_wide is W_o's row blocks laid side by side.
        t = jnp.dot(z, wo_wide, preferred_element_type=jnp.float32)       # (D, H*D)
        acc = t[0:S, 0:D]
        for j in range(1, H):
            acc = acc + t[j * S:(j + 1) * S, j * D:(j + 1) * D]
        return acc                                                        # (S, D)

    # -------------------------------- encoder --------------------------------
    eo_qkv, eo_f1 = e_offs
    ctx = enc_x_ref[...]
    for i in range(n_layers):
        w = e_wmat_ref[i]
        vec = e_vec_ref[i]
        wow = e_wow_ref[i]
        qkv = (jnp.dot(ctx, w[:, eo_qkv:eo_qkv + 3 * D],
                       preferred_element_type=jnp.float32) + vec[0:1, 0:3 * D])
        a = attention(qkv[:, 0:D], qkv[:, D:2 * D], qkv[:, 2 * D:3 * D], wow,
                      causal=False) + vec[1:2, 0:D]
        x1 = layer_norm(ctx + a, vec[2:3, 0:D], vec[3:4, 0:D])
        h1 = jnp.maximum(
            jnp.dot(x1, w[:, eo_f1:eo_f1 + F], preferred_element_type=jnp.float32)
            + vec[4:5, 0:F], 0.0)
        f = jnp.dot(h1, e_wf2_ref[i], preferred_element_type=jnp.float32) + vec[5:6, 0:D]
        ctx = layer_norm(x1 + f, vec[6:7, 0:D], vec[7:8, 0:D])

    # -------------------------------- decoder --------------------------------
    do_qkv, do_q, do_kv, do_f1 = d_offs
    y = dec_x_ref[...]
    for i in range(n_layers):
        w = d_wmat_ref[i]
        vec = d_vec_ref[i]
        wow = d_wow_ref[i]
        # masked self-attention
        qkv = (jnp.dot(y, w[:, do_qkv:do_qkv + 3 * D],
                       preferred_element_type=jnp.float32) + vec[0:1, 0:3 * D])
        a = attention(qkv[:, 0:D], qkv[:, D:2 * D], qkv[:, 2 * D:3 * D], wow[0:S, :],
                      causal=True) + vec[1:2, 0:D]
        x1 = layer_norm(y + a, vec[2:3, 0:D], vec[3:4, 0:D])
        # cross-attention against the encoder context
        qc = (jnp.dot(x1, w[:, do_q:do_q + D],
                      preferred_element_type=jnp.float32) + vec[4:5, 0:D])
        kv = (jnp.dot(ctx, w[:, do_kv:do_kv + 2 * D],
                      preferred_element_type=jnp.float32) + vec[5:6, 0:2 * D])
        a2 = attention(qc, kv[:, 0:D], kv[:, D:2 * D], wow[S:2 * S, :],
                       causal=False) + vec[6:7, 0:D]
        x2 = layer_norm(x1 + a2, vec[7:8, 0:D], vec[8:9, 0:D])
        # feed-forward
        h1 = jnp.maximum(
            jnp.dot(x2, w[:, do_f1:do_f1 + F], preferred_element_type=jnp.float32)
            + vec[9:10, 0:F], 0.0)
        f = jnp.dot(h1, d_wf2_ref[i], preferred_element_type=jnp.float32) + vec[10:11, 0:D]
        y = layer_norm(x2 + f, vec[11:12, 0:D], vec[12:13, 0:D])

    # ------------------- generator: softmax(linear(x)), eval branch ----------
    gen = gen_ref[...]                           # (D + 1, vocab)
    logits = jnp.dot(y, gen[0:D, :], preferred_element_type=jnp.float32) + gen[D:D + 1, :]
    m = jnp.max(logits, axis=-1, keepdims=True)
    e = jnp.exp(logits - m)
    out_ref[...] = (e / jnp.sum(e, axis=-1, keepdims=True)).astype(out_ref.dtype)


# --------------------------- one-time weight packing --------------------------

def _layout(widths, align=128):
    """Places segments left-to-right, bumping to a 128-lane boundary when a
    segment would straddle one (keeps every in-kernel lane slice inside a vreg)."""
    offs, cur = [], 0
    for w in widths:
        if (cur % align) + w > align:
            cur = ((cur + align - 1) // align) * align
        offs.append(cur)
        cur += w
    return tuple(offs), cur


def _pack_rowblob(mats, offs, total):
    rows = mats[0].shape[0]
    blob = jnp.zeros((rows, total), jnp.float32)
    for m, o in zip(mats, offs):
        blob = blob.at[:, o:o + m.shape[1]].set(m)
    return blob


def _pack_model(params, *, num_heads, d_model, d_ff):
    H, D, F = num_heads, d_model, d_ff
    S = D // H

    # Feature permutation that turns the reference's transpose/reshape head
    # split into fixed blocks of one (D, D) score matrix:  position b*S + a of
    # the permuted Q/K features holds original feature a*H + b.
    idx = (np.arange(D) % S) * H + (np.arange(D) // S)
    head_of, pos_of = idx // S, idx % S
    same_head = head_of[:, None] == head_of[None, :]
    block_bias = np.where(same_head, 0.0, _NEG_BIG).astype(np.float32)
    causal_fill = (same_head & (pos_of[None, :] > pos_of[:, None])).astype(np.float32)
    masks = jnp.asarray(np.stack([block_bias, causal_fill], axis=0))

    def permuted(p):                      # permute output features of Q / K linears
        return p["w"][:, idx], p["b"][idx]

    def wo_wide(wo):                      # W_o row blocks laid side by side (d_h, H*D)
        return jnp.concatenate([wo[j * S:(j + 1) * S, :] for j in range(H)], axis=1)

    padw = 128 * max(1, -(-max(3 * D, 2 * D, F) // 128))

    def vec_block(vectors):
        rows = []
        for v in vectors:
            v = jnp.reshape(jnp.asarray(v, jnp.float32), (-1,))
            rows.append(jnp.pad(v, (0, padw - v.shape[0])))
        return jnp.stack(rows, axis=0)

    e_offs, e_total = _layout([3 * D, F])
    d_offs, d_total = _layout([3 * D, D, 2 * D, F])

    e_wmat, e_wf2, e_vec, e_wow = [], [], [], []
    for l in params["encoder"]:
        at, ff = l["attn"], l["ff"]
        wq, bq = permuted(at["Q"])
        wk, bk = permuted(at["K"])
        qkv_w = jnp.concatenate([wq, wk, at["V"]["w"]], axis=1)
        e_wmat.append(_pack_rowblob([qkv_w, ff["l1"]["w"]], e_offs, e_total))
        e_wf2.append(ff["l2"]["w"])
        e_wow.append(wo_wide(at["O"]["w"]))
        e_vec.append(vec_block([
            jnp.concatenate([bq, bk, at["V"]["b"]]), at["O"]["b"],
            l["norm1"]["g"], l["norm1"]["b"],
            ff["l1"]["b"], ff["l2"]["b"],
            l["norm2"]["g"], l["norm2"]["b"]]))

    d_wmat, d_wf2, d_vec, d_wow = [], [], [], []
    for l in params["decoder"]:
        ma, ca, ff = l["mattn"], l["attn"], l["ff"]
        mwq, mbq = permuted(ma["Q"])
        mwk, mbk = permuted(ma["K"])
        cwq, cbq = permuted(ca["Q"])
        cwk, cbk = permuted(ca["K"])
        qkv_w = jnp.concatenate([mwq, mwk, ma["V"]["w"]], axis=1)
        kv_w = jnp.concatenate([cwk, ca["V"]["w"]], axis=1)
        d_wmat.append(_pack_rowblob([qkv_w, cwq, kv_w, ff["l1"]["w"]], d_offs, d_total))
        d_wf2.append(ff["l2"]["w"])
        d_wow.append(jnp.concatenate([wo_wide(ma["O"]["w"]), wo_wide(ca["O"]["w"])], axis=0))
        d_vec.append(vec_block([
            jnp.concatenate([mbq, mbk, ma["V"]["b"]]), ma["O"]["b"],
            l["norm1"]["g"], l["norm1"]["b"],
            cbq, jnp.concatenate([cbk, ca["V"]["b"]]), ca["O"]["b"],
            l["norm2"]["g"], l["norm2"]["b"],
            ff["l1"]["b"], ff["l2"]["b"],
            l["norm3"]["g"], l["norm3"]["b"]]))

    gen_wb = jnp.concatenate(
        [params["gen"]["w"], params["gen"]["b"].reshape(1, -1)], axis=0)

    return {
        "embedding": params["embedding"], "pe": params["pe"], "masks": masks,
        "e_wmat": jnp.stack(e_wmat), "e_wf2": jnp.stack(e_wf2),
        "e_vec": jnp.stack(e_vec), "e_wow": jnp.stack(e_wow),
        "d_wmat": jnp.stack(d_wmat), "d_wf2": jnp.stack(d_wf2),
        "d_vec": jnp.stack(d_vec), "d_wow": jnp.stack(d_wow),
        "gen_wb": gen_wb,
    }, e_offs, d_offs


# --------------------------- jitted forward (embed + 1 pallas_call) -----------

def _forward_impl(packed, enc_tokens, dec_tokens, *,
                  n_layers, num_heads, d_model, d_ff, vocab_size, e_offs, d_offs):
    scale = math.sqrt(d_model)

    # TODO(synk): embedding gather + positional-encoding add stay in plain JAX
    # glue (tiny gather; not worth a manual DMA-gather path inside the kernel).
    def embed(tokens):
        e = jnp.take(packed["embedding"], tokens, axis=0) * scale
        return e + packed["pe"][: tokens.shape[-1], :]     # dropout = identity (eval)

    enc_x = embed(enc_tokens)
    dec_x = embed(dec_tokens)

    kernel = functools.partial(
        _transformer_kernel, n_layers=n_layers, num_heads=num_heads,
        d_model=d_model, d_ff=d_ff, e_offs=e_offs, d_offs=d_offs)

    return pl.pallas_call(
        kernel,
        out_shape=jax.ShapeDtypeStruct((dec_tokens.shape[-1], vocab_size), jnp.float32),
        in_specs=[_VMEM] * 12,
        out_specs=_VMEM,
    )(enc_x, dec_x, packed["masks"],
      packed["e_wmat"], packed["e_wf2"], packed["e_vec"], packed["e_wow"],
      packed["d_wmat"], packed["d_wf2"], packed["d_vec"], packed["d_wow"],
      packed["gen_wb"])


# --------------------------- pure-JAX reference -------------------------------

def _ref_linear(x, p):
    return jnp.dot(x, p["w"], precision=jax.lax.Precision.HIGHEST) + p["b"]


def _ref_mha(p, q_in, k_in, v_in, mask, *, num_heads, d_model):
    d_h = d_model // num_heads
    sq, sk = q_in.shape[0], k_in.shape[0]
    ql = _ref_linear(q_in, p["Q"])
    kl = _ref_linear(k_in, p["K"])
    vl = _ref_linear(v_in, p["V"])
    qh = jnp.transpose(ql).reshape(num_heads, sq, d_h)
    kh = jnp.transpose(jnp.transpose(kl).reshape(num_heads, sk, d_h), (0, 2, 1))
    vh = vl.reshape(num_heads, sk, d_h)
    s = jnp.einsum("hqd,hdk->hqk", qh, kh,
                   precision=jax.lax.Precision.HIGHEST) / math.sqrt(d_model)
    prob = jax.nn.softmax(s, axis=-1)
    if mask is not None:
        prob = jnp.where(mask[None] != 0.0, -1.0e9, prob)
    att = jnp.einsum("hqk,hkd->hqd", prob, vh, precision=jax.lax.Precision.HIGHEST)
    return _ref_linear(att.reshape(sq, d_model), p["O"])


def _ref_layer_norm(z, lnp):
    mu = jnp.mean(z, axis=-1, keepdims=True)
    var = jnp.mean((z - mu) ** 2, axis=-1, keepdims=True)
    return (z - mu) * jax.lax.rsqrt(var + _LN_EPS) * lnp["g"] + lnp["b"]


def _ref_ff(p, x):
    return _ref_linear(jnp.maximum(_ref_linear(x, p["l1"]), 0.0), p["l2"])


def transformer_forward_reference(params, enc_tokens, dec_tokens, *, num_heads, d_model):
    def embed(tokens):
        e = jnp.take(params["embedding"], tokens, axis=0) * math.sqrt(d_model)
        return e + params["pe"][: tokens.shape[-1], :]

    context = embed(enc_tokens)
    for lp in params["encoder"]:
        a = _ref_mha(lp["attn"], context, context, context, None,
                     num_heads=num_heads, d_model=d_model)
        x1 = _ref_layer_norm(context + a, lp["norm1"])
        context = _ref_layer_norm(x1 + _ref_ff(lp["ff"], x1), lp["norm2"])

    out = embed(dec_tokens)
    sd = dec_tokens.shape[-1]
    mask = (jnp.tril(jnp.ones((sd, sd), jnp.float32)) == 0).astype(jnp.float32)
    for lp in params["decoder"]:
        a = _ref_mha(lp["mattn"], out, out, out, mask,
                     num_heads=num_heads, d_model=d_model)
        x1 = _ref_layer_norm(out + a, lp["norm1"])
        a2 = _ref_mha(lp["attn"], x1, context, context, None,
                      num_heads=num_heads, d_model=d_model)
        x2 = _ref_layer_norm(x1 + a2, lp["norm2"])
        out = _ref_layer_norm(x2 + _ref_ff(lp["ff"], x2), lp["norm3"])

    return jax.nn.softmax(_ref_linear(out, params["gen"]), axis=-1)


# --------------------------- params / model ----------------------------------

def init_linear_params(key, d_in, d_out):
    kw, kb = jax.random.split(key)
    bound = 1.0 / math.sqrt(d_in)
    # stored as (in, out) so y = x @ w + b (same math as torch's x @ W.T + b)
    w = jax.random.uniform(kw, (d_in, d_out), jnp.float32, -bound, bound)
    b = jax.random.uniform(kb, (d_out,), jnp.float32, -bound, bound)
    return {"w": w, "b": b}


def init_mha_params(key, d_model):
    ks = jax.random.split(key, 4)
    return {n: init_linear_params(k, d_model, d_model)
            for n, k in zip(("Q", "K", "V", "O"), ks)}


def init_ff_params(key, d_model, d_ff):
    k1, k2 = jax.random.split(key)
    return {"l1": init_linear_params(k1, d_model, d_ff),
            "l2": init_linear_params(k2, d_ff, d_model)}


def init_ln_params(d_model):
    return {"g": jnp.ones((d_model,), jnp.float32),
            "b": jnp.zeros((d_model,), jnp.float32)}


def make_positional_encoding(max_len, d_model):
    pos = jnp.arange(max_len, dtype=jnp.float32)[:, None]
    freq = 1.0 / (10000.0 ** (jnp.arange(0, d_model, 2, dtype=jnp.float32) / d_model))
    ang = pos * freq
    pe = jnp.zeros((max_len, d_model), jnp.float32)
    pe = pe.at[:, 0::2].set(jnp.sin(ang))
    pe = pe.at[:, 1::2].set(jnp.cos(ang))
    return pe


class Translator:
    """Mirrors the reference Translator (which wraps a Transformer).

    # TODO(synk): the reference Translator.forward is a stub returning None;
    # we expose the wrapped Transformer forward pass instead.
    """

    def __init__(self, h, key):
        self.h = h
        keys = jax.random.split(key, 2 + 2 * h["N"])
        params = {
            "embedding": jax.random.normal(keys[0], (h["vocab_size"], h["d_model"]),
                                           jnp.float32),
            "pe": make_positional_encoding(h["max_len"], h["d_model"]),
            "gen": init_linear_params(keys[1], h["d_model"], h["vocab_size"]),
            "encoder": [],
            "decoder": [],
        }
        for i in range(h["N"]):
            ek = jax.random.split(keys[2 + i], 2)
            params["encoder"].append({
                "attn": init_mha_params(ek[0], h["d_model"]),
                "norm1": init_ln_params(h["d_model"]),
                "ff": init_ff_params(ek[1], h["d_model"], h["d_ff"]),
                "norm2": init_ln_params(h["d_model"]),
            })
            dk = jax.random.split(keys[2 + h["N"] + i], 3)
            params["decoder"].append({
                "mattn": init_mha_params(dk[0], h["d_model"]),
                "norm1": init_ln_params(h["d_model"]),
                "attn": init_mha_params(dk[1], h["d_model"]),
                "norm2": init_ln_params(h["d_model"]),
                "ff": init_ff_params(dk[2], h["d_model"], h["d_ff"]),
                "norm3": init_ln_params(h["d_model"]),
            })
        self.params = params

        # One-time packing: fused/permuted weights, per-layer blobs, masks.
        self._packed, e_offs, d_offs = _pack_model(
            params, num_heads=h["num_heads"], d_model=h["d_model"], d_ff=h["d_ff"])
        self._fwd = jax.jit(functools.partial(
            _forward_impl, n_layers=h["N"], num_heads=h["num_heads"],
            d_model=h["d_model"], d_ff=h["d_ff"], vocab_size=h["vocab_size"],
            e_offs=e_offs, d_offs=d_offs))

    def forward(self, enc_tokens, dec_tokens):
        d_h = self.h["d_model"] // self.h["num_heads"]
        assert enc_tokens.shape[-1] == d_h and dec_tokens.shape[-1] == d_h, \
            "fused kernel requires seq_len == d_model // num_heads"
        return self._fwd(self._packed, enc_tokens, dec_tokens)

    def forward_reference(self, enc_tokens, dec_tokens):
        return transformer_forward_reference(self.params, enc_tokens, dec_tokens,
                                             num_heads=self.h["num_heads"],
                                             d_model=self.h["d_model"])


# --------------------------- main ---------------------------------------------

if __name__ == "__main__":
    h = dict(N=2, d_model=32, num_heads=4, d_ff=64, vocab_size=50,
             droput=0.1, max_len=64)

    key = jax.random.PRNGKey(0)
    k_model, k_enc, k_dec = jax.random.split(key, 3)

    model = Translator(h, k_model)

    seq = h["d_model"] // h["num_heads"]   # 8; fused head split needs seq == d_h
    enc_tokens = jax.random.randint(k_enc, (seq,), 0, h["vocab_size"], dtype=jnp.int32)
    dec_tokens = jax.random.randint(k_dec, (seq,), 0, h["vocab_size"], dtype=jnp.int32)

    out = jax.block_until_ready(model.forward(enc_tokens, dec_tokens))
    ref = jax.block_until_ready(model.forward_reference(enc_tokens, dec_tokens))

    assert out.shape == (seq, h["vocab_size"])
    assert bool(jnp.all(jnp.isfinite(out)))
    assert bool(jnp.allclose(jnp.sum(out, axis=-1), 1.0, atol=1e-3))
    err = float(jnp.max(jnp.abs(out - ref)))
    assert err < 5e-3, f"max abs diff {err}"

    print("KERNEL_OK")
</pallas_src>

<mosaic_0001>
module attributes {stable_mosaic.version = 11 : i64} {
  func.func @_transformer_kernel(%arg0: memref<8x32xf32, #tpu.memory_space<vmem>>, %arg1: memref<8x32xf32, #tpu.memory_space<vmem>>, %arg2: memref<2x32x32xf32, #tpu.memory_space<vmem>>, %arg3: memref<2x32x192xf32, #tpu.memory_space<vmem>>, %arg4: memref<2x64x32xf32, #tpu.memory_space<vmem>>, %arg5: memref<2x8x128xf32, #tpu.memory_space<vmem>>, %arg6: memref<2x8x128xf32, #tpu.memory_space<vmem>>, %arg7: memref<2x32x256xf32, #tpu.memory_space<vmem>>, %arg8: memref<2x64x32xf32, #tpu.memory_space<vmem>>, %arg9: memref<2x13x128xf32, #tpu.memory_space<vmem>>, %arg10: memref<2x16x128xf32, #tpu.memory_space<vmem>>, %arg11: memref<33x50xf32, #tpu.memory_space<vmem>>, %arg12: memref<8x50xf32, #tpu.memory_space<vmem>>) attributes {dimension_semantics = [], scalar_prefetch = 0 : i64, scratch_operands = 0 : i64, tpu.core_type = #tpu.core_type<tc>} {
    %c0 = arith.constant 0 : index
    %c0_0 = arith.constant 0 : index
    %c0_1 = arith.constant 0 : index
    %0 = vector.load %arg2[%c0, %c0_0, %c0_1] : memref<2x32x32xf32, #tpu.memory_space<vmem>>, vector<1x32x32xf32>
    %1 = vector.shape_cast %0 : vector<1x32x32xf32> to vector<32x32xf32>
    %c1 = arith.constant 1 : index
    %c0_2 = arith.constant 0 : index
    %c0_3 = arith.constant 0 : index
    %2 = vector.load %arg2[%c1, %c0_2, %c0_3] : memref<2x32x32xf32, #tpu.memory_space<vmem>>, vector<1x32x32xf32>
    %3 = vector.shape_cast %2 : vector<1x32x32xf32> to vector<32x32xf32>
    %c0_4 = arith.constant 0 : index
    %c0_5 = arith.constant 0 : index
    %4 = vector.load %arg0[%c0_4, %c0_5] : memref<8x32xf32, #tpu.memory_space<vmem>>, vector<8x32xf32>
    %c0_6 = arith.constant 0 : index
    %c0_7 = arith.constant 0 : index
    %c0_8 = arith.constant 0 : index
    %5 = vector.load %arg3[%c0_6, %c0_7, %c0_8] : memref<2x32x192xf32, #tpu.memory_space<vmem>>, vector<1x32x192xf32>
    %6 = vector.shape_cast %5 : vector<1x32x192xf32> to vector<32x192xf32>
    %c0_9 = arith.constant 0 : index
    %c0_10 = arith.constant 0 : index
    %c0_11 = arith.constant 0 : index
    %7 = vector.load %arg5[%c0_9, %c0_10, %c0_11] : memref<2x8x128xf32, #tpu.memory_space<vmem>>, vector<1x8x128xf32>
    %8 = vector.shape_cast %7 : vector<1x8x128xf32> to vector<8x128xf32>
    %c0_12 = arith.constant 0 : index
    %c0_13 = arith.constant 0 : index
    %c0_14 = arith.constant 0 : index
    %9 = vector.load %arg6[%c0_12, %c0_13, %c0_14] : memref<2x8x128xf32, #tpu.memory_space<vmem>>, vector<1x8x128xf32>
    %10 = vector.shape_cast %9 : vector<1x8x128xf32> to vector<8x128xf32>
    %11 = vector.extract_strided_slice %6 {offsets = [0, 0], sizes = [32, 96], strides = [1, 1]} : vector<32x192xf32> to vector<32x96xf32>
    %cst = arith.constant dense<0.000000e+00> : vector<8x96xf32>
    %12 = tpu.matmul %4, %11, %cst {dimension_numbers = #tpu.dot_dimension_numbers<[1], [0], [0], [1], [0, 0, 1, 1], [], []>} : vector<8x32xf32>, vector<32x96xf32>, vector<8x96xf32> -> vector<8x96xf32>
    %13 = vector.extract_strided_slice %8 {offsets = [0, 0], sizes = [1, 96], strides = [1, 1]} : vector<8x128xf32> to vector<1x96xf32>
    %14 = vector.broadcast %13 : vector<1x96xf32> to vector<8x96xf32>
    %15 = arith.addf %12, %14 : vector<8x96xf32>
    %16 = vector.extract_strided_slice %15 {offsets = [0, 0], sizes = [8, 32], strides = [1, 1]} : vector<8x96xf32> to vector<8x32xf32>
    %17 = vector.extract_strided_slice %15 {offsets = [0, 32], sizes = [8, 32], strides = [1, 1]} : vector<8x96xf32> to vector<8x32xf32>
    %18 = vector.extract_strided_slice %15 {offsets = [0, 64], sizes = [8, 32], strides = [1, 1]} : vector<8x96xf32> to vector<8x32xf32>
    %19 = tpu.transpose %16, [1, 0] : vector<8x32xf32> -> vector<32x8xf32>
    %cst_15 = arith.constant dense<0.000000e+00> : vector<32x32xf32>
    %20 = tpu.matmul %19, %17, %cst_15 {dimension_numbers = #tpu.dot_dimension_numbers<[1], [0], [0], [1], [0, 0, 1, 1], [], []>} : vector<32x8xf32>, vector<8x32xf32>, vector<32x32xf32> -> vector<32x32xf32>
    %cst_16 = arith.constant 0.176776692 : f32
    %21 = vector.broadcast %cst_16 : f32 to vector<32x32xf32>
    %22 = arith.mulf %20, %21 : vector<32x32xf32>
    %23 = arith.addf %22, %1 : vector<32x32xf32>
    %cst_17 = arith.constant dense<0xFF800000> : vector<32xf32>
    %24 = vector.multi_reduction <maximumf>, %23, %cst_17 [1] : vector<32x32xf32> to vector<32xf32>
    %25 = vector.shape_cast %24 : vector<32xf32> to vector<32x1xf32>
    %26 = vector.broadcast %25 : vector<32x1xf32> to vector<32x32xf32>
    %27 = arith.subf %23, %26 : vector<32x32xf32>
    %28 = math.exp %27 : vector<32x32xf32>
    %cst_18 = arith.constant dense<0.000000e+00> : vector<32xf32>
    %29 = vector.multi_reduction <add>, %28, %cst_18 [1] : vector<32x32xf32> to vector<32xf32>
    %30 = vector.shape_cast %29 : vector<32xf32> to vector<32x1xf32>
    %31 = tpu.reciprocal %30 {approx = true} : vector<32x1xf32> -> vector<32x1xf32>
    %32 = vector.broadcast %31 : vector<32x1xf32> to vector<32x32xf32>
    %33 = arith.mulf %28, %32 : vector<32x32xf32>
    %34 = vector.extract_strided_slice %18 {offsets = [0, 0], sizes = [8, 8], strides = [1, 1]} : vector<8x32xf32> to vector<8x8xf32>
    %35 = vector.extract_strided_slice %18 {offsets = [0, 8], sizes = [8, 8], strides = [1, 1]} : vector<8x32xf32> to vector<8x8xf32>
    %36 = vector.extract_strided_slice %18 {offsets = [0, 16], sizes = [8, 8], strides = [1, 1]} : vector<8x32xf32> to vector<8x8xf32>
    %37 = vector.extract_strided_slice %18 {offsets = [0, 24], sizes = [8, 8], strides = [1, 1]} : vector<8x32xf32> to vector<8x8xf32>
    %38 = tpu.concatenate %34, %35, %36, %37 in 0 : vector<8x8xf32>, vector<8x8xf32>, vector<8x8xf32>, vector<8x8xf32> -> vector<32x8xf32>
    %cst_19 = arith.constant dense<0.000000e+00> : vector<32x8xf32>
    %39 = tpu.matmul %33, %38, %cst_19 {dimension_numbers = #tpu.dot_dimension_numbers<[1], [0], [0], [1], [0, 0, 1, 1], [], []>} : vector<32x32xf32>, vector<32x8xf32>, vector<32x8xf32> -> vector<32x8xf32>
    %cst_20 = arith.constant dense<0.000000e+00> : vector<32x128xf32>
    %40 = tpu.matmul %39, %10, %cst_20 {dimension_numbers = #tpu.dot_dimension_numbers<[1], [0], [0], [1], [0, 0, 1, 1], [], []>} : vector<32x8xf32>, vector<8x128xf32>, vector<32x128xf32> -> vector<32x128xf32>
    %41 = vector.extract_strided_slice %40 {offsets = [0, 0], sizes = [8, 32], strides = [1, 1]} : vector<32x128xf32> to vector<8x32xf32>
    %42 = vector.extract_strided_slice %40 {offsets = [8, 32], sizes = [8, 32], strides = [1, 1]} : vector<32x128xf32> to vector<8x32xf32>
    %43 = arith.addf %41, %42 : vector<8x32xf32>
    %44 = vector.extract_strided_slice %40 {offsets = [16, 64], sizes = [8, 32], strides = [1, 1]} : vector<32x128xf32> to vector<8x32xf32>
    %45 = arith.addf %43, %44 : vector<8x32xf32>
    %46 = vector.extract_strided_slice %40 {offsets = [24, 96], sizes = [8, 32], strides = [1, 1]} : vector<32x128xf32> to vector<8x32xf32>
    %47 = arith.addf %45, %46 : vector<8x32xf32>
    %48 = vector.extract_strided_slice %8 {offsets = [1, 0], sizes = [1, 32], strides = [1, 1]} : vector<8x128xf32> to vector<1x32xf32>
    %49 = vector.broadcast %48 : vector<1x32xf32> to vector<8x32xf32>
    %50 = arith.addf %47, %49 : vector<8x32xf32>
    %51 = arith.addf %4, %50 : vector<8x32xf32>
    %52 = vector.extract_strided_slice %8 {offsets = [2, 0], sizes = [1, 32], strides = [1, 1]} : vector<8x128xf32> to vector<1x32xf32>
    %53 = vector.extract_strided_slice %8 {offsets = [3, 0], sizes = [1, 32], strides = [1, 1]} : vector<8x128xf32> to vector<1x32xf32>
    %cst_21 = arith.constant dense<0.000000e+00> : vector<8xf32>
    %54 = vector.multi_reduction <add>, %51, %cst_21 [1] : vector<8x32xf32> to vector<8xf32>
    %55 = vector.shape_cast %54 : vector<8xf32> to vector<8x1xf32>
    %cst_22 = arith.constant 3.200000e+01 : f32
    %56 = vector.broadcast %cst_22 : f32 to vector<8x1xf32>
    %57 = arith.divf %55, %56 : vector<8x1xf32>
    %58 = vector.broadcast %57 : vector<8x1xf32> to vector<8x32xf32>
    %59 = arith.subf %51, %58 : vector<8x32xf32>
    %60 = vector.broadcast %57 : vector<8x1xf32> to vector<8x32xf32>
    %61 = arith.subf %51, %60 : vector<8x32xf32>
    %62 = arith.mulf %59, %61 : vector<8x32xf32>
    %cst_23 = arith.constant dense<0.000000e+00> : vector<8xf32>
    %63 = vector.multi_reduction <add>, %62, %cst_23 [1] : vector<8x32xf32> to vector<8xf32>
    %64 = vector.shape_cast %63 : vector<8xf32> to vector<8x1xf32>
    %cst_24 = arith.constant 3.200000e+01 : f32
    %65 = vector.broadcast %cst_24 : f32 to vector<8x1xf32>
    %66 = arith.divf %64, %65 : vector<8x1xf32>
    %67 = vector.broadcast %57 : vector<8x1xf32> to vector<8x32xf32>
    %68 = arith.subf %51, %67 : vector<8x32xf32>
    %cst_25 = arith.constant 9.99999974E-6 : f32
    %69 = vector.broadcast %cst_25 : f32 to vector<8x1xf32>
    %70 = arith.addf %66, %69 : vector<8x1xf32>
    %71 = math.rsqrt %70 : vector<8x1xf32>
    %72 = vector.broadcast %71 : vector<8x1xf32> to vector<8x32xf32>
    %73 = arith.mulf %68, %72 : vector<8x32xf32>
    %74 = vector.broadcast %52 : vector<1x32xf32> to vector<8x32xf32>
    %75 = arith.mulf %73, %74 : vector<8x32xf32>
    %76 = vector.broadcast %53 : vector<1x32xf32> to vector<8x32xf32>
    %77 = arith.addf %75, %76 : vector<8x32xf32>
    %78 = vector.extract_strided_slice %6 {offsets = [0, 128], sizes = [32, 64], strides = [1, 1]} : vector<32x192xf32> to vector<32x64xf32>
    %cst_26 = arith.constant dense<0.000000e+00> : vector<8x64xf32>
    %79 = tpu.matmul %77, %78, %cst_26 {dimension_numbers = #tpu.dot_dimension_numbers<[1], [0], [0], [1], [0, 0, 1, 1], [], []>} : vector<8x32xf32>, vector<32x64xf32>, vector<8x64xf32> -> vector<8x64xf32>
    %80 = vector.extract_strided_slice %8 {offsets = [4, 0], sizes = [1, 64], strides = [1, 1]} : vector<8x128xf32> to vector<1x64xf32>
    %81 = vector.broadcast %80 : vector<1x64xf32> to vector<8x64xf32>
    %82 = arith.addf %79, %81 : vector<8x64xf32>
    %cst_27 = arith.constant 0.000000e+00 : f32
    %83 = vector.broadcast %cst_27 : f32 to vector<8x64xf32>
    %84 = arith.maximumf %82, %83 : vector<8x64xf32>
    %c0_28 = arith.constant 0 : index
    %c0_29 = arith.constant 0 : index
    %c0_30 = arith.constant 0 : index
    %85 = vector.load %arg4[%c0_28, %c0_29, %c0_30] : memref<2x64x32xf32, #tpu.memory_space<vmem>>, vector<1x64x32xf32>
    %86 = vector.shape_cast %85 : vector<1x64x32xf32> to vector<64x32xf32>
    %cst_31 = arith.constant dense<0.000000e+00> : vector<8x32xf32>
    %87 = tpu.matmul %84, %86, %cst_31 {dimension_numbers = #tpu.dot_dimension_numbers<[1], [0], [0], [1], [0, 0, 1, 1], [], []>} : vector<8x64xf32>, vector<64x32xf32>, vector<8x32xf32> -> vector<8x32xf32>
    %88 = vector.extract_strided_slice %8 {offsets = [5, 0], sizes = [1, 32], strides = [1, 1]} : vector<8x128xf32> to vector<1x32xf32>
    %89 = vector.broadcast %88 : vector<1x32xf32> to vector<8x32xf32>
    %90 = arith.addf %87, %89 : vector<8x32xf32>
    %91 = arith.addf %77, %90 : vector<8x32xf32>
    %92 = vector.extract_strided_slice %8 {offsets = [6, 0], sizes = [1, 32], strides = [1, 1]} : vector<8x128xf32> to vector<1x32xf32>
    %93 = vector.extract_strided_slice %8 {offsets = [7, 0], sizes = [1, 32], strides = [1, 1]} : vector<8x128xf32> to vector<1x32xf32>
    %cst_32 = arith.constant dense<0.000000e+00> : vector<8xf32>
    %94 = vector.multi_reduction <add>, %91, %cst_32 [1] : vector<8x32xf32> to vector<8xf32>
    %95 = vector.shape_cast %94 : vector<8xf32> to vector<8x1xf32>
    %cst_33 = arith.constant 3.200000e+01 : f32
    %96 = vector.broadcast %cst_33 : f32 to vector<8x1xf32>
    %97 = arith.divf %95, %96 : vector<8x1xf32>
    %98 = vector.broadcast %97 : vector<8x1xf32> to vector<8x32xf32>
    %99 = arith.subf %91, %98 : vector<8x32xf32>
    %100 = vector.broadcast %97 : vector<8x1xf32> to vector<8x32xf32>
    %101 = arith.subf %91, %100 : vector<8x32xf32>
    %102 = arith.mulf %99, %101 : vector<8x32xf32>
    %cst_34 = arith.constant dense<0.000000e+00> : vector<8xf32>
    %103 = vector.multi_reduction <add>, %102, %cst_34 [1] : vector<8x32xf32> to vector<8xf32>
    %104 = vector.shape_cast %103 : vector<8xf32> to vector<8x1xf32>
    %cst_35 = arith.constant 3.200000e+01 : f32
    %105 = vector.broadcast %cst_35 : f32 to vector<8x1xf32>
    %106 = arith.divf %104, %105 : vector<8x1xf32>
    %107 = vector.broadcast %97 : vector<8x1xf32> to vector<8x32xf32>
    %108 = arith.subf %91, %107 : vector<8x32xf32>
    %cst_36 = arith.constant 9.99999974E-6 : f32
    %109 = vector.broadcast %cst_36 : f32 to vector<8x1xf32>
    %110 = arith.addf %106, %109 : vector<8x1xf32>
    %111 = math.rsqrt %110 : vector<8x1xf32>
    %112 = vector.broadcast %111 : vector<8x1xf32> to vector<8x32xf32>
    %113 = arith.mulf %108, %112 : vector<8x32xf32>
    %114 = vector.broadcast %92 : vector<1x32xf32> to vector<8x32xf32>
    %115 = arith.mulf %113, %114 : vector<8x32xf32>
    %116 = vector.broadcast %93 : vector<1x32xf32> to vector<8x32xf32>
    %117 = arith.addf %115, %116 : vector<8x32xf32>
    %c1_37 = arith.constant 1 : index
    %c0_38 = arith.constant 0 : index
    %c0_39 = arith.constant 0 : index
    %118 = vector.load %arg3[%c1_37, %c0_38, %c0_39] : memref<2x32x192xf32, #tpu.memory_space<vmem>>, vector<1x32x192xf32>
    %119 = vector.shape_cast %118 : vector<1x32x192xf32> to vector<32x192xf32>
    %c1_40 = arith.constant 1 : index
    %c0_41 = arith.constant 0 : index
    %c0_42 = arith.constant 0 : index
    %120 = vector.load %arg5[%c1_40, %c0_41, %c0_42] : memref<2x8x128xf32, #tpu.memory_space<vmem>>, vector<1x8x128xf32>
    %121 = vector.shape_cast %120 : vector<1x8x128xf32> to vector<8x128xf32>
    %c1_43 = arith.constant 1 : index
    %c0_44 = arith.constant 0 : index
    %c0_45 = arith.constant 0 : index
    %122 = vector.load %arg6[%c1_43, %c0_44, %c0_45] : memref<2x8x128xf32, #tpu.memory_space<vmem>>, vector<1x8x128xf32>
    %123 = vector.shape_cast %122 : vector<1x8x128xf32> to vector<8x128xf32>
    %124 = vector.extract_strided_slice %119 {offsets = [0, 0], sizes = [32, 96], strides = [1, 1]} : vector<32x192xf32> to vector<32x96xf32>
    %cst_46 = arith.constant dense<0.000000e+00> : vector<8x96xf32>
    %125 = tpu.matmul %117, %124, %cst_46 {dimension_numbers = #tpu.dot_dimension_numbers<[1], [0], [0], [1], [0, 0, 1, 1], [], []>} : vector<8x32xf32>, vector<32x96xf32>, vector<8x96xf32> -> vector<8x96xf32>
    %126 = vector.extract_strided_slice %121 {offsets = [0, 0], sizes = [1, 96], strides = [1, 1]} : vector<8x128xf32> to vector<1x96xf32>
    %127 = vector.broadcast %126 : vector<1x96xf32> to vector<8x96xf32>
    %128 = arith.addf %125, %127 : vector<8x96xf32>
    %129 = vector.extract_strided_slice %128 {offsets = [0, 0], sizes = [8, 32], strides = [1, 1]} : vector<8x96xf32> to vector<8x32xf32>
    %130 = vector.extract_strided_slice %128 {offsets = [0, 32], sizes = [8, 32], strides = [1, 1]} : vector<8x96xf32> to vector<8x32xf32>
    %131 = vector.extract_strided_slice %128 {offsets = [0, 64], sizes = [8, 32], strides = [1, 1]} : vector<8x96xf32> to vector<8x32xf32>
    %132 = tpu.transpose %129, [1, 0] : vector<8x32xf32> -> vector<32x8xf32>
    %cst_47 = arith.constant dense<0.000000e+00> : vector<32x32xf32>
    %133 = tpu.matmul %132, %130, %cst_47 {dimension_numbers = #tpu.dot_dimension_numbers<[1], [0], [0], [1], [0, 0, 1, 1], [], []>} : vector<32x8xf32>, vector<8x32xf32>, vector<32x32xf32> -> vector<32x32xf32>
    %cst_48 = arith.constant 0.176776692 : f32
    %134 = vector.broadcast %cst_48 : f32 to vector<32x32xf32>
    %135 = arith.mulf %133, %134 : vector<32x32xf32>
    %136 = arith.addf %135, %1 : vector<32x32xf32>
    %cst_49 = arith.constant dense<0xFF800000> : vector<32xf32>
    %137 = vector.multi_reduction <maximumf>, %136, %cst_49 [1] : vector<32x32xf32> to vector<32xf32>
    %138 = vector.shape_cast %137 : vector<32xf32> to vector<32x1xf32>
    %139 = vector.broadcast %138 : vector<32x1xf32> to vector<32x32xf32>
    %140 = arith.subf %136, %139 : vector<32x32xf32>
    %141 = math.exp %140 : vector<32x32xf32>
    %cst_50 = arith.constant dense<0.000000e+00> : vector<32xf32>
    %142 = vector.multi_reduction <add>, %141, %cst_50 [1] : vector<32x32xf32> to vector<32xf32>
    %143 = vector.shape_cast %142 : vector<32xf32> to vector<32x1xf32>
    %144 = tpu.reciprocal %143 {approx = true} : vector<32x1xf32> -> vector<32x1xf32>
    %145 = vector.broadcast %144 : vector<32x1xf32> to vector<32x32xf32>
    %146 = arith.mulf %141, %145 : vector<32x32xf32>
    %147 = vector.extract_strided_slice %131 {offsets = [0, 0], sizes = [8, 8], strides = [1, 1]} : vector<8x32xf32> to vector<8x8xf32>
    %148 = vector.extract_strided_slice %131 {offsets = [0, 8], sizes = [8, 8], strides = [1, 1]} : vector<8x32xf32> to vector<8x8xf32>
    %149 = vector.extract_strided_slice %131 {offsets = [0, 16], sizes = [8, 8], strides = [1, 1]} : vector<8x32xf32> to vector<8x8xf32>
    %150 = vector.extract_strided_slice %131 {offsets = [0, 24], sizes = [8, 8], strides = [1, 1]} : vector<8x32xf32> to vector<8x8xf32>
    %151 = tpu.concatenate %147, %148, %149, %150 in 0 : vector<8x8xf32>, vector<8x8xf32>, vector<8x8xf32>, vector<8x8xf32> -> vector<32x8xf32>
    %cst_51 = arith.constant dense<0.000000e+00> : vector<32x8xf32>
    %152 = tpu.matmul %146, %151, %cst_51 {dimension_numbers = #tpu.dot_dimension_numbers<[1], [0], [0], [1], [0, 0, 1, 1], [], []>} : vector<32x32xf32>, vector<32x8xf32>, vector<32x8xf32> -> vector<32x8xf32>
    %cst_52 = arith.constant dense<0.000000e+00> : vector<32x128xf32>
    %153 = tpu.matmul %152, %123, %cst_52 {dimension_numbers = #tpu.dot_dimension_numbers<[1], [0], [0], [1], [0, 0, 1, 1], [], []>} : vector<32x8xf32>, vector<8x128xf32>, vector<32x128xf32> -> vector<32x128xf32>
    %154 = vector.extract_strided_slice %153 {offsets = [0, 0], sizes = [8, 32], strides = [1, 1]} : vector<32x128xf32> to vector<8x32xf32>
    %155 = vector.extract_strided_slice %153 {offsets = [8, 32], sizes = [8, 32], strides = [1, 1]} : vector<32x128xf32> to vector<8x32xf32>
    %156 = arith.addf %154, %155 : vector<8x32xf32>
    %157 = vector.extract_strided_slice %153 {offsets = [16, 64], sizes = [8, 32], strides = [1, 1]} : vector<32x128xf32> to vector<8x32xf32>
    %158 = arith.addf %156, %157 : vector<8x32xf32>
    %159 = vector.extract_strided_slice %153 {offsets = [24, 96], sizes = [8, 32], strides = [1, 1]} : vector<32x128xf32> to vector<8x32xf32>
    %160 = arith.addf %158, %159 : vector<8x32xf32>
    %161 = vector.extract_strided_slice %121 {offsets = [1, 0], sizes = [1, 32], strides = [1, 1]} : vector<8x128xf32> to vector<1x32xf32>
    %162 = vector.broadcast %161 : vector<1x32xf32> to vector<8x32xf32>
    %163 = arith.addf %160, %162 : vector<8x32xf32>
    %164 = arith.addf %117, %163 : vector<8x32xf32>
    %165 = vector.extract_strided_slice %121 {offsets = [2, 0], sizes = [1, 32], strides = [1, 1]} : vector<8x128xf32> to vector<1x32xf32>
    %166 = vector.extract_strided_slice %121 {offsets = [3, 0], sizes = [1, 32], strides = [1, 1]} : vector<8x128xf32> to vector<1x32xf32>
    %cst_53 = arith.constant dense<0.000000e+00> : vector<8xf32>
    %167 = vector.multi_reduction <add>, %164, %cst_53 [1] : vector<8x32xf32> to vector<8xf32>
    %168 = vector.shape_cast %167 : vector<8xf32> to vector<8x1xf32>
    %cst_54 = arith.constant 3.200000e+01 : f32
    %169 = vector.broadcast %cst_54 : f32 to vector<8x1xf32>
    %170 = arith.divf %168, %169 : vector<8x1xf32>
    %171 = vector.broadcast %170 : vector<8x1xf32> to vector<8x32xf32>
    %172 = arith.subf %164, %171 : vector<8x32xf32>
    %173 = vector.broadcast %170 : vector<8x1xf32> to vector<8x32xf32>
    %174 = arith.subf %164, %173 : vector<8x32xf32>
    %175 = arith.mulf %172, %174 : vector<8x32xf32>
    %cst_55 = arith.constant dense<0.000000e+00> : vector<8xf32>
    %176 = vector.multi_reduction <add>, %175, %cst_55 [1] : vector<8x32xf32> to vector<8xf32>
    %177 = vector.shape_cast %176 : vector<8xf32> to vector<8x1xf32>
    %cst_56 = arith.constant 3.200000e+01 : f32
    %178 = vector.broadcast %cst_56 : f32 to vector<8x1xf32>
    %179 = arith.divf %177, %178 : vector<8x1xf32>
    %180 = vector.broadcast %170 : vector<8x1xf32> to vector<8x32xf32>
    %181 = arith.subf %164, %180 : vector<8x32xf32>
    %cst_57 = arith.constant 9.99999974E-6 : f32
    %182 = vector.broadcast %cst_57 : f32 to vector<8x1xf32>
    %183 = arith.addf %179, %182 : vector<8x1xf32>
    %184 = math.rsqrt %183 : vector<8x1xf32>
    %185 = vector.broadcast %184 : vector<8x1xf32> to vector<8x32xf32>
    %186 = arith.mulf %181, %185 : vector<8x32xf32>
    %187 = vector.broadcast %165 : vector<1x32xf32> to vector<8x32xf32>
    %188 = arith.mulf %186, %187 : vector<8x32xf32>
    %189 = vector.broadcast %166 : vector<1x32xf32> to vector<8x32xf32>
    %190 = arith.addf %188, %189 : vector<8x32xf32>
    %191 = vector.extract_strided_slice %119 {offsets = [0, 128], sizes = [32, 64], strides = [1, 1]} : vector<32x192xf32> to vector<32x64xf32>
    %cst_58 = arith.constant dense<0.000000e+00> : vector<8x64xf32>
    %192 = tpu.matmul %190, %191, %cst_58 {dimension_numbers = #tpu.dot_dimension_numbers<[1], [0], [0], [1], [0, 0, 1, 1], [], []>} : vector<8x32xf32>, vector<32x64xf32>, vector<8x64xf32> -> vector<8x64xf32>
    %193 = vector.extract_strided_slice %121 {offsets = [4, 0], sizes = [1, 64], strides = [1, 1]} : vector<8x128xf32> to vector<1x64xf32>
    %194 = vector.broadcast %193 : vector<1x64xf32> to vector<8x64xf32>
    %195 = arith.addf %192, %194 : vector<8x64xf32>
    %cst_59 = arith.constant 0.000000e+00 : f32
    %196 = vector.broadcast %cst_59 : f32 to vector<8x64xf32>
    %197 = arith.maximumf %195, %196 : vector<8x64xf32>
    %c1_60 = arith.constant 1 : index
    %c0_61 = arith.constant 0 : index
    %c0_62 = arith.constant 0 : index
    %198 = vector.load %arg4[%c1_60, %c0_61, %c0_62] : memref<2x64x32xf32, #tpu.memory_space<vmem>>, vector<1x64x32xf32>
    %199 = vector.shape_cast %198 : vector<1x64x32xf32> to vector<64x32xf32>
    %cst_63 = arith.constant dense<0.000000e+00> : vector<8x32xf32>
    %200 = tpu.matmul %197, %199, %cst_63 {dimension_numbers = #tpu.dot_dimension_numbers<[1], [0], [0], [1], [0, 0, 1, 1], [], []>} : vector<8x64xf32>, vector<64x32xf32>, vector<8x32xf32> -> vector<8x32xf32>
    %201 = vector.extract_strided_slice %121 {offsets = [5, 0], sizes = [1, 32], strides = [1, 1]} : vector<8x128xf32> to vector<1x32xf32>
    %202 = vector.broadcast %201 : vector<1x32xf32> to vector<8x32xf32>
    %203 = arith.addf %200, %202 : vector<8x32xf32>
    %204 = arith.addf %190, %203 : vector<8x32xf32>
    %205 = vector.extract_strided_slice %121 {offsets = [6, 0], sizes = [1, 32], strides = [1, 1]} : vector<8x128xf32> to vector<1x32xf32>
    %206 = vector.extract_strided_slice %121 {offsets = [7, 0], sizes = [1, 32], strides = [1, 1]} : vector<8x128xf32> to vector<1x32xf32>
    %cst_64 = arith.constant dense<0.000000e+00> : vector<8xf32>
    %207 = vector.multi_reduction <add>, %204, %cst_64 [1] : vector<8x32xf32> to vector<8xf32>
    %208 = vector.shape_cast %207 : vector<8xf32> to vector<8x1xf32>
    %cst_65 = arith.constant 3.200000e+01 : f32
    %209 = vector.broadcast %cst_65 : f32 to vector<8x1xf32>
    %210 = arith.divf %208, %209 : vector<8x1xf32>
    %211 = vector.broadcast %210 : vector<8x1xf32> to vector<8x32xf32>
    %212 = arith.subf %204, %211 : vector<8x32xf32>
    %213 = vector.broadcast %210 : vector<8x1xf32> to vector<8x32xf32>
    %214 = arith.subf %204, %213 : vector<8x32xf32>
    %215 = arith.mulf %212, %214 : vector<8x32xf32>
    %cst_66 = arith.constant dense<0.000000e+00> : vector<8xf32>
    %216 = vector.multi_reduction <add>, %215, %cst_66 [1] : vector<8x32xf32> to vector<8xf32>
    %217 = vector.shape_cast %216 : vector<8xf32> to vector<8x1xf32>
    %cst_67 = arith.constant 3.200000e+01 : f32
    %218 = vector.broadcast %cst_67 : f32 to vector<8x1xf32>
    %219 = arith.divf %217, %218 : vector<8x1xf32>
    %220 = vector.broadcast %210 : vector<8x1xf32> to vector<8x32xf32>
    %221 = arith.subf %204, %220 : vector<8x32xf32>
    %cst_68 = arith.constant 9.99999974E-6 : f32
    %222 = vector.broadcast %cst_68 : f32 to vector<8x1xf32>
    %223 = arith.addf %219, %222 : vector<8x1xf32>
    %224 = math.rsqrt %223 : vector<8x1xf32>
    %225 = vector.broadcast %224 : vector<8x1xf32> to vector<8x32xf32>
    %226 = arith.mulf %221, %225 : vector<8x32xf32>
    %227 = vector.broadcast %205 : vector<1x32xf32> to vector<8x32xf32>
    %228 = arith.mulf %226, %227 : vector<8x32xf32>
    %229 = vector.broadcast %206 : vector<1x32xf32> to vector<8x32xf32>
    %230 = arith.addf %228, %229 : vector<8x32xf32>
    %c0_69 = arith.constant 0 : index
    %c0_70 = arith.constant 0 : index
    %231 = vector.load %arg1[%c0_69, %c0_70] : memref<8x32xf32, #tpu.memory_space<vmem>>, vector<8x32xf32>
    %c0_71 = arith.constant 0 : index
    %c0_72 = arith.constant 0 : index
    %c0_73 = arith.constant 0 : index
    %232 = vector.load %arg7[%c0_71, %c0_72, %c0_73] : memref<2x32x256xf32, #tpu.memory_space<vmem>>, vector<1x32x256xf32>
    %233 = vector.shape_cast %232 : vector<1x32x256xf32> to vector<32x256xf32>
    %c0_74 = arith.constant 0 : index
    %c0_75 = arith.constant 0 : index
    %c0_76 = arith.constant 0 : index
    %234 = vector.load %arg9[%c0_74, %c0_75, %c0_76] : memref<2x13x128xf32, #tpu.memory_space<vmem>>, vector<1x13x128xf32>
    %235 = vector.shape_cast %234 : vector<1x13x128xf32> to vector<13x128xf32>
    %c0_77 = arith.constant 0 : index
    %c0_78 = arith.constant 0 : index
    %c0_79 = arith.constant 0 : index
    %236 = vector.load %arg10[%c0_77, %c0_78, %c0_79] : memref<2x16x128xf32, #tpu.memory_space<vmem>>, vector<1x16x128xf32>
    %237 = vector.shape_cast %236 : vector<1x16x128xf32> to vector<16x128xf32>
    %238 = vector.extract_strided_slice %233 {offsets = [0, 0], sizes = [32, 96], strides = [1, 1]} : vector<32x256xf32> to vector<32x96xf32>
    %cst_80 = arith.constant dense<0.000000e+00> : vector<8x96xf32>
    %239 = tpu.matmul %231, %238, %cst_80 {dimension_numbers = #tpu.dot_dimension_numbers<[1], [0], [0], [1], [0, 0, 1, 1], [], []>} : vector<8x32xf32>, vector<32x96xf32>, vector<8x96xf32> -> vector<8x96xf32>
    %240 = vector.extract_strided_slice %235 {offsets = [0, 0], sizes = [1, 96], strides = [1, 1]} : vector<13x128xf32> to vector<1x96xf32>
    %241 = vector.broadcast %240 : vector<1x96xf32> to vector<8x96xf32>
    %242 = arith.addf %239, %241 : vector<8x96xf32>
    %243 = vector.extract_strided_slice %242 {offsets = [0, 0], sizes = [8, 32], strides = [1, 1]} : vector<8x96xf32> to vector<8x32xf32>
    %244 = vector.extract_strided_slice %242 {offsets = [0, 32], sizes = [8, 32], strides = [1, 1]} : vector<8x96xf32> to vector<8x32xf32>
    %245 = vector.extract_strided_slice %242 {offsets = [0, 64], sizes = [8, 32], strides = [1, 1]} : vector<8x96xf32> to vector<8x32xf32>
    %246 = vector.extract_strided_slice %237 {offsets = [0, 0], sizes = [8, 128], strides = [1, 1]} : vector<16x128xf32> to vector<8x128xf32>
    %247 = tpu.transpose %243, [1, 0] : vector<8x32xf32> -> vector<32x8xf32>
    %cst_81 = arith.constant dense<0.000000e+00> : vector<32x32xf32>
    %248 = tpu.matmul %247, %244, %cst_81 {dimension_numbers = #tpu.dot_dimension_numbers<[1], [0], [0], [1], [0, 0, 1, 1], [], []>} : vector<32x8xf32>, vector<8x32xf32>, vector<32x32xf32> -> vector<32x32xf32>
    %cst_82 = arith.constant 0.176776692 : f32
    %249 = vector.broadcast %cst_82 : f32 to vector<32x32xf32>
    %250 = arith.mulf %248, %249 : vector<32x32xf32>
    %251 = arith.addf %250, %1 : vector<32x32xf32>
    %cst_83 = arith.constant dense<0xFF800000> : vector<32xf32>
    %252 = vector.multi_reduction <maximumf>, %251, %cst_83 [1] : vector<32x32xf32> to vector<32xf32>
    %253 = vector.shape_cast %252 : vector<32xf32> to vector<32x1xf32>
    %254 = vector.broadcast %253 : vector<32x1xf32> to vector<32x32xf32>
    %255 = arith.subf %251, %254 : vector<32x32xf32>
    %256 = math.exp %255 : vector<32x32xf32>
    %cst_84 = arith.constant dense<0.000000e+00> : vector<32xf32>
    %257 = vector.multi_reduction <add>, %256, %cst_84 [1] : vector<32x32xf32> to vector<32xf32>
    %258 = vector.shape_cast %257 : vector<32xf32> to vector<32x1xf32>
    %259 = tpu.reciprocal %258 {approx = true} : vector<32x1xf32> -> vector<32x1xf32>
    %260 = vector.broadcast %259 : vector<32x1xf32> to vector<32x32xf32>
    %261 = arith.mulf %256, %260 : vector<32x32xf32>
    %cst_85 = arith.constant 0.000000e+00 : f32
    %262 = vector.broadcast %cst_85 : f32 to vector<32x32xf32>
    %263 = arith.cmpf one, %3, %262 : vector<32x32xf32>
    %cst_86 = arith.constant -1.000000e+09 : f32
    %264 = vector.broadcast %cst_86 : f32 to vector<32x32xf32>
    %265 = arith.select %263, %264, %261 : vector<32x32xi1>, vector<32x32xf32>
    %266 = vector.extract_strided_slice %245 {offsets = [0, 0], sizes = [8, 8], strides = [1, 1]} : vector<8x32xf32> to vector<8x8xf32>
    %267 = vector.extract_strided_slice %245 {offsets = [0, 8], sizes = [8, 8], strides = [1, 1]} : vector<8x32xf32> to vector<8x8xf32>
    %268 = vector.extract_strided_slice %245 {offsets = [0, 16], sizes = [8, 8], strides = [1, 1]} : vector<8x32xf32> to vector<8x8xf32>
    %269 = vector.extract_strided_slice %245 {offsets = [0, 24], sizes = [8, 8], strides = [1, 1]} : vector<8x32xf32> to vector<8x8xf32>
    %270 = tpu.concatenate %266, %267, %268, %269 in 0 : vector<8x8xf32>, vector<8x8xf32>, vector<8x8xf32>, vector<8x8xf32> -> vector<32x8xf32>
    %cst_87 = arith.constant dense<0.000000e+00> : vector<32x8xf32>
    %271 = tpu.matmul %265, %270, %cst_87 {dimension_numbers = #tpu.dot_dimension_numbers<[1], [0], [0], [1], [0, 0, 1, 1], [], []>} : vector<32x32xf32>, vector<32x8xf32>, vector<32x8xf32> -> vector<32x8xf32>
    %cst_88 = arith.constant dense<0.000000e+00> : vector<32x128xf32>
    %272 = tpu.matmul %271, %246, %cst_88 {dimension_numbers = #tpu.dot_dimension_numbers<[1], [0], [0], [1], [0, 0, 1, 1], [], []>} : vector<32x8xf32>, vector<8x128xf32>, vector<32x128xf32> -> vector<32x128xf32>
    %273 = vector.extract_strided_slice %272 {offsets = [0, 0], sizes = [8, 32], strides = [1, 1]} : vector<32x128xf32> to vector<8x32xf32>
    %274 = vector.extract_strided_slice %272 {offsets = [8, 32], sizes = [8, 32], strides = [1, 1]} : vector<32x128xf32> to vector<8x32xf32>
    %275 = arith.addf %273, %274 : vector<8x32xf32>
    %276 = vector.extract_strided_slice %272 {offsets = [16, 64], sizes = [8, 32], strides = [1, 1]} : vector<32x128xf32> to vector<8x32xf32>
    %277 = arith.addf %275, %276 : vector<8x32xf32>
    %278 = vector.extract_strided_slice %272 {offsets = [24, 96], sizes = [8, 32], strides = [1, 1]} : vector<32x128xf32> to vector<8x32xf32>
    %279 = arith.addf %277, %278 : vector<8x32xf32>
    %280 = vector.extract_strided_slice %235 {offsets = [1, 0], sizes = [1, 32], strides = [1, 1]} : vector<13x128xf32> to vector<1x32xf32>
    %281 = vector.broadcast %280 : vector<1x32xf32> to vector<8x32xf32>
    %282 = arith.addf %279, %281 : vector<8x32xf32>
    %283 = arith.addf %231, %282 : vector<8x32xf32>
    %284 = vector.extract_strided_slice %235 {offsets = [2, 0], sizes = [1, 32], strides = [1, 1]} : vector<13x128xf32> to vector<1x32xf32>
    %285 = vector.extract_strided_slice %235 {offsets = [3, 0], sizes = [1, 32], strides = [1, 1]} : vector<13x128xf32> to vector<1x32xf32>
    %cst_89 = arith.constant dense<0.000000e+00> : vector<8xf32>
    %286 = vector.multi_reduction <add>, %283, %cst_89 [1] : vector<8x32xf32> to vector<8xf32>
    %287 = vector.shape_cast %286 : vector<8xf32> to vector<8x1xf32>
    %cst_90 = arith.constant 3.200000e+01 : f32
    %288 = vector.broadcast %cst_90 : f32 to vector<8x1xf32>
    %289 = arith.divf %287, %288 : vector<8x1xf32>
    %290 = vector.broadcast %289 : vector<8x1xf32> to vector<8x32xf32>
    %291 = arith.subf %283, %290 : vector<8x32xf32>
    %292 = vector.broadcast %289 : vector<8x1xf32> to vector<8x32xf32>
    %293 = arith.subf %283, %292 : vector<8x32xf32>
    %294 = arith.mulf %291, %293 : vector<8x32xf32>
    %cst_91 = arith.constant dense<0.000000e+00> : vector<8xf32>
    %295 = vector.multi_reduction <add>, %294, %cst_91 [1] : vector<8x32xf32> to vector<8xf32>
    %296 = vector.shape_cast %295 : vector<8xf32> to vector<8x1xf32>
    %cst_92 = arith.constant 3.200000e+01 : f32
    %297 = vector.broadcast %cst_92 : f32 to vector<8x1xf32>
    %298 = arith.divf %296, %297 : vector<8x1xf32>
    %299 = vector.broadcast %289 : vector<8x1xf32> to vector<8x32xf32>
    %300 = arith.subf %283, %299 : vector<8x32xf32>
    %cst_93 = arith.constant 9.99999974E-6 : f32
    %301 = vector.broadcast %cst_93 : f32 to vector<8x1xf32>
    %302 = arith.addf %298, %301 : vector<8x1xf32>
    %303 = math.rsqrt %302 : vector<8x1xf32>
    %304 = vector.broadcast %303 : vector<8x1xf32> to vector<8x32xf32>
    %305 = arith.mulf %300, %304 : vector<8x32xf32>
    %306 = vector.broadcast %284 : vector<1x32xf32> to vector<8x32xf32>
    %307 = arith.mulf %305, %306 : vector<8x32xf32>
    %308 = vector.broadcast %285 : vector<1x32xf32> to vector<8x32xf32>
    %309 = arith.addf %307, %308 : vector<8x32xf32>
    %310 = vector.extract_strided_slice %233 {offsets = [0, 96], sizes = [32, 32], strides = [1, 1]} : vector<32x256xf32> to vector<32x32xf32>
    %cst_94 = arith.constant dense<0.000000e+00> : vector<8x32xf32>
    %311 = tpu.matmul %309, %310, %cst_94 {dimension_numbers = #tpu.dot_dimension_numbers<[1], [0], [0], [1], [0, 0, 1, 1], [], []>} : vector<8x32xf32>, vector<32x32xf32>, vector<8x32xf32> -> vector<8x32xf32>
    %312 = vector.extract_strided_slice %235 {offsets = [4, 0], sizes = [1, 32], strides = [1, 1]} : vector<13x128xf32> to vector<1x32xf32>
    %313 = vector.broadcast %312 : vector<1x32xf32> to vector<8x32xf32>
    %314 = arith.addf %311, %313 : vector<8x32xf32>
    %315 = vector.extract_strided_slice %233 {offsets = [0, 128], sizes = [32, 64], strides = [1, 1]} : vector<32x256xf32> to vector<32x64xf32>
    %cst_95 = arith.constant dense<0.000000e+00> : vector<8x64xf32>
    %316 = tpu.matmul %230, %315, %cst_95 {dimension_numbers = #tpu.dot_dimension_numbers<[1], [0], [0], [1], [0, 0, 1, 1], [], []>} : vector<8x32xf32>, vector<32x64xf32>, vector<8x64xf32> -> vector<8x64xf32>
    %317 = vector.extract_strided_slice %235 {offsets = [5, 0], sizes = [1, 64], strides = [1, 1]} : vector<13x128xf32> to vector<1x64xf32>
    %318 = vector.broadcast %317 : vector<1x64xf32> to vector<8x64xf32>
    %319 = arith.addf %316, %318 : vector<8x64xf32>
    %320 = vector.extract_strided_slice %319 {offsets = [0, 0], sizes = [8, 32], strides = [1, 1]} : vector<8x64xf32> to vector<8x32xf32>
    %321 = vector.extract_strided_slice %319 {offsets = [0, 32], sizes = [8, 32], strides = [1, 1]} : vector<8x64xf32> to vector<8x32xf32>
    %322 = vector.extract_strided_slice %237 {offsets = [8, 0], sizes = [8, 128], strides = [1, 1]} : vector<16x128xf32> to vector<8x128xf32>
    %323 = tpu.transpose %314, [1, 0] : vector<8x32xf32> -> vector<32x8xf32>
    %cst_96 = arith.constant dense<0.000000e+00> : vector<32x32xf32>
    %324 = tpu.matmul %323, %320, %cst_96 {dimension_numbers = #tpu.dot_dimension_numbers<[1], [0], [0], [1], [0, 0, 1, 1], [], []>} : vector<32x8xf32>, vector<8x32xf32>, vector<32x32xf32> -> vector<32x32xf32>
    %cst_97 = arith.constant 0.176776692 : f32
    %325 = vector.broadcast %cst_97 : f32 to vector<32x32xf32>
    %326 = arith.mulf %324, %325 : vector<32x32xf32>
    %327 = arith.addf %326, %1 : vector<32x32xf32>
    %cst_98 = arith.constant dense<0xFF800000> : vector<32xf32>
    %328 = vector.multi_reduction <maximumf>, %327, %cst_98 [1] : vector<32x32xf32> to vector<32xf32>
    %329 = vector.shape_cast %328 : vector<32xf32> to vector<32x1xf32>
    %330 = vector.broadcast %329 : vector<32x1xf32> to vector<32x32xf32>
    %331 = arith.subf %327, %330 : vector<32x32xf32>
    %332 = math.exp %331 : vector<32x32xf32>
    %cst_99 = arith.constant dense<0.000000e+00> : vector<32xf32>
    %333 = vector.multi_reduction <add>, %332, %cst_99 [1] : vector<32x32xf32> to vector<32xf32>
    %334 = vector.shape_cast %333 : vector<32xf32> to vector<32x1xf32>
    %335 = tpu.reciprocal %334 {approx = true} : vector<32x1xf32> -> vector<32x1xf32>
    %336 = vector.broadcast %335 : vector<32x1xf32> to vector<32x32xf32>
    %337 = arith.mulf %332, %336 : vector<32x32xf32>
    %338 = vector.extract_strided_slice %321 {offsets = [0, 0], sizes = [8, 8], strides = [1, 1]} : vector<8x32xf32> to vector<8x8xf32>
    %339 = vector.extract_strided_slice %321 {offsets = [0, 8], sizes = [8, 8], strides = [1, 1]} : vector<8x32xf32> to vector<8x8xf32>
    %340 = vector.extract_strided_slice %321 {offsets = [0, 16], sizes = [8, 8], strides = [1, 1]} : vector<8x32xf32> to vector<8x8xf32>
    %341 = vector.extract_strided_slice %321 {offsets = [0, 24], sizes = [8, 8], strides = [1, 1]} : vector<8x32xf32> to vector<8x8xf32>
    %342 = tpu.concatenate %338, %339, %340, %341 in 0 : vector<8x8xf32>, vector<8x8xf32>, vector<8x8xf32>, vector<8x8xf32> -> vector<32x8xf32>
    %cst_100 = arith.constant dense<0.000000e+00> : vector<32x8xf32>
    %343 = tpu.matmul %337, %342, %cst_100 {dimension_numbers = #tpu.dot_dimension_numbers<[1], [0], [0], [1], [0, 0, 1, 1], [], []>} : vector<32x32xf32>, vector<32x8xf32>, vector<32x8xf32> -> vector<32x8xf32>
    %cst_101 = arith.constant dense<0.000000e+00> : vector<32x128xf32>
    %344 = tpu.matmul %343, %322, %cst_101 {dimension_numbers = #tpu.dot_dimension_numbers<[1], [0], [0], [1], [0, 0, 1, 1], [], []>} : vector<32x8xf32>, vector<8x128xf32>, vector<32x128xf32> -> vector<32x128xf32>
    %345 = vector.extract_strided_slice %344 {offsets = [0, 0], sizes = [8, 32], strides = [1, 1]} : vector<32x128xf32> to vector<8x32xf32>
    %346 = vector.extract_strided_slice %344 {offsets = [8, 32], sizes = [8, 32], strides = [1, 1]} : vector<32x128xf32> to vector<8x32xf32>
    %347 = arith.addf %345, %346 : vector<8x32xf32>
    %348 = vector.extract_strided_slice %344 {offsets = [16, 64], sizes = [8, 32], strides = [1, 1]} : vector<32x128xf32> to vector<8x32xf32>
    %349 = arith.addf %347, %348 : vector<8x32xf32>
    %350 = vector.extract_strided_slice %344 {offsets = [24, 96], sizes = [8, 32], strides = [1, 1]} : vector<32x128xf32> to vector<8x32xf32>
    %351 = arith.addf %349, %350 : vector<8x32xf32>
    %352 = vector.extract_strided_slice %235 {offsets = [6, 0], sizes = [1, 32], strides = [1, 1]} : vector<13x128xf32> to vector<1x32xf32>
    %353 = vector.broadcast %352 : vector<1x32xf32> to vector<8x32xf32>
    %354 = arith.addf %351, %353 : vector<8x32xf32>
    %355 = arith.addf %309, %354 : vector<8x32xf32>
    %356 = vector.extract_strided_slice %235 {offsets = [7, 0], sizes = [1, 32], strides = [1, 1]} : vector<13x128xf32> to vector<1x32xf32>
    %357 = vector.extract_strided_slice %235 {offsets = [8, 0], sizes = [1, 32], strides = [1, 1]} : vector<13x128xf32> to vector<1x32xf32>
    %cst_102 = arith.constant dense<0.000000e+00> : vector<8xf32>
    %358 = vector.multi_reduction <add>, %355, %cst_102 [1] : vector<8x32xf32> to vector<8xf32>
    %359 = vector.shape_cast %358 : vector<8xf32> to vector<8x1xf32>
    %cst_103 = arith.constant 3.200000e+01 : f32
    %360 = vector.broadcast %cst_103 : f32 to vector<8x1xf32>
    %361 = arith.divf %359, %360 : vector<8x1xf32>
    %362 = vector.broadcast %361 : vector<8x1xf32> to vector<8x32xf32>
    %363 = arith.subf %355, %362 : vector<8x32xf32>
    %364 = vector.broadcast %361 : vector<8x1xf32> to vector<8x32xf32>
    %365 = arith.subf %355, %364 : vector<8x32xf32>
    %366 = arith.mulf %363, %365 : vector<8x32xf32>
    %cst_104 = arith.constant dense<0.000000e+00> : vector<8xf32>
    %367 = vector.multi_reduction <add>, %366, %cst_104 [1] : vector<8x32xf32> to vector<8xf32>
    %368 = vector.shape_cast %367 : vector<8xf32> to vector<8x1xf32>
    %cst_105 = arith.constant 3.200000e+01 : f32
    %369 = vector.broadcast %cst_105 : f32 to vector<8x1xf32>
    %370 = arith.divf %368, %369 : vector<8x1xf32>
    %371 = vector.broadcast %361 : vector<8x1xf32> to vector<8x32xf32>
    %372 = arith.subf %355, %371 : vector<8x32xf32>
    %cst_106 = arith.constant 9.99999974E-6 : f32
    %373 = vector.broadcast %cst_106 : f32 to vector<8x1xf32>
    %374 = arith.addf %370, %373 : vector<8x1xf32>
    %375 = math.rsqrt %374 : vector<8x1xf32>
    %376 = vector.broadcast %375 : vector<8x1xf32> to vector<8x32xf32>
    %377 = arith.mulf %372, %376 : vector<8x32xf32>
    %378 = vector.broadcast %356 : vector<1x32xf32> to vector<8x32xf32>
    %379 = arith.mulf %377, %378 : vector<8x32xf32>
    %380 = vector.broadcast %357 : vector<1x32xf32> to vector<8x32xf32>
    %381 = arith.addf %379, %380 : vector<8x32xf32>
    %382 = vector.extract_strided_slice %233 {offsets = [0, 192], sizes = [32, 64], strides = [1, 1]} : vector<32x256xf32> to vector<32x64xf32>
    %cst_107 = arith.constant dense<0.000000e+00> : vector<8x64xf32>
    %383 = tpu.matmul %381, %382, %cst_107 {dimension_numbers = #tpu.dot_dimension_numbers<[1], [0], [0], [1], [0, 0, 1, 1], [], []>} : vector<8x32xf32>, vector<32x64xf32>, vector<8x64xf32> -> vector<8x64xf32>
    %384 = vector.extract_strided_slice %235 {offsets = [9, 0], sizes = [1, 64], strides = [1, 1]} : vector<13x128xf32> to vector<1x64xf32>
    %385 = vector.broadcast %384 : vector<1x64xf32> to vector<8x64xf32>
    %386 = arith.addf %383, %385 : vector<8x64xf32>
    %cst_108 = arith.constant 0.000000e+00 : f32
    %387 = vector.broadcast %cst_108 : f32 to vector<8x64xf32>
    %388 = arith.maximumf %386, %387 : vector<8x64xf32>
    %c0_109 = arith.constant 0 : index
    %c0_110 = arith.constant 0 : index
    %c0_111 = arith.constant 0 : index
    %389 = vector.load %arg8[%c0_109, %c0_110, %c0_111] : memref<2x64x32xf32, #tpu.memory_space<vmem>>, vector<1x64x32xf32>
    %390 = vector.shape_cast %389 : vector<1x64x32xf32> to vector<64x32xf32>
    %cst_112 = arith.constant dense<0.000000e+00> : vector<8x32xf32>
    %391 = tpu.matmul %388, %390, %cst_112 {dimension_numbers = #tpu.dot_dimension_numbers<[1], [0], [0], [1], [0, 0, 1, 1], [], []>} : vector<8x64xf32>, vector<64x32xf32>, vector<8x32xf32> -> vector<8x32xf32>
    %392 = vector.extract_strided_slice %235 {offsets = [10, 0], sizes = [1, 32], strides = [1, 1]} : vector<13x128xf32> to vector<1x32xf32>
    %393 = vector.broadcast %392 : vector<1x32xf32> to vector<8x32xf32>
    %394 = arith.addf %391, %393 : vector<8x32xf32>
    %395 = arith.addf %381, %394 : vector<8x32xf32>
    %396 = vector.extract_strided_slice %235 {offsets = [11, 0], sizes = [1, 32], strides = [1, 1]} : vector<13x128xf32> to vector<1x32xf32>
    %397 = vector.extract_strided_slice %235 {offsets = [12, 0], sizes = [1, 32], strides = [1, 1]} : vector<13x128xf32> to vector<1x32xf32>
    %cst_113 = arith.constant dense<0.000000e+00> : vector<8xf32>
    %398 = vector.multi_reduction <add>, %395, %cst_113 [1] : vector<8x32xf32> to vector<8xf32>
    %399 = vector.shape_cast %398 : vector<8xf32> to vector<8x1xf32>
    %cst_114 = arith.constant 3.200000e+01 : f32
    %400 = vector.broadcast %cst_114 : f32 to vector<8x1xf32>
    %401 = arith.divf %399, %400 : vector<8x1xf32>
    %402 = vector.broadcast %401 : vector<8x1xf32> to vector<8x32xf32>
    %403 = arith.subf %395, %402 : vector<8x32xf32>
    %404 = vector.broadcast %401 : vector<8x1xf32> to vector<8x32xf32>
    %405 = arith.subf %395, %404 : vector<8x32xf32>
    %406 = arith.mulf %403, %405 : vector<8x32xf32>
    %cst_115 = arith.constant dense<0.000000e+00> : vector<8xf32>
    %407 = vector.multi_reduction <add>, %406, %cst_115 [1] : vector<8x32xf32> to vector<8xf32>
    %408 = vector.shape_cast %407 : vector<8xf32> to vector<8x1xf32>
    %cst_116 = arith.constant 3.200000e+01 : f32
    %409 = vector.broadcast %cst_116 : f32 to vector<8x1xf32>
    %410 = arith.divf %408, %409 : vector<8x1xf32>
    %411 = vector.broadcast %401 : vector<8x1xf32> to vector<8x32xf32>
    %412 = arith.subf %395, %411 : vector<8x32xf32>
    %cst_117 = arith.constant 9.99999974E-6 : f32
    %413 = vector.broadcast %cst_117 : f32 to vector<8x1xf32>
    %414 = arith.addf %410, %413 : vector<8x1xf32>
    %415 = math.rsqrt %414 : vector<8x1xf32>
    %416 = vector.broadcast %415 : vector<8x1xf32> to vector<8x32xf32>
    %417 = arith.mulf %412, %416 : vector<8x32xf32>
    %418 = vector.broadcast %396 : vector<1x32xf32> to vector<8x32xf32>
    %419 = arith.mulf %417, %418 : vector<8x32xf32>
    %420 = vector.broadcast %397 : vector<1x32xf32> to vector<8x32xf32>
    %421 = arith.addf %419, %420 : vector<8x32xf32>
    %c1_118 = arith.constant 1 : index
    %c0_119 = arith.constant 0 : index
    %c0_120 = arith.constant 0 : index
    %422 = vector.load %arg7[%c1_118, %c0_119, %c0_120] : memref<2x32x256xf32, #tpu.memory_space<vmem>>, vector<1x32x256xf32>
    %423 = vector.shape_cast %422 : vector<1x32x256xf32> to vector<32x256xf32>
    %c1_121 = arith.constant 1 : index
    %c0_122 = arith.constant 0 : index
    %c0_123 = arith.constant 0 : index
    %424 = vector.load %arg9[%c1_121, %c0_122, %c0_123] : memref<2x13x128xf32, #tpu.memory_space<vmem>>, vector<1x13x128xf32>
    %425 = vector.shape_cast %424 : vector<1x13x128xf32> to vector<13x128xf32>
    %c1_124 = arith.constant 1 : index
    %c0_125 = arith.constant 0 : index
    %c0_126 = arith.constant 0 : index
    %426 = vector.load %arg10[%c1_124, %c0_125, %c0_126] : memref<2x16x128xf32, #tpu.memory_space<vmem>>, vector<1x16x128xf32>
    %427 = vector.shape_cast %426 : vector<1x16x128xf32> to vector<16x128xf32>
    %428 = vector.extract_strided_slice %423 {offsets = [0, 0], sizes = [32, 96], strides = [1, 1]} : vector<32x256xf32> to vector<32x96xf32>
    %cst_127 = arith.constant dense<0.000000e+00> : vector<8x96xf32>
    %429 = tpu.matmul %421, %428, %cst_127 {dimension_numbers = #tpu.dot_dimension_numbers<[1], [0], [0], [1], [0, 0, 1, 1], [], []>} : vector<8x32xf32>, vector<32x96xf32>, vector<8x96xf32> -> vector<8x96xf32>
    %430 = vector.extract_strided_slice %425 {offsets = [0, 0], sizes = [1, 96], strides = [1, 1]} : vector<13x128xf32> to vector<1x96xf32>
    %431 = vector.broadcast %430 : vector<1x96xf32> to vector<8x96xf32>
    %432 = arith.addf %429, %431 : vector<8x96xf32>
    %433 = vector.extract_strided_slice %432 {offsets = [0, 0], sizes = [8, 32], strides = [1, 1]} : vector<8x96xf32> to vector<8x32xf32>
    %434 = vector.extract_strided_slice %432 {offsets = [0, 32], sizes = [8, 32], strides = [1, 1]} : vector<8x96xf32> to vector<8x32xf32>
    %435 = vector.extract_strided_slice %432 {offsets = [0, 64], sizes = [8, 32], strides = [1, 1]} : vector<8x96xf32> to vector<8x32xf32>
    %436 = vector.extract_strided_slice %427 {offsets = [0, 0], sizes = [8, 128], strides = [1, 1]} : vector<16x128xf32> to vector<8x128xf32>
    %437 = tpu.transpose %433, [1, 0] : vector<8x32xf32> -> vector<32x8xf32>
    %cst_128 = arith.constant dense<0.000000e+00> : vector<32x32xf32>
    %438 = tpu.matmul %437, %434, %cst_128 {dimension_numbers = #tpu.dot_dimension_numbers<[1], [0], [0], [1], [0, 0, 1, 1], [], []>} : vector<32x8xf32>, vector<8x32xf32>, vector<32x32xf32> -> vector<32x32xf32>
    %cst_129 = arith.constant 0.176776692 : f32
    %439 = vector.broadcast %cst_129 : f32 to vector<32x32xf32>
    %440 = arith.mulf %438, %439 : vector<32x32xf32>
    %441 = arith.addf %440, %1 : vector<32x32xf32>
    %cst_130 = arith.constant dense<0xFF800000> : vector<32xf32>
    %442 = vector.multi_reduction <maximumf>, %441, %cst_130 [1] : vector<32x32xf32> to vector<32xf32>
    %443 = vector.shape_cast %442 : vector<32xf32> to vector<32x1xf32>
    %444 = vector.broadcast %443 : vector<32x1xf32> to vector<32x32xf32>
    %445 = arith.subf %441, %444 : vector<32x32xf32>
    %446 = math.exp %445 : vector<32x32xf32>
    %cst_131 = arith.constant dense<0.000000e+00> : vector<32xf32>
    %447 = vector.multi_reduction <add>, %446, %cst_131 [1] : vector<32x32xf32> to vector<32xf32>
    %448 = vector.shape_cast %447 : vector<32xf32> to vector<32x1xf32>
    %449 = tpu.reciprocal %448 {approx = true} : vector<32x1xf32> -> vector<32x1xf32>
    %450 = vector.broadcast %449 : vector<32x1xf32> to vector<32x32xf32>
    %451 = arith.mulf %446, %450 : vector<32x32xf32>
    %cst_132 = arith.constant 0.000000e+00 : f32
    %452 = vector.broadcast %cst_132 : f32 to vector<32x32xf32>
    %453 = arith.cmpf one, %3, %452 : vector<32x32xf32>
    %cst_133 = arith.constant -1.000000e+09 : f32
    %454 = vector.broadcast %cst_133 : f32 to vector<32x32xf32>
    %455 = arith.select %453, %454, %451 : vector<32x32xi1>, vector<32x32xf32>
    %456 = vector.extract_strided_slice %435 {offsets = [0, 0], sizes = [8, 8], strides = [1, 1]} : vector<8x32xf32> to vector<8x8xf32>
    %457 = vector.extract_strided_slice %435 {offsets = [0, 8], sizes = [8, 8], strides = [1, 1]} : vector<8x32xf32> to vector<8x8xf32>
    %458 = vector.extract_strided_slice %435 {offsets = [0, 16], sizes = [8, 8], strides = [1, 1]} : vector<8x32xf32> to vector<8x8xf32>
    %459 = vector.extract_strided_slice %435 {offsets = [0, 24], sizes = [8, 8], strides = [1, 1]} : vector<8x32xf32> to vector<8x8xf32>
    %460 = tpu.concatenate %456, %457, %458, %459 in 0 : vector<8x8xf32>, vector<8x8xf32>, vector<8x8xf32>, vector<8x8xf32> -> vector<32x8xf32>
    %cst_134 = arith.constant dense<0.000000e+00> : vector<32x8xf32>
    %461 = tpu.matmul %455, %460, %cst_134 {dimension_numbers = #tpu.dot_dimension_numbers<[1], [0], [0], [1], [0, 0, 1, 1], [], []>} : vector<32x32xf32>, vector<32x8xf32>, vector<32x8xf32> -> vector<32x8xf32>
    %cst_135 = arith.constant dense<0.000000e+00> : vector<32x128xf32>
    %462 = tpu.matmul %461, %436, %cst_135 {dimension_numbers = #tpu.dot_dimension_numbers<[1], [0], [0], [1], [0, 0, 1, 1], [], []>} : vector<32x8xf32>, vector<8x128xf32>, vector<32x128xf32> -> vector<32x128xf32>
    %463 = vector.extract_strided_slice %462 {offsets = [0, 0], sizes = [8, 32], strides = [1, 1]} : vector<32x128xf32> to vector<8x32xf32>
    %464 = vector.extract_strided_slice %462 {offsets = [8, 32], sizes = [8, 32], strides = [1, 1]} : vector<32x128xf32> to vector<8x32xf32>
    %465 = arith.addf %463, %464 : vector<8x32xf32>
    %466 = vector.extract_strided_slice %462 {offsets = [16, 64], sizes = [8, 32], strides = [1, 1]} : vector<32x128xf32> to vector<8x32xf32>
    %467 = arith.addf %465, %466 : vector<8x32xf32>
    %468 = vector.extract_strided_slice %462 {offsets = [24, 96], sizes = [8, 32], strides = [1, 1]} : vector<32x128xf32> to vector<8x32xf32>
    %469 = arith.addf %467, %468 : vector<8x32xf32>
    %470 = vector.extract_strided_slice %425 {offsets = [1, 0], sizes = [1, 32], strides = [1, 1]} : vector<13x128xf32> to vector<1x32xf32>
    %471 = vector.broadcast %470 : vector<1x32xf32> to vector<8x32xf32>
    %472 = arith.addf %469, %471 : vector<8x32xf32>
    %473 = arith.addf %421, %472 : vector<8x32xf32>
    %474 = vector.extract_strided_slice %425 {offsets = [2, 0], sizes = [1, 32], strides = [1, 1]} : vector<13x128xf32> to vector<1x32xf32>
    %475 = vector.extract_strided_slice %425 {offsets = [3, 0], sizes = [1, 32], strides = [1, 1]} : vector<13x128xf32> to vector<1x32xf32>
    %cst_136 = arith.constant dense<0.000000e+00> : vector<8xf32>
    %476 = vector.multi_reduction <add>, %473, %cst_136 [1] : vector<8x32xf32> to vector<8xf32>
    %477 = vector.shape_cast %476 : vector<8xf32> to vector<8x1xf32>
    %cst_137 = arith.constant 3.200000e+01 : f32
    %478 = vector.broadcast %cst_137 : f32 to vector<8x1xf32>
    %479 = arith.divf %477, %478 : vector<8x1xf32>
    %480 = vector.broadcast %479 : vector<8x1xf32> to vector<8x32xf32>
    %481 = arith.subf %473, %480 : vector<8x32xf32>
    %482 = vector.broadcast %479 : vector<8x1xf32> to vector<8x32xf32>
    %483 = arith.subf %473, %482 : vector<8x32xf32>
    %484 = arith.mulf %481, %483 : vector<8x32xf32>
    %cst_138 = arith.constant dense<0.000000e+00> : vector<8xf32>
    %485 = vector.multi_reduction <add>, %484, %cst_138 [1] : vector<8x32xf32> to vector<8xf32>
    %486 = vector.shape_cast %485 : vector<8xf32> to vector<8x1xf32>
    %cst_139 = arith.constant 3.200000e+01 : f32
    %487 = vector.broadcast %cst_139 : f32 to vector<8x1xf32>
    %488 = arith.divf %486, %487 : vector<8x1xf32>
    %489 = vector.broadcast %479 : vector<8x1xf32> to vector<8x32xf32>
    %490 = arith.subf %473, %489 : vector<8x32xf32>
    %cst_140 = arith.constant 9.99999974E-6 : f32
    %491 = vector.broadcast %cst_140 : f32 to vector<8x1xf32>
    %492 = arith.addf %488, %491 : vector<8x1xf32>
    %493 = math.rsqrt %492 : vector<8x1xf32>
    %494 = vector.broadcast %493 : vector<8x1xf32> to vector<8x32xf32>
    %495 = arith.mulf %490, %494 : vector<8x32xf32>
    %496 = vector.broadcast %474 : vector<1x32xf32> to vector<8x32xf32>
    %497 = arith.mulf %495, %496 : vector<8x32xf32>
    %498 = vector.broadcast %475 : vector<1x32xf32> to vector<8x32xf32>
    %499 = arith.addf %497, %498 : vector<8x32xf32>
    %500 = vector.extract_strided_slice %423 {offsets = [0, 96], sizes = [32, 32], strides = [1, 1]} : vector<32x256xf32> to vector<32x32xf32>
    %cst_141 = arith.constant dense<0.000000e+00> : vector<8x32xf32>
    %501 = tpu.matmul %499, %500, %cst_141 {dimension_numbers = #tpu.dot_dimension_numbers<[1], [0], [0], [1], [0, 0, 1, 1], [], []>} : vector<8x32xf32>, vector<32x32xf32>, vector<8x32xf32> -> vector<8x32xf32>
    %502 = vector.extract_strided_slice %425 {offsets = [4, 0], sizes = [1, 32], strides = [1, 1]} : vector<13x128xf32> to vector<1x32xf32>
    %503 = vector.broadcast %502 : vector<1x32xf32> to vector<8x32xf32>
    %504 = arith.addf %501, %503 : vector<8x32xf32>
    %505 = vector.extract_strided_slice %423 {offsets = [0, 128], sizes = [32, 64], strides = [1, 1]} : vector<32x256xf32> to vector<32x64xf32>
    %cst_142 = arith.constant dense<0.000000e+00> : vector<8x64xf32>
    %506 = tpu.matmul %230, %505, %cst_142 {dimension_numbers = #tpu.dot_dimension_numbers<[1], [0], [0], [1], [0, 0, 1, 1], [], []>} : vector<8x32xf32>, vector<32x64xf32>, vector<8x64xf32> -> vector<8x64xf32>
    %507 = vector.extract_strided_slice %425 {offsets = [5, 0], sizes = [1, 64], strides = [1, 1]} : vector<13x128xf32> to vector<1x64xf32>
    %508 = vector.broadcast %507 : vector<1x64xf32> to vector<8x64xf32>
    %509 = arith.addf %506, %508 : vector<8x64xf32>
    %510 = vector.extract_strided_slice %509 {offsets = [0, 0], sizes = [8, 32], strides = [1, 1]} : vector<8x64xf32> to vector<8x32xf32>
    %511 = vector.extract_strided_slice %509 {offsets = [0, 32], sizes = [8, 32], strides = [1, 1]} : vector<8x64xf32> to vector<8x32xf32>
    %512 = vector.extract_strided_slice %427 {offsets = [8, 0], sizes = [8, 128], strides = [1, 1]} : vector<16x128xf32> to vector<8x128xf32>
    %513 = tpu.transpose %504, [1, 0] : vector<8x32xf32> -> vector<32x8xf32>
    %cst_143 = arith.constant dense<0.000000e+00> : vector<32x32xf32>
    %514 = tpu.matmul %513, %510, %cst_143 {dimension_numbers = #tpu.dot_dimension_numbers<[1], [0], [0], [1], [0, 0, 1, 1], [], []>} : vector<32x8xf32>, vector<8x32xf32>, vector<32x32xf32> -> vector<32x32xf32>
    %cst_144 = arith.constant 0.176776692 : f32
    %515 = vector.broadcast %cst_144 : f32 to vector<32x32xf32>
    %516 = arith.mulf %514, %515 : vector<32x32xf32>
    %517 = arith.addf %516, %1 : vector<32x32xf32>
    %cst_145 = arith.constant dense<0xFF800000> : vector<32xf32>
    %518 = vector.multi_reduction <maximumf>, %517, %cst_145 [1] : vector<32x32xf32> to vector<32xf32>
    %519 = vector.shape_cast %518 : vector<32xf32> to vector<32x1xf32>
    %520 = vector.broadcast %519 : vector<32x1xf32> to vector<32x32xf32>
    %521 = arith.subf %517, %520 : vector<32x32xf32>
    %522 = math.exp %521 : vector<32x32xf32>
    %cst_146 = arith.constant dense<0.000000e+00> : vector<32xf32>
    %523 = vector.multi_reduction <add>, %522, %cst_146 [1] : vector<32x32xf32> to vector<32xf32>
    %524 = vector.shape_cast %523 : vector<32xf32> to vector<32x1xf32>
    %525 = tpu.reciprocal %524 {approx = true} : vector<32x1xf32> -> vector<32x1xf32>
    %526 = vector.broadcast %525 : vector<32x1xf32> to vector<32x32xf32>
    %527 = arith.mulf %522, %526 : vector<32x32xf32>
    %528 = vector.extract_strided_slice %511 {offsets = [0, 0], sizes = [8, 8], strides = [1, 1]} : vector<8x32xf32> to vector<8x8xf32>
    %529 = vector.extract_strided_slice %511 {offsets = [0, 8], sizes = [8, 8], strides = [1, 1]} : vector<8x32xf32> to vector<8x8xf32>
    %530 = vector.extract_strided_slice %511 {offsets = [0, 16], sizes = [8, 8], strides = [1, 1]} : vector<8x32xf32> to vector<8x8xf32>
    %531 = vector.extract_strided_slice %511 {offsets = [0, 24], sizes = [8, 8], strides = [1, 1]} : vector<8x32xf32> to vector<8x8xf32>
    %532 = tpu.concatenate %528, %529, %530, %531 in 0 : vector<8x8xf32>, vector<8x8xf32>, vector<8x8xf32>, vector<8x8xf32> -> vector<32x8xf32>
    %cst_147 = arith.constant dense<0.000000e+00> : vector<32x8xf32>
    %533 = tpu.matmul %527, %532, %cst_147 {dimension_numbers = #tpu.dot_dimension_numbers<[1], [0], [0], [1], [0, 0, 1, 1], [], []>} : vector<32x32xf32>, vector<32x8xf32>, vector<32x8xf32> -> vector<32x8xf32>
    %cst_148 = arith.constant dense<0.000000e+00> : vector<32x128xf32>
    %534 = tpu.matmul %533, %512, %cst_148 {dimension_numbers = #tpu.dot_dimension_numbers<[1], [0], [0], [1], [0, 0, 1, 1], [], []>} : vector<32x8xf32>, vector<8x128xf32>, vector<32x128xf32> -> vector<32x128xf32>
    %535 = vector.extract_strided_slice %534 {offsets = [0, 0], sizes = [8, 32], strides = [1, 1]} : vector<32x128xf32> to vector<8x32xf32>
    %536 = vector.extract_strided_slice %534 {offsets = [8, 32], sizes = [8, 32], strides = [1, 1]} : vector<32x128xf32> to vector<8x32xf32>
    %537 = arith.addf %535, %536 : vector<8x32xf32>
    %538 = vector.extract_strided_slice %534 {offsets = [16, 64], sizes = [8, 32], strides = [1, 1]} : vector<32x128xf32> to vector<8x32xf32>
    %539 = arith.addf %537, %538 : vector<8x32xf32>
    %540 = vector.extract_strided_slice %534 {offsets = [24, 96], sizes = [8, 32], strides = [1, 1]} : vector<32x128xf32> to vector<8x32xf32>
    %541 = arith.addf %539, %540 : vector<8x32xf32>
    %542 = vector.extract_strided_slice %425 {offsets = [6, 0], sizes = [1, 32], strides = [1, 1]} : vector<13x128xf32> to vector<1x32xf32>
    %543 = vector.broadcast %542 : vector<1x32xf32> to vector<8x32xf32>
    %544 = arith.addf %541, %543 : vector<8x32xf32>
    %545 = arith.addf %499, %544 : vector<8x32xf32>
    %546 = vector.extract_strided_slice %425 {offsets = [7, 0], sizes = [1, 32], strides = [1, 1]} : vector<13x128xf32> to vector<1x32xf32>
    %547 = vector.extract_strided_slice %425 {offsets = [8, 0], sizes = [1, 32], strides = [1, 1]} : vector<13x128xf32> to vector<1x32xf32>
    %cst_149 = arith.constant dense<0.000000e+00> : vector<8xf32>
    %548 = vector.multi_reduction <add>, %545, %cst_149 [1] : vector<8x32xf32> to vector<8xf32>
    %549 = vector.shape_cast %548 : vector<8xf32> to vector<8x1xf32>
    %cst_150 = arith.constant 3.200000e+01 : f32
    %550 = vector.broadcast %cst_150 : f32 to vector<8x1xf32>
    %551 = arith.divf %549, %550 : vector<8x1xf32>
    %552 = vector.broadcast %551 : vector<8x1xf32> to vector<8x32xf32>
    %553 = arith.subf %545, %552 : vector<8x32xf32>
    %554 = vector.broadcast %551 : vector<8x1xf32> to vector<8x32xf32>
    %555 = arith.subf %545, %554 : vector<8x32xf32>
    %556 = arith.mulf %553, %555 : vector<8x32xf32>
    %cst_151 = arith.constant dense<0.000000e+00> : vector<8xf32>
    %557 = vector.multi_reduction <add>, %556, %cst_151 [1] : vector<8x32xf32> to vector<8xf32>
    %558 = vector.shape_cast %557 : vector<8xf32> to vector<8x1xf32>
    %cst_152 = arith.constant 3.200000e+01 : f32
    %559 = vector.broadcast %cst_152 : f32 to vector<8x1xf32>
    %560 = arith.divf %558, %559 : vector<8x1xf32>
    %561 = vector.broadcast %551 : vector<8x1xf32> to vector<8x32xf32>
    %562 = arith.subf %545, %561 : vector<8x32xf32>
    %cst_153 = arith.constant 9.99999974E-6 : f32
    %563 = vector.broadcast %cst_153 : f32 to vector<8x1xf32>
    %564 = arith.addf %560, %563 : vector<8x1xf32>
    %565 = math.rsqrt %564 : vector<8x1xf32>
    %566 = vector.broadcast %565 : vector<8x1xf32> to vector<8x32xf32>
    %567 = arith.mulf %562, %566 : vector<8x32xf32>
    %568 = vector.broadcast %546 : vector<1x32xf32> to vector<8x32xf32>
    %569 = arith.mulf %567, %568 : vector<8x32xf32>
    %570 = vector.broadcast %547 : vector<1x32xf32> to vector<8x32xf32>
    %571 = arith.addf %569, %570 : vector<8x32xf32>
    %572 = vector.extract_strided_slice %423 {offsets = [0, 192], sizes = [32, 64], strides = [1, 1]} : vector<32x256xf32> to vector<32x64xf32>
    %cst_154 = arith.constant dense<0.000000e+00> : vector<8x64xf32>
    %573 = tpu.matmul %571, %572, %cst_154 {dimension_numbers = #tpu.dot_dimension_numbers<[1], [0], [0], [1], [0, 0, 1, 1], [], []>} : vector<8x32xf32>, vector<32x64xf32>, vector<8x64xf32> -> vector<8x64xf32>
    %574 = vector.extract_strided_slice %425 {offsets = [9, 0], sizes = [1, 64], strides = [1, 1]} : vector<13x128xf32> to vector<1x64xf32>
    %575 = vector.broadcast %574 : vector<1x64xf32> to vector<8x64xf32>
    %576 = arith.addf %573, %575 : vector<8x64xf32>
    %cst_155 = arith.constant 0.000000e+00 : f32
    %577 = vector.broadcast %cst_155 : f32 to vector<8x64xf32>
    %578 = arith.maximumf %576, %577 : vector<8x64xf32>
    %c1_156 = arith.constant 1 : index
    %c0_157 = arith.constant 0 : index
    %c0_158 = arith.constant 0 : index
    %579 = vector.load %arg8[%c1_156, %c0_157, %c0_158] : memref<2x64x32xf32, #tpu.memory_space<vmem>>, vector<1x64x32xf32>
    %580 = vector.shape_cast %579 : vector<1x64x32xf32> to vector<64x32xf32>
    %cst_159 = arith.constant dense<0.000000e+00> : vector<8x32xf32>
    %581 = tpu.matmul %578, %580, %cst_159 {dimension_numbers = #tpu.dot_dimension_numbers<[1], [0], [0], [1], [0, 0, 1, 1], [], []>} : vector<8x64xf32>, vector<64x32xf32>, vector<8x32xf32> -> vector<8x32xf32>
    %582 = vector.extract_strided_slice %425 {offsets = [10, 0], sizes = [1, 32], strides = [1, 1]} : vector<13x128xf32> to vector<1x32xf32>
    %583 = vector.broadcast %582 : vector<1x32xf32> to vector<8x32xf32>
    %584 = arith.addf %581, %583 : vector<8x32xf32>
    %585 = arith.addf %571, %584 : vector<8x32xf32>
    %586 = vector.extract_strided_slice %425 {offsets = [11, 0], sizes = [1, 32], strides = [1, 1]} : vector<13x128xf32> to vector<1x32xf32>
    %587 = vector.extract_strided_slice %425 {offsets = [12, 0], sizes = [1, 32], strides = [1, 1]} : vector<13x128xf32> to vector<1x32xf32>
    %cst_160 = arith.constant dense<0.000000e+00> : vector<8xf32>
    %588 = vector.multi_reduction <add>, %585, %cst_160 [1] : vector<8x32xf32> to vector<8xf32>
    %589 = vector.shape_cast %588 : vector<8xf32> to vector<8x1xf32>
    %cst_161 = arith.constant 3.200000e+01 : f32
    %590 = vector.broadcast %cst_161 : f32 to vector<8x1xf32>
    %591 = arith.divf %589, %590 : vector<8x1xf32>
    %592 = vector.broadcast %591 : vector<8x1xf32> to vector<8x32xf32>
    %593 = arith.subf %585, %592 : vector<8x32xf32>
    %594 = vector.broadcast %591 : vector<8x1xf32> to vector<8x32xf32>
    %595 = arith.subf %585, %594 : vector<8x32xf32>
    %596 = arith.mulf %593, %595 : vector<8x32xf32>
    %cst_162 = arith.constant dense<0.000000e+00> : vector<8xf32>
    %597 = vector.multi_reduction <add>, %596, %cst_162 [1] : vector<8x32xf32> to vector<8xf32>
    %598 = vector.shape_cast %597 : vector<8xf32> to vector<8x1xf32>
    %cst_163 = arith.constant 3.200000e+01 : f32
    %599 = vector.broadcast %cst_163 : f32 to vector<8x1xf32>
    %600 = arith.divf %598, %599 : vector<8x1xf32>
    %601 = vector.broadcast %591 : vector<8x1xf32> to vector<8x32xf32>
    %602 = arith.subf %585, %601 : vector<8x32xf32>
    %cst_164 = arith.constant 9.99999974E-6 : f32
    %603 = vector.broadcast %cst_164 : f32 to vector<8x1xf32>
    %604 = arith.addf %600, %603 : vector<8x1xf32>
    %605 = math.rsqrt %604 : vector<8x1xf32>
    %606 = vector.broadcast %605 : vector<8x1xf32> to vector<8x32xf32>
    %607 = arith.mulf %602, %606 : vector<8x32xf32>
    %608 = vector.broadcast %586 : vector<1x32xf32> to vector<8x32xf32>
    %609 = arith.mulf %607, %608 : vector<8x32xf32>
    %610 = vector.broadcast %587 : vector<1x32xf32> to vector<8x32xf32>
    %611 = arith.addf %609, %610 : vector<8x32xf32>
    %c0_165 = arith.constant 0 : index
    %c0_166 = arith.constant 0 : index
    %612 = vector.load %arg11[%c0_165, %c0_166] : memref<33x50xf32, #tpu.memory_space<vmem>>, vector<33x50xf32>
    %613 = vector.extract_strided_slice %612 {offsets = [0, 0], sizes = [32, 50], strides = [1, 1]} : vector<33x50xf32> to vector<32x50xf32>
    %cst_167 = arith.constant dense<0.000000e+00> : vector<8x50xf32>
    %614 = tpu.matmul %611, %613, %cst_167 {dimension_numbers = #tpu.dot_dimension_numbers<[1], [0], [0], [1], [0, 0, 1, 1], [], []>} : vector<8x32xf32>, vector<32x50xf32>, vector<8x50xf32> -> vector<8x50xf32>
    %615 = vector.extract_strided_slice %612 {offsets = [32, 0], sizes = [1, 50], strides = [1, 1]} : vector<33x50xf32> to vector<1x50xf32>
    %616 = vector.broadcast %615 : vector<1x50xf32> to vector<8x50xf32>
    %617 = arith.addf %614, %616 : vector<8x50xf32>
    %cst_168 = arith.constant dense<0xFF800000> : vector<8xf32>
    %618 = vector.multi_reduction <maximumf>, %617, %cst_168 [1] : vector<8x50xf32> to vector<8xf32>
    %619 = vector.shape_cast %618 : vector<8xf32> to vector<8x1xf32>
    %620 = vector.broadcast %619 : vector<8x1xf32> to vector<8x50xf32>
    %621 = arith.subf %617, %620 : vector<8x50xf32>
    %622 = math.exp %621 : vector<8x50xf32>
    %cst_169 = arith.constant dense<0.000000e+00> : vector<8xf32>
    %623 = vector.multi_reduction <add>, %622, %cst_169 [1] : vector<8x50xf32> to vector<8xf32>
    %624 = vector.shape_cast %623 : vector<8xf32> to vector<8x1xf32>
    %625 = vector.broadcast %624 : vector<8x1xf32> to vector<8x50xf32>
    %626 = arith.divf %622, %625 : vector<8x50xf32>
    %c0_170 = arith.constant 0 : index
    %c0_171 = arith.constant 0 : index
    %627 = vector.load %arg12[%c0_170, %c0_171] : memref<8x50xf32, #tpu.memory_space<vmem>>, vector<8x50xf32>
    tpu.vector_store %arg12[%c0_170, %c0_171], %626 {strides = array<i32>} : memref<8x50xf32, #tpu.memory_space<vmem>>, vector<8x50xf32>,
    return
  }
}

</mosaic_0001>

<bundles_post_ra>
// kernel: _forward_impl.1
= control target key start
LH: loop header
LB: loop body
LE: loop exit
PB: predicated region body
PF: predicated region fallthrough
CT: control target
= control target key end

     0   :  { %v5190_v1 = vmov 0.0   ;;  %vm5191_vm0 = vmmov 0   ;;  %s6233_s0 = inlined_call_operand.vmem [shape: f32[8,32], index: 0, kind: input, shape index: {}]   ;;  %s6234_s1 = inlined_call_operand.vmem [shape: f32[8,32], index: 1, kind: input, shape index: {}]   ;;  %s6235_s2 = inlined_call_operand.vmem [shape: f32[2,32,32], index: 2, kind: input, shape index: {}]   ;;  %s6236_s3 = inlined_call_operand.vmem [shape: f32[2,32,192], index: 3, kind: input, shape index: {}]   ;;  %s6237_s4 = inlined_call_operand.vmem [shape: f32[2,64,32], index: 4, kind: input, shape index: {}]   ;;  %s6238_s5 = inlined_call_operand.vmem [shape: f32[2,8,128], index: 5, kind: input, shape index: {}]   ;;  %s6239_s6 = inlined_call_operand.vmem [shape: f32[2,8,128], index: 6, kind: input, shape index: {}]   ;;  %s6240_s7 = inlined_call_operand.vmem [shape: f32[2,32,256], index: 7, kind: input, shape index: {}]   ;;  %s6241_s8 = inlined_call_operand.vmem [shape: f32[2,64,32], index: 8, kind: input, shape index: {}]   ;;  %s6242_s9 = inlined_call_operand.vmem [shape: f32[2,13,128], index: 9, kind: input, shape index: {}]   ;;  %s6243_s10 = inlined_call_operand.vmem [shape: f32[2,16,128], index: 10, kind: input, shape index: {}]   ;;  %s6244_s11 = inlined_call_operand.vmem [shape: f32[33,50], index: 11, kind: input, shape index: {}]   ;;  %s6245_s12 = inlined_call_operand.hbm [shape: f32[8,50], index: 12, kind: output, shape index: {}]  }
   0x1   :  { %v58_v0 = vld [vmem:[%s6236_s3 + $0x30] sm:$0xff]  ;;  %4636 = vmatprep.subr.mxu0 %v5190_v1  ;;  %v56_v2 = vld [vmem:[%s6236_s3 + $0x20] sm:$0xff]  ;;  %4644 = vmatprep.mubr.msk.f32.mxu0 %vm5191_vm0, %v5190_v1 }
   0x2   :  { %4637 = vmatpush3.msra.mxu0 %v58_v0 }
   0x3   :  { %17 = vsyncpa [#allocation3], 0  ;;  %4638 = vmatprep.subr.mxu0 %v5190_v1  ;;  %v54_v3 = vld [vmem:[%s6236_s3 + $0x10] sm:$0xff]  ;;  %v52_v4 = vld [vmem:[%s6236_s3] sm:$0xff]  ;;  %vm66_vm1 = vcmask 261120   ;;  %v62_v6 = vlaneseq  ;;  %s5193_s15 = smov 120  }
   0x4   :  { %4639 = vmatpush3.msra.mxu0 %v56_v2  ;;  %v5284_v5 = vld [vmem:[%s6233_s0] sm:$0xff]  ;;  %s5192_s0 = smov 96   ;;  %vm176_vm2 = vcmask 64512   ;;  %v5315_v20 = vld [vmem:[%s6235_s2 + $0x8] sm:$0xff]  ;;  %v5329_v31 = vld [vmem:[%s6235_s2 + $0x10] sm:$0xff]  ;;  %s5194_s24 = smov 104  }
   0x5   :  { %4640 = vmatprep.subr.mxu0 %v5190_v1  ;;  %v5289_v7 = vshrl.u32 %v62_v6, 7  ;;  %v5297_v9 = vld [vmem:[%s6238_s5] sm:$0xff]  ;;  %v5334_v34 = vld [vmem:[%s6235_s2 + $0x18] sm:$0xff]  ;;  %s5195_s25 = smov 112   ;;  %s5196_s26 = smov 64   ;;  %vm673_vm3 = vcmask 523264  }
   0x6   :  { %4641 = vmatpush3.msra.mxu0 %v54_v3  ;;  %v5320_v23 = vld [vmem:[%s6235_s2] sm:$0xff]  ;;  %s5197_s29 = smov 32   ;;  %vm4268_vm8 = vcmask 408576  }
   0x7   :  { %4642 = vmatprep.subr.mxu0 %v5190_v1  ;;  %v5292_v8 = vsub.s32 0, %v5289_v7 }
   0x8   :  { %4643 = vmatpush3.msra.mxu0 %v52_v4 }
   0x9   :  { %4645 = vmatmul.mubr.msk.f32.vlgmr.msra.gmra.mxu0 %vm66_vm1, %v5284_v5  ;;  %v65_v10 = vrot.slane %v5297_v9, %v5292_v8 }
  0xc9   :  { %v136_v11 = vpop.f32.mrf.mxu0 }
  0xca   :  { %v5301_v12 = vadd.f32 %v136_v11, %v65_v10 }
  0xcb   :  { %v4646_v13 = vpop.f32.mrf.mxu0 }
  0xcc   :  { %173 = vrot.lane.b32.xlu0 %v5301_v12, %s5192_s0 }
  0xea   :  { %140 = vxpose.xlu0.b32.start.end [1/1] (short) (narrow) %v5301_v12, 32 }
 0x11f   :  { %326 = vrot.lane.b32.xlu0 %v5301_v12, %s5193_s15 }
 0x13e   :  { %v174_v14 = vpop.permute.xlu0 %173 }
 0x13f   :  { %4647 = vmatprep.subr.mxu1 %v174_v14 }
 0x140   :  { %4648 = vmatpush3.msra.mxu1 %v174_v14 }
 0x166   :  { %v156_v15 = vpop.trf.xlu0 }
 0x167   :  { %4649 = vmatprep.mubr.msk.f32.mxu1 %vm176_vm2, %v156_v15 }
 0x16a   :  { %v157_v16 = vpop.trf.xlu0 }
 0x16b   :  { %4650 = vmatmul.mubr.msk.f32.vlgmr.msra.gmra.mxu1 %vm176_vm2, %v157_v16 }
 0x16e   :  { %v158_v17 = vpop.trf.xlu0 }
 0x16f   :  { %4652 = vmatprep.mubr.msk.f32.mxu1 %vm176_vm2, %v158_v17 }
 0x172   :  { %v159_v18 = vpop.trf.xlu0 }
 0x173   :  { %4653 = vmatmul.mubr.msk.f32.gmra.mxu1 %vm176_vm2, %v159_v18 }
 0x191   :  { %v327_v57 = vpop.permute.xlu0 %326 }
 0x22b   :  { %v4651_v19 = vpop.f32.mrf.mxu1 }
 0x22c   :  { %v275_v21 = vmul.f32 0.17677669, %v4651_v19  ;;  %v61_v19 = vld [vmem:[%s6239_s6] sm:$0xff] }
 0x22d   :  { %v255_v22 = vpop.f32.mrf.mxu1  ;;  %4669 = vmatprep.subr.mxu0 %v61_v19 }
 0x22e   :  { %v274_v24 = vmul.f32 0.17677669, %v255_v22  ;;  %v279_v25 = vadd.f32 %v275_v21, %v5315_v20  ;;  %4670 = vmatpush3.msra.mxu0 %v61_v19 }
 0x22f   :  { %4688 = vmatprep.subr.mxu0 %v5190_v1 }
 0x230   :  { %v285_v26 = vsel %vm66_vm1, %v279_v25, -inf  ;;  %v278_v27 = vadd.f32 %v274_v24, %v5320_v23 }
 0x231   :  { %286 = vmax.xlane.f32.xlu1 %v285_v26 }
 0x232   :  { %v282_v29 = vsel %vm66_vm1, %v278_v27, -inf }
 0x233   :  { %v4654_v28 = vpop.f32.mrf.mxu1 }
 0x234   :  { %v277_v32 = vmul.f32 0.17677669, %v4654_v28 }
 0x235   :  { %v265_v30 = vpop.f32.mrf.mxu1  ;;  %283 = vmax.xlane.f32.xlu1 %v282_v29 }
 0x236   :  { %v276_v33 = vmul.f32 0.17677669, %v265_v30  ;;  %v281_v37 = vadd.f32 %v277_v32, %v5334_v34  ;;  %v5374_v32 = vsub.s32 1, %v5289_v7 }
 0x238   :  { %v280_v35 = vadd.f32 %v276_v33, %v5329_v31  ;;  %v291_v38 = vsel %vm66_vm1, %v281_v37, -inf }
 0x23a   :  { %v288_v36 = vsel %vm66_vm1, %v280_v35, -inf }
 0x23b   :  { %289 = vmax.xlane.f32.xlu1 %v288_v36 }
 0x23f   :  { %292 = vmax.xlane.f32.xlu1 %v291_v38 }
 0x250   :  { %330 = vrot.lane.b32.xlu1 %v5301_v12, %s5194_s24 }
 0x254   :  { %328 = vrot.lane.b32.xlu1 %v5301_v12, %s5195_s25 }
 0x2ba   :  { %v287_v39 = vpop.xlane.xlu1 %286 }
 0x2bb   :  { %v295_v40 = vsub.f32 %v279_v25, %v287_v39 }
 0x2bd   :  { %v300_v41 = vmul.f32 1.442695, %v295_v40 }
 0x2be   :  { %v284_v42 = vpop.xlane.xlu1 %283 }
 0x2bf   :  { %5044 = vpow2.f32 %v300_v41  ;;  %v294_v43 = vsub.f32 %v278_v27, %v284_v42 }
 0x2c1   :  { %v298_v44 = vmul.f32 1.442695, %v294_v43 }
 0x2c3   :  { %5046 = vpow2.f32 %v298_v44 }
 0x2c4   :  { %v290_v45 = vpop.xlane.xlu1 %289 }
 0x2c5   :  { %v296_v46 = vsub.f32 %v280_v35, %v290_v45 }
 0x2c7   :  { %v302_v49 = vmul.f32 1.442695, %v296_v46 }
 0x2c8   :  { %v293_v47 = vpop.xlane.xlu1 %292 }
 0x2c9   :  { %v297_v48 = vsub.f32 %v281_v37, %v293_v47  ;;  %v556_v37 = vrot.slane %v5297_v9, %v5374_v32 }
 0x2cb   :  { %v304_v50 = vmul.f32 1.442695, %v297_v48  ;;  %v59_v48 = vld [vmem:[%s6236_s3 + $0x38] sm:$0xff] }
 0x2cc   :  { %v5045_v51 = vpop.eup %5044  ;;  %v331_v52 = vpop.permute.xlu1 %330 }
 0x2cd   :  { %5048 = vpow2.f32 %v304_v50  ;;  %v309_v53 = vsel %vm66_vm1, %v5045_v51, 0.0  ;;  %v53_v50 = vld [vmem:[%s6236_s3 + $0x8] sm:$0xff] }
 0x2ce   :  { %310 = vadd.xlane.f32.xlu1 %v309_v53  ;;  %5050 = vpow2.f32 %v302_v49  ;;  %v55_v49 = vld [vmem:[%s6236_s3 + $0x18] sm:$0xff]  ;;  %v666_v53 = vld [vmem:[%s6237_s4 + $0x28] sm:$0xff] }
 0x2d0   :  { %v5047_v54 = vpop.eup %5046  ;;  %v329_v55 = vpop.permute.xlu1 %328 }
 0x2d1   :  { %336 = vrot.lane.b32.xlu0 %v329_v55, %s5196_s26  ;;  %v306_v56 = vsel %vm66_vm1, %v5047_v54, 0.0  ;;  %v664_v55 = vld [vmem:[%s6237_s4 + $0x18] sm:$0xff] }
 0x2d2   :  { %307 = vadd.xlane.f32.xlu1 %v306_v56 }
 0x2d5   :  { %334 = vrot.lane.b32.xlu0 %v327_v57, %s5196_s26 }
 0x2d9   :  { %332 = vrot.lane.b32.xlu0 %v5301_v12, %s5196_s26 }
 0x2da   :  { %v5049_v58 = vpop.eup %5048 }
 0x2db   :  { %v315_v59 = vsel %vm66_vm1, %v5049_v58, 0.0  ;;  %v5051_v60 = vpop.eup %5050 }
 0x2dc   :  { %316 = vadd.xlane.f32.xlu1 %v315_v59  ;;  %v312_v61 = vsel %vm66_vm1, %v5051_v60, 0.0  ;;  %v5418_v59 = vsub.s32 2, %v5289_v7 }
 0x2e0   :  { %313 = vadd.xlane.f32.xlu1 %v312_v61  ;;  %v576_v61 = vrot.slane %v5297_v9, %v5418_v59 }
 0x2f1   :  { %338 = vrot.lane.b32.xlu1 %v331_v52, %s5196_s26  ;;  %v667_v52 = vld [vmem:[%s6237_s4 + $0x30] sm:$0xff] }
 0x343   :  { %v337_v2 = vpop.permute.xlu0 %336 }
 0x347   :  { %v335_v10 = vpop.permute.xlu0 %334 }
 0x34b   :  { %v333_v13 = vpop.permute.xlu0 %332 }
 0x357   :  { %v311_v62 = vpop.xlane.xlu1 %310 }
 0x35b   :  { %v308_v63 = vpop.xlane.xlu1 %307 }
 0x35c   :  { %5052 = vrcp.f32 %v308_v63 }
 0x35d   :  { %5054 = vrcp.f32 %v311_v62 }
 0x365   :  { %v317_v0 = vpop.xlane.xlu1 %316 }
 0x366   :  { %5056 = vrcp.f32 %v317_v0 }
 0x369   :  { %v5053_v3 = vpop.eup %5052  ;;  %v314_v4 = vpop.xlane.xlu1 %313 }
 0x36a   :  { %5058 = vrcp.f32 %v314_v4  ;;  %v322_v6 = vmul.f32 %v5053_v3, %v5047_v54  ;;  %v5055_v12 = vpop.eup %5054  ;;  %v665_v54 = vld [vmem:[%s6237_s4 + $0x20] sm:$0xff]  ;;  %v663_v4 = vld [vmem:[%s6237_s4 + $0x10] sm:$0xff] }
 0x36b   :  { %v323_v14 = vmul.f32 %v5055_v12, %v5045_v51  ;;  %v668_v51 = vld [vmem:[%s6237_s4 + $0x38] sm:$0xff] }
 0x36c   :  { %4663 = vmatprep.mubr.msk.f32.mxu1 %vm66_vm1, %v322_v6  ;;  %v662_v6 = vld [vmem:[%s6237_s4 + $0x8] sm:$0xff] }
 0x36d   :  { %v339_v11 = vpop.permute.xlu1 %338 }
 0x36e   :  { %4655 = vmatprep.subr.mxu1 %v339_v11 }
 0x36f   :  { %4656 = vmatpush3.msra.mxu1 %v339_v11  ;;  %v5442_v11 = vsub.s32 4, %v5289_v7 }
 0x370   :  { %4657 = vmatprep.subr.mxu1 %v337_v2 }
 0x371   :  { %4658 = vmatpush3.msra.mxu1 %v337_v2  ;;  %v586_v12 = vrot.slane %v5297_v9, %v5442_v11 }
 0x372   :  { %4659 = vmatprep.subr.mxu1 %v335_v10 }
 0x373   :  { %4660 = vmatpush3.msra.mxu1 %v335_v10  ;;  %v5057_v15 = vpop.eup %5056  ;;  %v661_v10 = vld [vmem:[%s6237_s4] sm:$0xff] }
 0x374   :  { %4661 = vmatprep.subr.mxu1 %v333_v13  ;;  %v325_v18 = vmul.f32 %v5057_v15, %v5049_v58 }
 0x375   :  { %4662 = vmatpush3.msra.mxu1 %v333_v13 }
 0x376   :  { %4664 = vmatmul.mubr.msk.f32.vlgmr.msra.gmra.mxu1 %vm66_vm1, %v323_v14  ;;  %4677 = vmatprep.subr.mxu1 %v5190_v1 }
 0x377   :  { %v5059_v16 = vpop.eup %5058  ;;  %4678 = vmatpush3.msra.mxu1 %v59_v48 }
 0x378   :  { %v324_v17 = vmul.f32 %v5059_v16, %v5051_v60  ;;  %4679 = vmatprep.subr.mxu1 %v5190_v1  ;;  %v5421_v60 = vsub.s32 3, %v5289_v7 }
 0x37a   :  { %4666 = vmatprep.mubr.msk.f32.mxu1 %vm66_vm1, %v324_v17  ;;  %v581_v0 = vrot.slane %v5297_v9, %v5421_v60  ;;  %v5448_v17 = vsub.s32 5, %v5289_v7 }
 0x37b   :  { %4667 = vmatmul.mubr.msk.f32.gmra.mxu1 %vm66_vm1, %v325_v18 }
 0x37c   :  { %4685 = vmatprep.mubr.msk.f32.mxu1 %vm5191_vm0, %v5190_v1  ;;  %v672_v18 = vrot.slane %v5297_v9, %v5448_v17 }
 0x436   :  { %v4665_v21 = vpop.f32.mrf.mxu1 }
 0x438   :  { %v422_v22 = vpop.f32.mrf.mxu1 }
 0x439   :  { %4671 = vmatprep.mubr.msk.f32.mxu0 %vm176_vm2, %v422_v22 }
 0x43a   :  { %4672 = vmatmul.mubr.msk.f32.vlgmr.msra.gmra.mxu0 %vm176_vm2, %v4665_v21 }
 0x43b   :  { %v4668_v24 = vpop.f32.mrf.mxu1  ;;  %4689 = vmatpush3.msra.mxu0 %v668_v51 }
 0x43c   :  { %4690 = vmatprep.subr.mxu0 %v5190_v1 }
 0x43d   :  { %v432_v25 = vpop.f32.mrf.mxu1  ;;  %4691 = vmatpush3.msra.mxu0 %v667_v52 }
 0x43e   :  { %4674 = vmatprep.mubr.msk.f32.mxu0 %vm176_vm2, %v432_v25  ;;  %4692 = vmatprep.subr.mxu0 %v5190_v1 }
 0x43f   :  { %4675 = vmatmul.mubr.msk.f32.gmra.mxu0 %vm176_vm2, %v4668_v24 }
 0x440   :  { %4704 = vmatprep.mubr.msk.f32.mxu0 %vm5191_vm0, %v5190_v1  ;;  %4693 = vmatpush3.msra.mxu0 %v666_v53 }
 0x441   :  { %4694 = vmatprep.subr.mxu0 %v5190_v1 }
 0x442   :  { %4695 = vmatpush3.msra.mxu0 %v665_v54 }
 0x443   :  { %4696 = vmatprep.subr.mxu0 %v5190_v1 }
 0x444   :  { %4697 = vmatpush3.msra.mxu0 %v664_v55 }
 0x445   :  { %4698 = vmatprep.subr.mxu0 %v5190_v1 }
 0x446   :  { %4699 = vmatpush3.msra.mxu0 %v663_v4 }
 0x447   :  { %4700 = vmatprep.subr.mxu0 %v5190_v1 }
 0x448   :  { %4701 = vmatpush3.msra.mxu0 %v662_v6 }
 0x449   :  { %4702 = vmatprep.subr.mxu0 %v5190_v1 }
 0x44a   :  { %4703 = vmatpush3.msra.mxu0 %v661_v10 }
 0x4fa   :  { %v4673_v26 = vpop.f32.mrf.mxu0 }
 0x4fb   :  { %539 = vrot.lane.b32.xlu0 %v4673_v26, %s5192_s0 }
 0x4fc   :  { %v519_v27 = vpop.f32.mrf.mxu0 }
 0x4ff   :  { %v4676_v28 = vpop.f32.mrf.mxu0 }
 0x500   :  { %549 = vrot.lane.b32.xlu0 %v4676_v28, %s5197_s29 }
 0x501   :  { %v529_v29 = vpop.f32.mrf.mxu0 }
 0x502   :  { %544 = vrot.lane.b32.xlu1 %v529_v29, %s5196_s26 }
 0x56d   :  { %v540_v30 = vpop.permute.xlu0 %539 }
 0x56e   :  { %v542_v33 = vadd.f32 %v540_v30, %v519_v27 }
 0x572   :  { %v550_v38 = vpop.permute.xlu0 %549 }
 0x574   :  { %v545_v35 = vpop.permute.xlu1 %544 }
 0x575   :  { %v547_v36 = vadd.f32 %v545_v35, %v542_v33  ;;  %v4320_v33 = vld [vmem:[%s6236_s3 + $0x70] sm:$0xff]  ;;  %v4318_v35 = vld [vmem:[%s6236_s3 + $0x60] sm:$0xff] }
 0x577   :  { %v552_v39 = vadd.f32 %v550_v38, %v547_v36  ;;  %v4316_v36 = vld [vmem:[%s6236_s3 + $0x50] sm:$0xff] }
 0x579   :  { %v557_v40 = vadd.f32 %v556_v37, %v552_v39  ;;  %v4314_v37 = vld [vmem:[%s6236_s3 + $0x40] sm:$0xff] }
 0x57b   :  { %v558_v41 = vadd.f32 %v557_v40, %v5284_v5  ;;  %v57_v5 = vld [vmem:[%s6236_s3 + $0x28] sm:$0xff] }
 0x57c   :  { %4680 = vmatpush3.msra.mxu1 %v57_v5  ;;  %v5486_v5 = vld [vmem:[%s6238_s5 + $0x8] sm:$0xff] }
 0x57d   :  { %v559_v42 = vsel %vm66_vm1, %v558_v41, 0.0  ;;  %4681 = vmatprep.subr.mxu1 %v5190_v1 }
 0x57e   :  { %560 = vadd.xlane.f32.xlu1 %v559_v42  ;;  %4682 = vmatpush3.msra.mxu1 %v55_v49  ;;  %v5473_v42 = vsub.s32 7, %v5289_v7 }
 0x57f   :  { %4683 = vmatprep.subr.mxu1 %v5190_v1 }
 0x580   :  { %4684 = vmatpush3.msra.mxu1 %v53_v50 }
 0x581   :  { %4707 = vmatprep.subr.mxu1 %v5190_v1 }
 0x607   :  { %v561_v43 = vpop.xlane.xlu1 %560 }
 0x608   :  { %v563_v44 = vmul.f32 0.03125, %v561_v43 }
 0x60a   :  { %v564_v45 = vsub.f32 %v558_v41, %v563_v44  ;;  %v5470_v41 = vsub.s32 6, %v5289_v7  ;;  %v787_v7 = vrot.slane %v5486_v5, %v5292_v8 }
 0x60c   :  { %v565_v46 = vmul.f32 %v564_v45, %v564_v45  ;;  %v764_v43 = vrot.slane %v5297_v9, %v5470_v41 }
 0x60e   :  { %v566_v47 = vsel %vm66_vm1, %v565_v46, 0.0  ;;  %v769_v46 = vrot.slane %v5297_v9, %v5473_v42 }
 0x60f   :  { %567 = vadd.xlane.f32.xlu0 %v566_v47 }
 0x698   :  { %v568_v56 = vpop.xlane.xlu0 %567 }
 0x699   :  { %v569_v57 = vmul.f32 0.03125, %v568_v56 }
 0x69b   :  { %v570_v58 = vadd.f32 1e-05, %v569_v57 }
 0x69d   :  { %5060 = vrsqrt.f32 %v570_v58 }
 0x6aa   :  { %v5061_v62 = vpop.eup %5060 }
 0x6ab   :  { %v572_v63 = vmul.f32 %v5061_v62, %v564_v45 }
 0x6ad   :  { %v577_v2 = vmul.f32 %v576_v61, %v572_v63 }
 0x6af   :  { %v582_v3 = vadd.f32 %v581_v0, %v577_v2 }
 0x6b1   :  { %4686 = vmatmul.mubr.msk.f32.vlgmr.msra.gmra.mxu1 %vm66_vm1, %v582_v3 }
 0x6b2   :  { %4715 = vmatprep.mubr.msk.f32.mxu1 %vm5191_vm0, %v5190_v1  ;;  %4708 = vmatpush3.msra.mxu1 %v4320_v33 }
 0x6b3   :  { %4709 = vmatprep.subr.mxu1 %v5190_v1 }
 0x6b4   :  { %4710 = vmatpush3.msra.mxu1 %v4318_v35 }
 0x6b5   :  { %4711 = vmatprep.subr.mxu1 %v5190_v1 }
 0x6b6   :  { %4712 = vmatpush3.msra.mxu1 %v4316_v36 }
 0x6b7   :  { %4713 = vmatprep.subr.mxu1 %v5190_v1 }
 0x6b8   :  { %4714 = vmatpush3.msra.mxu1 %v4314_v37 }
 0x771   :  { %v656_v13 = vpop.f32.mrf.mxu1 }
 0x772   :  { %v657_v14 = vadd.f32 %v656_v13, %v586_v12 }
 0x773   :  { %v4687_v15 = vpop.f32.mrf.mxu1 }
 0x774   :  { %v660_v16 = vmax.f32 %v657_v14, 0.0 }
 0x776   :  { %4705 = vmatmul.mubr.msk.f32.vlgmr.msra.gmra.mxu0 %vm673_vm3, %v660_v16 }
 0x836   :  { %v743_v19 = vpop.f32.mrf.mxu0 }
 0x837   :  { %v744_v21 = vadd.f32 %v743_v19, %v672_v18 }
 0x838   :  { %v4706_v22 = vpop.f32.mrf.mxu0 }
 0x839   :  { %v747_v24 = vadd.f32 %v744_v21, %v582_v3 }
 0x83b   :  { %v748_v25 = vsel %vm66_vm1, %v747_v24, 0.0 }
 0x83c   :  { %749 = vadd.xlane.f32.xlu0 %v748_v25 }
 0x8c5   :  { %v750_v26 = vpop.xlane.xlu0 %749 }
 0x8c6   :  { %v751_v27 = vmul.f32 0.03125, %v750_v26 }
 0x8c8   :  { %v752_v28 = vsub.f32 %v747_v24, %v751_v27 }
 0x8ca   :  { %v753_v29 = vmul.f32 %v752_v28, %v752_v28 }
 0x8cc   :  { %v754_v30 = vsel %vm66_vm1, %v753_v29, 0.0 }
 0x8cd   :  { %755 = vadd.xlane.f32.xlu0 %v754_v30 }
 0x956   :  { %v756_v38 = vpop.xlane.xlu0 %755 }
 0x957   :  { %v757_v39 = vmul.f32 0.03125, %v756_v38 }
 0x959   :  { %v758_v40 = vadd.f32 1e-05, %v757_v39 }
 0x95b   :  { %5062 = vrsqrt.f32 %v758_v40 }
 0x968   :  { %v5063_v44 = vpop.eup %5062 }
 0x969   :  { %v760_v45 = vmul.f32 %v5063_v44, %v752_v28 }
 0x96b   :  { %v765_v47 = vmul.f32 %v764_v43, %v760_v45 }
 0x96d   :  { %v5479_v48 = vadd.f32 %v769_v46, %v765_v47  ;;  %v4323_v47 = vld [vmem:[%s6239_s6 + $0x8] sm:$0xff] }
 0x96f   :  { %4716 = vmatmul.mubr.msk.f32.vlgmr.msra.gmra.mxu1 %vm66_vm1, %v5479_v48 }
 0xa2f   :  { %v857_v49 = vpop.f32.mrf.mxu1 }
 0xa30   :  { %v5490_v50 = vadd.f32 %v857_v49, %v787_v7 }
 0xa31   :  { %v4717_v51 = vpop.f32.mrf.mxu1 }
 0xa32   :  { %861 = vxpose.xlu0.b32.start.end [1/1] (short) (narrow) %v5490_v50, 32  ;;  %894 = vrot.lane.b32.xlu1 %v5490_v50, %s5192_s0 }
 0xaa4   :  { %v895_v9 = vpop.permute.xlu1 %894 }
 0xaa5   :  { %4718 = vmatprep.subr.mxu1 %v895_v9 }
 0xaa6   :  { %4719 = vmatpush3.msra.mxu1 %v895_v9 }
 0xaa7   :  { %4740 = vmatprep.subr.mxu1 %v4323_v47 }
 0xaae   :  { %v877_v52 = vpop.trf.xlu0 }
 0xaaf   :  { %4720 = vmatprep.mubr.msk.f32.mxu1 %vm176_vm2, %v877_v52 }
 0xab2   :  { %v878_v53 = vpop.trf.xlu0 }
 0xab3   :  { %4721 = vmatmul.mubr.msk.f32.vlgmr.msra.gmra.mxu1 %vm176_vm2, %v878_v53 }
 0xab4   :  { %4741 = vmatpush3.msra.mxu1 %v4323_v47 }
 0xab5   :  { %4759 = vmatprep.subr.mxu1 %v5190_v1 }
 0xab6   :  { %v879_v54 = vpop.trf.xlu0 }
 0xab7   :  { %4723 = vmatprep.mubr.msk.f32.mxu1 %vm176_vm2, %v879_v54 }
 0xaba   :  { %v880_v55 = vpop.trf.xlu0 }
 0xabb   :  { %4724 = vmatmul.mubr.msk.f32.gmra.mxu1 %vm176_vm2, %v880_v55 }
 0xb73   :  { %v4722_v56 = vpop.f32.mrf.mxu1 }
 0xb74   :  { %v995_v57 = vmul.f32 0.17677669, %v4722_v56 }
 0xb75   :  { %v975_v58 = vpop.f32.mrf.mxu1 }
 0xb76   :  { %v994_v61 = vmul.f32 0.17677669, %v975_v58  ;;  %v999_v62 = vadd.f32 %v995_v57, %v5315_v20 }
 0xb78   :  { %v1005_v63 = vsel %vm66_vm1, %v999_v62, -inf  ;;  %v998_v0 = vadd.f32 %v994_v61, %v5320_v23 }
 0xb79   :  { %1006 = vmax.xlane.f32.xlu0 %v1005_v63 }
 0xb7a   :  { %v1002_v2 = vsel %vm66_vm1, %v998_v0, -inf }
 0xb7b   :  { %1003 = vmax.xlane.f32.xlu1 %v1002_v2  ;;  %v4725_v3 = vpop.f32.mrf.mxu1 }
 0xb7c   :  { %v997_v6 = vmul.f32 0.17677669, %v4725_v3 }
 0xb7d   :  { %v985_v4 = vpop.f32.mrf.mxu1 }
 0xb7e   :  { %v996_v10 = vmul.f32 0.17677669, %v985_v4  ;;  %v1001_v14 = vadd.f32 %v997_v6, %v5334_v34 }
 0xb80   :  { %v1000_v12 = vadd.f32 %v996_v10, %v5329_v31  ;;  %v1011_v15 = vsel %vm66_vm1, %v1001_v14, -inf }
 0xb82   :  { %v1008_v13 = vsel %vm66_vm1, %v1000_v12, -inf }
 0xb83   :  { %1009 = vmax.xlane.f32.xlu1 %v1008_v13 }
 0xb87   :  { %1012 = vmax.xlane.f32.xlu1 %v1011_v15 }
 0xb98   :  { %1050 = vrot.lane.b32.xlu1 %v5490_v50, %s5194_s24 }
 0xb9c   :  { %1048 = vrot.lane.b32.xlu1 %v5490_v50, %s5195_s25 }
 0xba0   :  { %1046 = vrot.lane.b32.xlu1 %v5490_v50, %s5193_s15 }
 0xc02   :  { %v1007_v22 = vpop.xlane.xlu0 %1006 }
 0xc03   :  { %v1015_v25 = vsub.f32 %v999_v62, %v1007_v22 }
 0xc04   :  { %v1004_v16 = vpop.xlane.xlu1 %1003 }
 0xc05   :  { %v1020_v26 = vmul.f32 1.442695, %v1015_v25  ;;  %v1014_v30 = vsub.f32 %v998_v0, %v1004_v16 }
 0xc07   :  { %5064 = vpow2.f32 %v1020_v26  ;;  %v1018_v35 = vmul.f32 1.442695, %v1014_v30 }
 0xc0c   :  { %v1010_v18 = vpop.xlane.xlu1 %1009 }
 0xc0d   :  { %v1016_v28 = vsub.f32 %v1000_v12, %v1010_v18 }
 0xc0f   :  { %v1022_v33 = vmul.f32 1.442695, %v1016_v28 }
 0xc10   :  { %v1013_v19 = vpop.xlane.xlu1 %1012 }
 0xc11   :  { %v1017_v27 = vsub.f32 %v1001_v14, %v1013_v19 }
 0xc13   :  { %v1024_v29 = vmul.f32 1.442695, %v1017_v27 }
 0xc14   :  { %v1051_v21 = vpop.permute.xlu1 %1050  ;;  %v5065_v36 = vpop.eup %5064 }
 0xc15   :  { %1058 = vrot.lane.b32.xlu0 %v1051_v21, %s5196_s26  ;;  %5066 = vpow2.f32 %v1024_v29  ;;  %v1029_v37 = vsel %vm66_vm1, %v5065_v36, 0.0  ;;  %v1276_v21 = vrot.slane %v5486_v5, %v5374_v32 }
 0xc16   :  { %5068 = vpow2.f32 %v1022_v33 }
 0xc17   :  { %5070 = vpow2.f32 %v1018_v35 }
 0xc18   :  { %v1049_v24 = vpop.permute.xlu1 %1048 }
 0xc19   :  { %1056 = vrot.lane.b32.xlu1 %v1049_v24, %s5196_s26 }
 0xc1c   :  { %v1047_v46 = vpop.permute.xlu1 %1046 }
 0xc22   :  { %v5067_v38 = vpop.eup %5066 }
 0xc23   :  { %v1035_v39 = vsel %vm66_vm1, %v5067_v38, 0.0  ;;  %v5069_v40 = vpop.eup %5068 }
 0xc24   :  { %v5071_v43 = vpop.eup %5070  ;;  %v1032_v44 = vsel %vm66_vm1, %v5069_v40, 0.0 }
 0xc25   :  { %v1026_v45 = vsel %vm66_vm1, %v5071_v43, 0.0 }
 0xc34   :  { %1030 = vadd.xlane.f32.xlu0 %v1029_v37  ;;  %v4317_v37 = vld [vmem:[%s6236_s3 + $0x58] sm:$0xff] }
 0xc38   :  { %1036 = vadd.xlane.f32.xlu0 %v1035_v39  ;;  %v4345_v39 = vld [vmem:[%s6237_s4 + $0x78] sm:$0xff] }
 0xc3c   :  { %1033 = vadd.xlane.f32.xlu0 %v1032_v44  ;;  %v4342_v44 = vld [vmem:[%s6237_s4 + $0x60] sm:$0xff] }
 0xc3d   :  { %1027 = vadd.xlane.f32.xlu1 %v1026_v45  ;;  %v4341_v45 = vld [vmem:[%s6237_s4 + $0x58] sm:$0xff] }
 0xc4e   :  { %1054 = vrot.lane.b32.xlu1 %v1047_v46, %s5196_s26 }
 0xc52   :  { %1052 = vrot.lane.b32.xlu0 %v5490_v50, %s5196_s26 }
 0xc87   :  { %v1059_v7 = vpop.permute.xlu0 %1058 }
 0xc88   :  { %4726 = vmatprep.subr.mxu0 %v1059_v7 }
 0xc89   :  { %4727 = vmatpush3.msra.mxu0 %v1059_v7 }
 0xc8b   :  { %v1057_v49 = vpop.permute.xlu1 %1056 }
 0xc8c   :  { %4728 = vmatprep.subr.mxu0 %v1057_v49 }
 0xc8d   :  { %4729 = vmatpush3.msra.mxu0 %v1057_v49  ;;  %v1295_v49 = vrot.slane %v5486_v5, %v5418_v59 }
 0xcbd   :  { %v1031_v51 = vpop.xlane.xlu0 %1030 }
 0xcbe   :  { %5072 = vrcp.f32 %v1031_v51 }
 0xcc1   :  { %v1037_v9 = vpop.xlane.xlu0 %1036 }
 0xcc5   :  { %v1034_v52 = vpop.xlane.xlu0 %1033 }
 0xcc6   :  { %5074 = vrcp.f32 %v1034_v52  ;;  %v1028_v50 = vpop.xlane.xlu1 %1027  ;;  %v1300_v52 = vrot.slane %v5486_v5, %v5421_v60 }
 0xcc7   :  { %5076 = vrcp.f32 %v1028_v50 }
 0xcc8   :  { %5078 = vrcp.f32 %v1037_v9 }
 0xcc9   :  { %v1053_v54 = vpop.permute.xlu0 %1052 }
 0xcca   :  { %v1055_v53 = vpop.permute.xlu1 %1054 }
 0xccb   :  { %4730 = vmatprep.subr.mxu0 %v1055_v53  ;;  %v5073_v55 = vpop.eup %5072 }
 0xccc   :  { %4731 = vmatpush3.msra.mxu0 %v1055_v53  ;;  %v1043_v61 = vmul.f32 %v5073_v55, %v5065_v36  ;;  %v4321_v36 = vld [vmem:[%s6236_s3 + $0x78] sm:$0xff]  ;;  %v5599_v55 = vld [vmem:[%s6240_s7 + $0x20] sm:$0xff] }
 0xccd   :  { %4732 = vmatprep.subr.mxu0 %v1053_v54 }
 0xcce   :  { %4733 = vmatpush3.msra.mxu0 %v1053_v54  ;;  %v5592_v54 = vld [vmem:[%s6240_s7 + $0x30] sm:$0xff] }
 0xccf   :  { %4748 = vmatprep.subr.mxu0 %v5190_v1 }
 0xcd3   :  { %v5075_v56 = vpop.eup %5074 }
 0xcd4   :  { %v5077_v57 = vpop.eup %5076  ;;  %v1044_v63 = vmul.f32 %v5075_v56, %v5069_v40  ;;  %v4344_v40 = vld [vmem:[%s6237_s4 + $0x70] sm:$0xff] }
 0xcd5   :  { %v1042_v58 = vmul.f32 %v5077_v57, %v5071_v43  ;;  %v5079_v62 = vpop.eup %5078  ;;  %v4343_v43 = vld [vmem:[%s6237_s4 + $0x68] sm:$0xff]  ;;  %v5608_v56 = vld [vmem:[%s6240_s7 + $0x10] sm:$0xff]  ;;  %v5615_v57 = vld [vmem:[%s6240_s7] sm:$0xff] }
 0xcd6   :  { %v1045_v0 = vmul.f32 %v5079_v62, %v5067_v38  ;;  %v4315_v38 = vld [vmem:[%s6236_s3 + $0x48] sm:$0xff] }
 0xcd7   :  { %4734 = vmatprep.mubr.msk.f32.mxu0 %vm66_vm1, %v1042_v58  ;;  %v5621_v58 = vld [vmem:[%s6234_s1] sm:$0xff]  ;;  %v4339_v62 = vld [vmem:[%s6237_s4 + $0x48] sm:$0xff] }
 0xcd8   :  { %4735 = vmatmul.mubr.msk.f32.vlgmr.msra.gmra.mxu0 %vm66_vm1, %v1043_v61  ;;  %v4340_v61 = vld [vmem:[%s6237_s4 + $0x50] sm:$0xff] }
 0xcd9   :  { %4737 = vmatprep.mubr.msk.f32.mxu0 %vm66_vm1, %v1044_v63  ;;  %4749 = vmatpush3.msra.mxu0 %v4321_v36  ;;  %v4338_v63 = vld [vmem:[%s6237_s4 + $0x40] sm:$0xff] }
 0xcda   :  { %4750 = vmatprep.subr.mxu0 %v5190_v1 }
 0xcdc   :  { %4738 = vmatmul.mubr.msk.f32.gmra.mxu0 %vm66_vm1, %v1045_v0  ;;  %v1305_v0 = vrot.slane %v5486_v5, %v5442_v11 }
 0xcdd   :  { %4756 = vmatprep.mubr.msk.f32.mxu0 %vm5191_vm0, %v5190_v1 }
 0xd98   :  { %v4736_v2 = vpop.f32.mrf.mxu0 }
 0xd9a   :  { %v1142_v3 = vpop.f32.mrf.mxu0 }
 0xd9b   :  { %4742 = vmatprep.mubr.msk.f32.mxu1 %vm176_vm2, %v1142_v3 }
 0xd9c   :  { %v4739_v4 = vpop.f32.mrf.mxu0  ;;  %4743 = vmatmul.mubr.msk.f32.vlgmr.msra.gmra.mxu1 %vm176_vm2, %v4736_v2 }
 0xd9d   :  { %4760 = vmatpush3.msra.mxu1 %v4345_v39 }
 0xd9e   :  { %v1152_v6 = vpop.f32.mrf.mxu0  ;;  %4761 = vmatprep.subr.mxu1 %v5190_v1 }
 0xd9f   :  { %4745 = vmatprep.mubr.msk.f32.mxu1 %vm176_vm2, %v1152_v6  ;;  %4762 = vmatpush3.msra.mxu1 %v4344_v40  ;;  %v5643_v6 = vld [vmem:[%s6242_s9] sm:$0xff] }
 0xda0   :  { %4746 = vmatmul.mubr.msk.f32.gmra.mxu1 %vm176_vm2, %v4739_v4  ;;  %4763 = vmatprep.subr.mxu1 %v5190_v1 }
 0xda1   :  { %4775 = vmatprep.mubr.msk.f32.mxu1 %vm5191_vm0, %v5190_v1  ;;  %4764 = vmatpush3.msra.mxu1 %v4343_v43 }
 0xda2   :  { %4765 = vmatprep.subr.mxu1 %v5190_v1 }
 0xda3   :  { %4766 = vmatpush3.msra.mxu1 %v4342_v44 }
 0xda4   :  { %4767 = vmatprep.subr.mxu1 %v5190_v1 }
 0xda5   :  { %4768 = vmatpush3.msra.mxu1 %v4341_v45 }
 0xda6   :  { %4769 = vmatprep.subr.mxu1 %v5190_v1 }
 0xda7   :  { %4770 = vmatpush3.msra.mxu1 %v4340_v61 }
 0xda8   :  { %4771 = vmatprep.subr.mxu1 %v5190_v1 }
 0xda9   :  { %4772 = vmatpush3.msra.mxu1 %v4339_v62 }
 0xdaa   :  { %4773 = vmatprep.subr.mxu1 %v5190_v1 }
 0xdab   :  { %4774 = vmatpush3.msra.mxu1 %v4338_v63 }
 0xe5c   :  { %v4744_v10 = vpop.f32.mrf.mxu1 }
 0xe5d   :  { %1259 = vrot.lane.b32.xlu1 %v4744_v10, %s5192_s0 }
 0xe5e   :  { %v1239_v12 = vpop.f32.mrf.mxu1 }
 0xe60   :  { %v4747_v13 = vpop.f32.mrf.mxu1 }
 0xe61   :  { %1269 = vrot.lane.b32.xlu1 %v4747_v13, %s5197_s29 }
 0xe62   :  { %v1249_v14 = vpop.f32.mrf.mxu1 }
 0xe63   :  { %1264 = vrot.lane.b32.xlu0 %v1249_v14, %s5196_s26 }
 0xecf   :  { %v1260_v15 = vpop.permute.xlu1 %1259 }
 0xed0   :  { %v1262_v16 = vadd.f32 %v1260_v15, %v1239_v12  ;;  %v1506_v12 = vrot.slane %v5643_v6, %v5292_v8 }
 0xed3   :  { %v1270_v22 = vpop.permute.xlu1 %1269 }
 0xed5   :  { %v1265_v18 = vpop.permute.xlu0 %1264 }
 0xed6   :  { %v1267_v19 = vadd.f32 %v1265_v18, %v1262_v16 }
 0xed8   :  { %v1272_v24 = vadd.f32 %v1270_v22, %v1267_v19 }
 0xeda   :  { %v1277_v25 = vadd.f32 %v1276_v21, %v1272_v24 }
 0xedc   :  { %v1278_v26 = vadd.f32 %v1277_v25, %v5479_v48  ;;  %v4319_v48 = vld [vmem:[%s6236_s3 + $0x68] sm:$0xff] }
 0xedd   :  { %4751 = vmatpush3.msra.mxu0 %v4319_v48 }
 0xede   :  { %v1279_v27 = vsel %vm66_vm1, %v1278_v26, 0.0  ;;  %4752 = vmatprep.subr.mxu0 %v5190_v1 }
 0xedf   :  { %1280 = vadd.xlane.f32.xlu0 %v1279_v27  ;;  %4753 = vmatpush3.msra.mxu0 %v4317_v37 }
 0xee0   :  { %4754 = vmatprep.subr.mxu0 %v5190_v1 }
 0xee1   :  { %4755 = vmatpush3.msra.mxu0 %v4315_v38 }
 0xee2   :  { %4778 = vmatprep.subr.mxu0 %v5190_v1 }
 0xf68   :  { %v1281_v28 = vpop.xlane.xlu0 %1280 }
 0xf69   :  { %v1282_v29 = vmul.f32 0.03125, %v1281_v28 }
 0xf6b   :  { %v1283_v30 = vsub.f32 %v1278_v26, %v1282_v29 }
 0xf6d   :  { %v1284_v33 = vmul.f32 %v1283_v30, %v1283_v30 }
 0xf6f   :  { %v1285_v35 = vsel %vm66_vm1, %v1284_v33, 0.0 }
 0xf70   :  { %1286 = vadd.xlane.f32.xlu1 %v1285_v35 }
 0xff9   :  { %v1287_v46 = vpop.xlane.xlu1 %1286 }
 0xffa   :  { %v1288_v47 = vmul.f32 0.03125, %v1287_v46 }
 0xffc   :  { %v1289_v7 = vadd.f32 1e-05, %v1288_v47 }
 0xffe   :  { %5080 = vrsqrt.f32 %v1289_v7 }
0x100b   :  { %v5081_v51 = vpop.eup %5080 }
0x100c   :  { %v1291_v9 = vmul.f32 %v5081_v51, %v1283_v30 }
0x100e   :  { %v1296_v50 = vmul.f32 %v1295_v49, %v1291_v9 }
0x1010   :  { %v5587_v53 = vadd.f32 %v1300_v52, %v1296_v50 }
0x1012   :  { %4757 = vmatmul.mubr.msk.f32.vlgmr.msra.gmra.mxu0 %vm66_vm1, %v5587_v53 }
0x1013   :  { %4779 = vmatpush3.msra.mxu0 %v5592_v54  ;;  %4786 = vmatprep.mubr.msk.f32.mxu0 %vm5191_vm0, %v5190_v1 }
0x1014   :  { %4780 = vmatprep.subr.mxu0 %v5190_v1 }
0x1015   :  { %4781 = vmatpush3.msra.mxu0 %v5599_v55 }
0x1016   :  { %4782 = vmatprep.subr.mxu0 %v5190_v1 }
0x1017   :  { %4783 = vmatpush3.msra.mxu0 %v5608_v56 }
0x1018   :  { %4784 = vmatprep.subr.mxu0 %v5190_v1 }
0x1019   :  { %4785 = vmatpush3.msra.mxu0 %v5615_v57 }
0x101a   :  { %4787 = vmatmul.mubr.msk.f32.vlgmr.msra.gmra.mxu0 %vm66_vm1, %v5621_v58 }
0x10d2   :  { %v1375_v2 = vpop.f32.mrf.mxu0 }
0x10d3   :  { %v1376_v3 = vadd.f32 %v1375_v2, %v1305_v0 }
0x10d4   :  { %v4758_v4 = vpop.f32.mrf.mxu0 }
0x10d5   :  { %v1379_v10 = vmax.f32 %v1376_v3, 0.0 }
0x10d7   :  { %4776 = vmatmul.mubr.msk.f32.vlgmr.msra.gmra.mxu1 %vm673_vm3, %v1379_v10 }
0x10da   :  { %v1576_v13 = vpop.f32.mrf.mxu0 }
0x10db   :  { %v5648_v14 = vadd.f32 %v1576_v13, %v1506_v12 }
0x10dc   :  { %v4788_v15 = vpop.f32.mrf.mxu0 }
0x10dd   :  { %1580 = vxpose.xlu1.b32.start.end [1/1] (short) (narrow) %v5648_v14, 32  ;;  %1613 = vrot.lane.b32.xlu0 %v5648_v14, %s5192_s0 }
0x114f   :  { %v1614_v16 = vpop.permute.xlu0 %1613 }
0x1150   :  { %4789 = vmatprep.subr.mxu0 %v1614_v16 }
0x1151   :  { %4790 = vmatpush3.msra.mxu0 %v1614_v16 }
0x1159   :  { %v1596_v18 = vpop.trf.xlu1 }
0x115a   :  { %4791 = vmatprep.mubr.msk.f32.mxu0 %vm176_vm2, %v1596_v18 }
0x115d   :  { %v1597_v19 = vpop.trf.xlu1 }
0x115e   :  { %4792 = vmatmul.mubr.msk.f32.vlgmr.msra.gmra.mxu0 %vm176_vm2, %v1597_v19 }
0x1161   :  { %v1598_v21 = vpop.trf.xlu1 }
0x1162   :  { %4794 = vmatprep.mubr.msk.f32.mxu0 %vm176_vm2, %v1598_v21 }
0x1165   :  { %v1599_v22 = vpop.trf.xlu1 }
0x1166   :  { %4795 = vmatmul.mubr.msk.f32.gmra.mxu0 %vm176_vm2, %v1599_v22 }
0x1197   :  { %v5657_v24 = vpop.f32.mrf.mxu1 }
0x1199   :  { %v4777_v25 = vpop.f32.mrf.mxu1 }
0x119a   :  { %v5685_v25 = vld [vmem:[%s6235_s2 + $0x20] sm:$0xff] }
0x119b   :  { %vm1765_vm4 = vcmp.ne.f32.partialorder %v5685_v25, 0.0 }
0x121e   :  { %v4793_v26 = vpop.f32.mrf.mxu0 }
0x121f   :  { %v1714_v27 = vmul.f32 0.17677669, %v4793_v26 }
0x1220   :  { %v1694_v28 = vpop.f32.mrf.mxu0 }
0x1221   :  { %v1713_v29 = vmul.f32 0.17677669, %v1694_v28  ;;  %v1718_v30 = vadd.f32 %v1714_v27, %v5315_v20 }
0x1223   :  { %v1724_v33 = vsel %vm66_vm1, %v1718_v30, -inf  ;;  %v1717_v35 = vadd.f32 %v1713_v29, %v5320_v23 }
0x1224   :  { %1725 = vmax.xlane.f32.xlu0 %v1724_v33  ;;  %v5694_v33 = vld [vmem:[%s6235_s2 + $0x28] sm:$0xff] }
0x1225   :  { %v1721_v37 = vsel %vm66_vm1, %v1717_v35, -inf  ;;  %vm1766_vm5 = vcmp.ne.f32.partialorder %v5694_v33, 0.0  ;;  %v4386_v33 = vld [vmem:[%s6243_s10 + $0x10] sm:$0xff] }
0x1226   :  { %v4796_v36 = vpop.f32.mrf.mxu0 }
0x1227   :  { %v1716_v48 = vmul.f32 0.17677669, %v4796_v36 }
0x1228   :  { %1722 = vmax.xlane.f32.xlu0 %v1721_v37  ;;  %v1704_v38 = vpop.f32.mrf.mxu0 }
0x1229   :  { %v1715_v39 = vmul.f32 0.17677669, %v1704_v38  ;;  %v1720_v40 = vadd.f32 %v1716_v48, %v5334_v34  ;;  %v5704_v38 = vld [vmem:[%s6235_s2 + $0x30] sm:$0xff] }
0x122a   :  { %vm1767_vm6 = vcmp.ne.f32.partialorder %v5704_v38, 0.0 }
0x122b   :  { %v1730_v43 = vsel %vm66_vm1, %v1720_v40, -inf  ;;  %v1719_v44 = vadd.f32 %v1715_v39, %v5329_v31  ;;  %v5709_v39 = vld [vmem:[%s6235_s2 + $0x38] sm:$0xff] }
0x122c   :  { %1731 = vmax.xlane.f32.xlu1 %v1730_v43  ;;  %vm1768_vm7 = vcmp.ne.f32.partialorder %v5709_v39, 0.0  ;;  %v6030_v39 = vld [vmem:[%s6240_s7 + $0x78] sm:$0xff] }
0x122d   :  { %v1727_v20 = vsel %vm66_vm1, %v1719_v44, -inf }
0x122e   :  { %1728 = vmax.xlane.f32.xlu0 %v1727_v20 }
0x1244   :  { %1777 = vrot.lane.b32.xlu0 %v5648_v14, %s5194_s24 }
0x1248   :  { %1775 = vrot.lane.b32.xlu0 %v5648_v14, %s5195_s25 }
0x124c   :  { %1773 = vrot.lane.b32.xlu0 %v5648_v14, %s5193_s15 }
0x12ad   :  { %v1726_v23 = vpop.xlane.xlu0 %1725 }
0x12ae   :  { %v1734_v45 = vsub.f32 %v1718_v30, %v1726_v23 }
0x12b0   :  { %v1739_v34 = vmul.f32 1.442695, %v1734_v45  ;;  %v1501_v45 = vld [vmem:[%s6243_s10] sm:$0xff] }
0x12b1   :  { %v1723_v46 = vpop.xlane.xlu0 %1722  ;;  %4811 = vmatprep.subr.mxu0 %v1501_v45 }
0x12b2   :  { %5082 = vpow2.f32 %v1739_v34  ;;  %v1733_v47 = vsub.f32 %v1717_v35, %v1723_v46  ;;  %4812 = vmatpush3.msra.mxu0 %v1501_v45 }
0x12b3   :  { %4830 = vmatprep.subr.mxu0 %v5190_v1 }
0x12b4   :  { %v1737_v31 = vmul.f32 1.442695, %v1733_v47 }
0x12b5   :  { %v1732_v63 = vpop.xlane.xlu1 %1731 }
0x12b6   :  { %5084 = vpow2.f32 %v1737_v31  ;;  %v1736_v0 = vsub.f32 %v1720_v40, %v1732_v63 }
0x12b7   :  { %v1729_v9 = vpop.xlane.xlu0 %1728 }
0x12b8   :  { %v1743_v2 = vmul.f32 1.442695, %v1736_v0  ;;  %v1735_v3 = vsub.f32 %v1719_v44, %v1729_v9 }
0x12ba   :  { %5086 = vpow2.f32 %v1743_v2  ;;  %v1741_v4 = vmul.f32 1.442695, %v1735_v3 }
0x12bb   :  { %v1778_v50 = vpop.permute.xlu0 %1777 }
0x12bc   :  { %5088 = vpow2.f32 %v1741_v4  ;;  %v2003_v4 = vrot.slane %v5643_v6, %v5374_v32 }
0x12bf   :  { %v5083_v7 = vpop.eup %5082  ;;  %v1776_v61 = vpop.permute.xlu0 %1775 }
0x12c0   :  { %v1748_v49 = vsel %vm66_vm1, %v5083_v7, 0.0 }
0x12c1   :  { %1749 = vadd.xlane.f32.xlu1 %v1748_v49 }
0x12c3   :  { %v5085_v51 = vpop.eup %5084  ;;  %v1774_v62 = vpop.permute.xlu0 %1773 }
0x12c4   :  { %v1745_v52 = vsel %vm66_vm1, %v5085_v51, 0.0 }
0x12c5   :  { %1746 = vadd.xlane.f32.xlu0 %v1745_v52  ;;  %v1392_v52 = vrot.slane %v5486_v5, %v5448_v17 }
0x12c7   :  { %v5087_v10 = vpop.eup %5086 }
0x12c8   :  { %v1754_v12 = vsel %vm66_vm1, %v5087_v10, 0.0 }
0x12c9   :  { %v5089_v13 = vpop.eup %5088 }
0x12ca   :  { %v1751_v15 = vsel %vm66_vm1, %v5089_v13, 0.0 }
0x12d2   :  { %1783 = vrot.lane.b32.xlu1 %v1776_v61, %s5196_s26 }
0x12d6   :  { %1781 = vrot.lane.b32.xlu1 %v1774_v62, %s5196_s26 }
0x12db   :  { %1785 = vrot.lane.b32.xlu0 %v1778_v50, %s5196_s26  ;;  %v1463_v50 = vadd.f32 %v5657_v24, %v1392_v52  ;;  %v2125_v52 = vrot.slane %v5643_v6, %v5448_v17 }
0x12dd   :  { %v1466_v61 = vadd.f32 %v1463_v50, %v5587_v53 }
0x12df   :  { %v1467_v62 = vsel %vm66_vm1, %v1466_v61, 0.0 }
0x12fa   :  { %1755 = vadd.xlane.f32.xlu1 %v1754_v12 }
0x12fe   :  { %1752 = vadd.xlane.f32.xlu1 %v1751_v15 }
0x130f   :  { %1779 = vrot.lane.b32.xlu1 %v5648_v14, %s5196_s26 }
0x134a   :  { %v1750_v16 = vpop.xlane.xlu1 %1749 }
0x134e   :  { %v1747_v18 = vpop.xlane.xlu0 %1746  ;;  %v1784_v19 = vpop.permute.xlu1 %1783 }
0x134f   :  { %5090 = vrcp.f32 %v1747_v18 }
0x1350   :  { %5092 = vrcp.f32 %v1750_v16 }
0x1352   :  { %v1786_v21 = vpop.permute.xlu0 %1785  ;;  %v1782_v22 = vpop.permute.xlu1 %1781 }
0x1353   :  { %4797 = vmatprep.subr.mxu1 %v1786_v21 }
0x1354   :  { %4798 = vmatpush3.msra.mxu1 %v1786_v21  ;;  %v5751_v21 = vld [vmem:[%s6240_s7 + $0x38] sm:$0xff] }
0x1355   :  { %4799 = vmatprep.subr.mxu1 %v1784_v19 }
0x1356   :  { %4800 = vmatpush3.msra.mxu1 %v1784_v19 }
0x1357   :  { %4801 = vmatprep.subr.mxu1 %v1782_v22 }
0x1358   :  { %4802 = vmatpush3.msra.mxu1 %v1782_v22  ;;  %v5770_v22 = vld [vmem:[%s6240_s7 + $0x8] sm:$0xff] }
0x135c   :  { %v5091_v26 = vpop.eup %5090 }
0x135d   :  { %v1761_v14 = vmul.f32 %v5091_v26, %v5085_v51  ;;  %v5093_v29 = vpop.eup %5092 }
0x135e   :  { %v1762_v35 = vmul.f32 %v5093_v29, %v5083_v7 }
0x135f   :  { %v1769_v27 = vsel %vm1765_vm4, -1e+09, %v1761_v14 }
0x1360   :  { %4805 = vmatprep.mubr.msk.f32.mxu1 %vm66_vm1, %v1769_v27  ;;  %v1770_v48 = vsel %vm1766_vm5, -1e+09, %v1762_v35 }
0x1383   :  { %v1756_v28 = vpop.xlane.xlu1 %1755 }
0x1384   :  { %5094 = vrcp.f32 %v1756_v28 }
0x1387   :  { %v1753_v30 = vpop.xlane.xlu1 %1752 }
0x1388   :  { %5096 = vrcp.f32 %v1753_v30 }
0x138b   :  { %v1780_v36 = vpop.permute.xlu1 %1779 }
0x138c   :  { %4803 = vmatprep.subr.mxu1 %v1780_v36 }
0x138d   :  { %4804 = vmatpush3.msra.mxu1 %v1780_v36 }
0x138e   :  { %4806 = vmatmul.mubr.msk.f32.vlgmr.msra.gmra.mxu1 %vm66_vm1, %v1770_v48  ;;  %4819 = vmatprep.subr.mxu1 %v5190_v1 }
0x1391   :  { %v5095_v37 = vpop.eup %5094 }
0x1392   :  { %v1764_v43 = vmul.f32 %v5095_v37, %v5087_v10 }
0x1394   :  { %v1772_v23 = vsel %vm1768_vm7, -1e+09, %v1764_v43 }
0x1395   :  { %v5097_v40 = vpop.eup %5096 }
0x1396   :  { %v1763_v44 = vmul.f32 %v5097_v40, %v5089_v13  ;;  %v1483_v40 = vrot.slane %v5486_v5, %v5470_v41 }
0x1398   :  { %v1771_v20 = vsel %vm1767_vm6, -1e+09, %v1763_v44 }
0x1399   :  { %4808 = vmatprep.mubr.msk.f32.mxu1 %vm66_vm1, %v1771_v20  ;;  %v1488_v20 = vrot.slane %v5486_v5, %v5473_v42 }
0x139a   :  { %4809 = vmatmul.mubr.msk.f32.gmra.mxu1 %vm66_vm1, %v1772_v23 }
0x139b   :  { %4827 = vmatprep.mubr.msk.f32.mxu1 %vm5191_vm0, %v5190_v1 }
0x144e   :  { %v4807_v34 = vpop.f32.mrf.mxu1 }
0x1450   :  { %v1869_v46 = vpop.f32.mrf.mxu1 }
0x1451   :  { %4813 = vmatprep.mubr.msk.f32.mxu0 %vm176_vm2, %v1869_v46 }
0x1452   :  { %4814 = vmatmul.mubr.msk.f32.vlgmr.msra.gmra.mxu0 %vm176_vm2, %v4807_v34 }
0x1453   :  { %4831 = vmatpush3.msra.mxu0 %v5751_v21 }
0x1454   :  { %4832 = vmatprep.subr.mxu0 %v5190_v1 }
0x145a   :  { %v4810_v47 = vpop.f32.mrf.mxu1 }
0x145c   :  { %v1879_v31 = vpop.f32.mrf.mxu1 }
0x145d   :  { %4816 = vmatprep.mubr.msk.f32.mxu0 %vm176_vm2, %v1879_v31  ;;  %v2022_v31 = vrot.slane %v5643_v6, %v5418_v59 }
0x145e   :  { %4817 = vmatmul.mubr.msk.f32.gmra.mxu0 %vm176_vm2, %v4810_v47 }
0x145f   :  { %4838 = vmatprep.mubr.msk.f32.mxu0 %vm5191_vm0, %v5190_v1 }
0x1512   :  { %v4815_v7 = vpop.f32.mrf.mxu0 }
0x1513   :  { %1986 = vrot.lane.b32.xlu0 %v4815_v7, %s5192_s0 }
0x1514   :  { %v1966_v49 = vpop.f32.mrf.mxu0 }
0x151e   :  { %v4818_v51 = vpop.f32.mrf.mxu0 }
0x151f   :  { %1996 = vrot.lane.b32.xlu0 %v4818_v51, %s5197_s29 }
0x1520   :  { %v1976_v9 = vpop.f32.mrf.mxu0 }
0x1521   :  { %1991 = vrot.lane.b32.xlu1 %v1976_v9, %s5196_s26 }
0x153e   :  { %1468 = vadd.xlane.f32.xlu0 %v1467_v62 }
0x1554   :  { %2043 = vrot.lane.b32.xlu0 %v5592_v54, %s5197_s29 }
0x1585   :  { %v1987_v63 = vpop.permute.xlu0 %1986 }
0x1586   :  { %v1989_v0 = vadd.f32 %v1987_v63, %v1966_v49  ;;  %v2027_v49 = vrot.slane %v5643_v6, %v5421_v60  ;;  %v2032_v63 = vrot.slane %v5643_v6, %v5442_v11 }
0x1591   :  { %v1997_v10 = vpop.permute.xlu0 %1996 }
0x1593   :  { %v1992_v2 = vpop.permute.xlu1 %1991 }
0x1594   :  { %v1994_v3 = vadd.f32 %v1992_v2, %v1989_v0 }
0x1596   :  { %v1999_v12 = vadd.f32 %v1997_v10, %v1994_v3 }
0x1598   :  { %v2004_v13 = vadd.f32 %v2003_v4, %v1999_v12 }
0x159a   :  { %v2005_v24 = vadd.f32 %v2004_v13, %v5621_v58  ;;  %v5765_v58 = vld [vmem:[%s6240_s7 + $0x18] sm:$0xff] }
0x159c   :  { %v2006_v53 = vsel %vm66_vm1, %v2005_v24, 0.0 }
0x159d   :  { %2007 = vadd.xlane.f32.xlu1 %v2006_v53 }
0x15ae   :  { %2041 = vrot.lane.b32.xlu1 %v5599_v55, %s5197_s29  ;;  %v5758_v55 = vld [vmem:[%s6240_s7 + $0x28] sm:$0xff] }
0x15af   :  { %4833 = vmatpush3.msra.mxu0 %v5758_v55 }
0x15b0   :  { %4834 = vmatprep.subr.mxu0 %v5190_v1 }
0x15b1   :  { %4835 = vmatpush3.msra.mxu0 %v5765_v58 }
0x15b2   :  { %4836 = vmatprep.subr.mxu0 %v5190_v1 }
0x15b3   :  { %4837 = vmatpush3.msra.mxu0 %v5770_v22 }
0x15c7   :  { %v1469_v15 = vpop.xlane.xlu0 %1468 }
0x15c8   :  { %v1470_v54 = vmul.f32 0.03125, %v1469_v15 }
0x15ca   :  { %v1471_v16 = vsub.f32 %v1466_v61, %v1470_v54 }
0x15cb   :  { %v2044_v26 = vpop.permute.xlu0 %2043 }
0x15cc   :  { %v1472_v18 = vmul.f32 %v1471_v16, %v1471_v16  ;;  %4820 = vmatpush3.msra.mxu1 %v2044_v26  ;;  %v5821_v26 = vld [vmem:[%s6235_s2 + $0x8] sm:$0xff] }
0x15cd   :  { %4821 = vmatprep.subr.mxu1 %v5190_v1 }
0x15ce   :  { %v1473_v19 = vsel %vm66_vm1, %v1472_v18, 0.0 }
0x15d2   :  { %1474 = vadd.xlane.f32.xlu1 %v1473_v19 }
0x1626   :  { %v2008_v14 = vpop.xlane.xlu1 %2007 }
0x1627   :  { %v2009_v27 = vmul.f32 0.03125, %v2008_v14 }
0x1629   :  { %v2010_v28 = vsub.f32 %v2005_v24, %v2009_v27 }
0x162a   :  { %v2042_v29 = vpop.permute.xlu1 %2041 }
0x162b   :  { %v2011_v30 = vmul.f32 %v2010_v28, %v2010_v28  ;;  %4822 = vmatpush3.msra.mxu1 %v2042_v29 }
0x162c   :  { %4823 = vmatprep.subr.mxu1 %v5190_v1 }
0x162d   :  { %v2012_v35 = vsel %vm66_vm1, %v2011_v30, 0.0 }
0x162e   :  { %2013 = vadd.xlane.f32.xlu0 %v2012_v35 }
0x1644   :  { %2039 = vrot.lane.b32.xlu0 %v5608_v56, %s5197_s29 }
0x1648   :  { %2037 = vrot.lane.b32.xlu0 %v5615_v57, %s5197_s29 }
0x165b   :  { %v1475_v36 = vpop.xlane.xlu1 %1474 }
0x165c   :  { %v1476_v48 = vmul.f32 0.03125, %v1475_v36  ;;  %v5828_v36 = vld [vmem:[%s6235_s2 + $0x18] sm:$0xff] }
0x165e   :  { %v1477_v37 = vadd.f32 1e-05, %v1476_v48 }
0x1660   :  { %5098 = vrsqrt.f32 %v1477_v37 }
0x166d   :  { %v5099_v43 = vpop.eup %5098 }
0x166e   :  { %v1479_v44 = vmul.f32 %v5099_v43, %v1471_v16  ;;  %v5814_v16 = vld [vmem:[%s6235_s2] sm:$0xff] }
0x1670   :  { %v1484_v23 = vmul.f32 %v1483_v40, %v1479_v44  ;;  %v5835_v40 = vld [vmem:[%s6235_s2 + $0x10] sm:$0xff] }
0x1672   :  { %v5786_v45 = vadd.f32 %v1488_v20, %v1484_v23 }
0x1674   :  { %4839 = vmatmul.mubr.msk.f32.vlgmr.msra.gmra.mxu0 %vm66_vm1, %v5786_v45 }
0x16b7   :  { %v2014_v56 = vpop.xlane.xlu0 %2013 }
0x16b8   :  { %v2015_v57 = vmul.f32 0.03125, %v2014_v56 }
0x16ba   :  { %v2016_v34 = vadd.f32 1e-05, %v2015_v57 }
0x16bb   :  { %v2040_v46 = vpop.permute.xlu0 %2039 }
0x16bc   :  { %5100 = vrsqrt.f32 %v2016_v34  ;;  %4824 = vmatpush3.msra.mxu1 %v2040_v46 }
0x16bd   :  { %4825 = vmatprep.subr.mxu1 %v5190_v1 }
0x16bf   :  { %v2038_v47 = vpop.permute.xlu0 %2037 }
0x16c0   :  { %4826 = vmatpush3.msra.mxu1 %v2038_v47 }
0x16c9   :  { %v5101_v5 = vpop.eup %5100 }
0x16ca   :  { %v2018_v7 = vmul.f32 %v5101_v5, %v2010_v28 }
0x16cc   :  { %v2023_v51 = vmul.f32 %v2022_v31, %v2018_v7 }
0x16ce   :  { %v5795_v9 = vadd.f32 %v2027_v49, %v2023_v51 }
0x16d0   :  { %4828 = vmatmul.mubr.msk.f32.vlgmr.msra.gmra.mxu1 %vm66_vm1, %v5795_v9 }
0x1734   :  { %v2195_v50 = vpop.f32.mrf.mxu0 }
0x1735   :  { %v5801_v61 = vadd.f32 %v2195_v50, %v2125_v52 }
0x1736   :  { %v4840_v62 = vpop.f32.mrf.mxu0 }
0x1737   :  { %4841 = vmatprep.subr.mxu1 %v5801_v61 }
0x1738   :  { %4842 = vmatpush3.msra.mxu1 %v5801_v61 }
0x1790   :  { %v2118_v0 = vpop.f32.mrf.mxu1 }
0x1791   :  { %v2119_v2 = vadd.f32 %v2118_v0, %v2032_v63 }
0x1792   :  { %v4829_v3 = vpop.f32.mrf.mxu1 }
0x1793   :  { %2199 = vxpose.xlu0.b32.start.end [1/1] (short) (narrow) %v2119_v2, 32 }
0x180f   :  { %v2215_v4 = vpop.trf.xlu0 }
0x1810   :  { %4843 = vmatprep.mubr.msk.f32.mxu1 %vm176_vm2, %v2215_v4 }
0x1813   :  { %v2216_v10 = vpop.trf.xlu0 }
0x1814   :  { %4844 = vmatmul.mubr.msk.f32.vlgmr.msra.gmra.mxu1 %vm176_vm2, %v2216_v10 }
0x1817   :  { %v2217_v12 = vpop.trf.xlu0 }
0x1818   :  { %4846 = vmatprep.mubr.msk.f32.mxu1 %vm176_vm2, %v2217_v12 }
0x181b   :  { %v2218_v13 = vpop.trf.xlu0 }
0x181c   :  { %4847 = vmatmul.mubr.msk.f32.gmra.mxu1 %vm176_vm2, %v2218_v13 }
0x18d4   :  { %v4845_v24 = vpop.f32.mrf.mxu1 }
0x18d5   :  { %v2329_v15 = vmul.f32 0.17677669, %v4845_v24  ;;  %v1502_v24 = vld [vmem:[%s6243_s10 + $0x8] sm:$0xff] }
0x18d6   :  { %v2309_v53 = vpop.f32.mrf.mxu1  ;;  %4863 = vmatprep.subr.mxu1 %v1502_v24 }
0x18d7   :  { %v2328_v54 = vmul.f32 0.17677669, %v2309_v53  ;;  %v2333_v14 = vadd.f32 %v5821_v26, %v2329_v15  ;;  %4864 = vmatpush3.msra.mxu1 %v1502_v24 }
0x18d8   :  { %4882 = vmatprep.subr.mxu1 %v5190_v1 }
0x18d9   :  { %v2332_v18 = vadd.f32 %v5814_v16, %v2328_v54  ;;  %v2339_v35 = vsel %vm66_vm1, %v2333_v14, -inf }
0x18db   :  { %v2336_v19 = vsel %vm66_vm1, %v2332_v18, -inf }
0x18dc   :  { %2337 = vmax.xlane.f32.xlu1 %v2336_v19  ;;  %v4848_v27 = vpop.f32.mrf.mxu1 }
0x18dd   :  { %v2331_v28 = vmul.f32 0.17677669, %v4848_v27 }
0x18de   :  { %v2319_v29 = vpop.f32.mrf.mxu1 }
0x18df   :  { %v2330_v30 = vmul.f32 0.17677669, %v2319_v29  ;;  %v2335_v48 = vadd.f32 %v5828_v36, %v2331_v28 }
0x18e0   :  { %2340 = vmax.xlane.f32.xlu1 %v2339_v35 }
0x18e1   :  { %v2345_v37 = vsel %vm66_vm1, %v2335_v48, -inf  ;;  %v2334_v43 = vadd.f32 %v5835_v40, %v2330_v30 }
0x18e3   :  { %v2342_v44 = vsel %vm66_vm1, %v2334_v43, -inf }
0x18e4   :  { %2346 = vmax.xlane.f32.xlu1 %v2345_v37  ;;  %2343 = vmax.xlane.f32.xlu0 %v2342_v44 }
0x18f5   :  { %2385 = vrot.lane.b32.xlu1 %v5801_v61, %s5194_s24 }
0x18f9   :  { %2383 = vrot.lane.b32.xlu1 %v5801_v61, %s5195_s25 }
0x18fd   :  { %2381 = vrot.lane.b32.xlu1 %v5801_v61, %s5193_s15 }
0x1965   :  { %v2338_v20 = vpop.xlane.xlu1 %2337 }
0x1966   :  { %v2348_v50 = vsub.f32 %v2332_v18, %v2338_v20 }
0x1968   :  { %v2352_v2 = vmul.f32 1.442695, %v2348_v50 }
0x1969   :  { %v2341_v23 = vpop.xlane.xlu1 %2340 }
0x196a   :  { %v2349_v56 = vsub.f32 %v2333_v14, %v2341_v23 }
0x196c   :  { %v2354_v57 = vmul.f32 1.442695, %v2349_v56 }
0x196d   :  { %v2347_v34 = vpop.xlane.xlu1 %2346  ;;  %v2344_v46 = vpop.xlane.xlu0 %2343 }
0x196e   :  { %5102 = vpow2.f32 %v2354_v57  ;;  %v2351_v47 = vsub.f32 %v2335_v48, %v2347_v34  ;;  %v2350_v31 = vsub.f32 %v2334_v43, %v2344_v46 }
0x1970   :  { %v2358_v5 = vmul.f32 1.442695, %v2351_v47  ;;  %v2356_v7 = vmul.f32 1.442695, %v2350_v31 }
0x1971   :  { %v2386_v49 = vpop.permute.xlu1 %2385 }
0x1972   :  { %5104 = vpow2.f32 %v2358_v5  ;;  %2393 = vrot.lane.b32.xlu1 %v2386_v49, %s5192_s0 }
0x1973   :  { %5106 = vpow2.f32 %v2356_v7 }
0x1974   :  { %5108 = vpow2.f32 %v2352_v2 }
0x1975   :  { %v2384_v12 = vpop.permute.xlu1 %2383 }
0x1979   :  { %v2382_v13 = vpop.permute.xlu1 %2381 }
0x197b   :  { %v5103_v51 = vpop.eup %5102 }
0x197c   :  { %v2363_v52 = vsel %vm66_vm1, %v5103_v51, 0.0 }
0x197d   :  { %2364 = vadd.xlane.f32.xlu0 %v2363_v52 }
0x197f   :  { %v5105_v62 = vpop.eup %5104 }
0x1980   :  { %v2369_v63 = vsel %vm66_vm1, %v5105_v62, 0.0  ;;  %v5107_v0 = vpop.eup %5106 }
0x1981   :  { %2370 = vadd.xlane.f32.xlu0 %v2369_v63  ;;  %v2366_v3 = vsel %vm66_vm1, %v5107_v0, 0.0  ;;  %v5109_v4 = vpop.eup %5108 }
0x1982   :  { %v2360_v10 = vsel %vm66_vm1, %v5109_v4, 0.0 }
0x1985   :  { %2367 = vadd.xlane.f32.xlu0 %v2366_v3 }
0x1996   :  { %2361 = vadd.xlane.f32.xlu1 %v2360_v10 }
0x199b   :  { %2391 = vrot.lane.b32.xlu0 %v2384_v12, %s5192_s0 }
0x19a7   :  { %2389 = vrot.lane.b32.xlu1 %v2382_v13, %s5192_s0 }
0x19ab   :  { %2387 = vrot.lane.b32.xlu1 %v5801_v61, %s5192_s0 }
0x19e4   :  { %v2394_v53 = vpop.permute.xlu1 %2393 }
0x19e5   :  { %4849 = vmatprep.subr.mxu0 %v2394_v53 }
0x19e6   :  { %4850 = vmatpush3.msra.mxu0 %v2394_v53 }
0x1a06   :  { %v2365_v15 = vpop.xlane.xlu0 %2364 }
0x1a07   :  { %5110 = vrcp.f32 %v2365_v15 }
0x1a0a   :  { %v2371_v54 = vpop.xlane.xlu0 %2370 }
0x1a0e   :  { %v2368_v18 = vpop.xlane.xlu0 %2367 }
0x1a0f   :  { %5112 = vrcp.f32 %v2368_v18 }
0x1a12   :  { %v2392_v19 = vpop.permute.xlu0 %2391 }
0x1a13   :  { %4851 = vmatprep.subr.mxu0 %v2392_v19 }
0x1a14   :  { %4852 = vmatpush3.msra.mxu0 %v2392_v19  ;;  %v5111_v28 = vpop.eup %5110 }
0x1a15   :  { %v2377_v48 = vmul.f32 %v5111_v28, %v5103_v51  ;;  %v2611_v51 = vrot.slane %v5643_v6, %v5470_v41 }
0x1a1c   :  { %v5113_v29 = vpop.eup %5112 }
0x1a1d   :  { %v2378_v43 = vmul.f32 %v5113_v29, %v5107_v0 }
0x1a1f   :  { %v2362_v61 = vpop.xlane.xlu1 %2361 }
0x1a20   :  { %5114 = vrcp.f32 %v2362_v61 }
0x1a21   :  { %5116 = vrcp.f32 %v2371_v54 }
0x1a23   :  { %v2390_v14 = vpop.permute.xlu1 %2389 }
0x1a24   :  { %4853 = vmatprep.subr.mxu0 %v2390_v14 }
0x1a25   :  { %4854 = vmatpush3.msra.mxu0 %v2390_v14  ;;  %v1500_v14 = vld [vmem:[%s6242_s9 + $0x8] sm:$0x1f] }
0x1a27   :  { %v2388_v27 = vpop.permute.xlu1 %2387 }
0x1a28   :  { %4855 = vmatprep.subr.mxu0 %v2388_v27 }
0x1a29   :  { %4856 = vmatpush3.msra.mxu0 %v2388_v27  ;;  %v2630_v27 = vrot.slane %v5643_v6, %v5473_v42  ;;  %v2732_v6 = vld [vmem:[%s6241_s8 + $0x8] sm:$0xff] }
0x1a2a   :  { %4871 = vmatprep.subr.mxu0 %v5190_v1 }
0x1a2d   :  { %v5115_v30 = vpop.eup %5114 }
0x1a2e   :  { %v2376_v35 = vmul.f32 %v5115_v30, %v5109_v4  ;;  %v5117_v37 = vpop.eup %5116  ;;  %v2635_v30 = vrot.slane %v1500_v14, %v5292_v8 }
0x1a2f   :  { %v2379_v44 = vmul.f32 %v5117_v37, %v5105_v62  ;;  %v2733_v37 = vld [vmem:[%s6241_s8 + $0x10] sm:$0xff] }
0x1a30   :  { %4857 = vmatprep.mubr.msk.f32.mxu0 %vm66_vm1, %v2376_v35 }
0x1a31   :  { %4858 = vmatmul.mubr.msk.f32.vlgmr.msra.gmra.mxu0 %vm66_vm1, %v2377_v48 }
0x1a32   :  { %4860 = vmatprep.mubr.msk.f32.mxu0 %vm66_vm1, %v2378_v43  ;;  %v2731_v43 = vld [vmem:[%s6241_s8] sm:$0xff] }
0x1a35   :  { %4861 = vmatmul.mubr.msk.f32.gmra.mxu0 %vm66_vm1, %v2379_v44  ;;  %v2640_v44 = vrot.slane %v1500_v14, %v5374_v32 }
0x1a36   :  { %4879 = vmatprep.mubr.msk.f32.mxu0 %vm5191_vm0, %v5190_v1 }
0x1af1   :  { %v4859_v20 = vpop.f32.mrf.mxu0 }
0x1af3   :  { %v2477_v23 = vpop.f32.mrf.mxu0 }
0x1af4   :  { %4865 = vmatprep.mubr.msk.f32.mxu1 %vm176_vm2, %v2477_v23 }
0x1af5   :  { %v4862_v56 = vpop.f32.mrf.mxu0  ;;  %4866 = vmatmul.mubr.msk.f32.vlgmr.msra.gmra.mxu1 %vm176_vm2, %v4859_v20 }
0x1af7   :  { %v2487_v57 = vpop.f32.mrf.mxu0 }
0x1af8   :  { %4868 = vmatprep.mubr.msk.f32.mxu1 %vm176_vm2, %v2487_v57 }
0x1af9   :  { %4869 = vmatmul.mubr.msk.f32.gmra.mxu1 %vm176_vm2, %v4862_v56 }
0x1afa   :  { %4898 = vmatprep.mubr.msk.f32.mxu1 %vm5191_vm0, %v5190_v1 }
0x1bb5   :  { %v4867_v34 = vpop.f32.mrf.mxu1 }
0x1bb6   :  { %2594 = vrot.lane.b32.xlu0 %v4867_v34, %s5192_s0  ;;  %v2742_v34 = vrot.slane %v1500_v14, %v5418_v59 }
0x1bb7   :  { %v2574_v46 = vpop.f32.mrf.mxu1 }
0x1bb9   :  { %v4870_v47 = vpop.f32.mrf.mxu1 }
0x1bba   :  { %2604 = vrot.lane.b32.xlu0 %v4870_v47, %s5197_s29 }
0x1bbb   :  { %v2584_v31 = vpop.f32.mrf.mxu1 }
0x1bbc   :  { %2599 = vrot.lane.b32.xlu1 %v2584_v31, %s5196_s26 }
0x1c28   :  { %v2595_v5 = vpop.permute.xlu0 %2594 }
0x1c29   :  { %v2597_v7 = vadd.f32 %v2595_v5, %v2574_v46 }
0x1c2c   :  { %v2605_v50 = vpop.permute.xlu0 %2604 }
0x1c2e   :  { %v2600_v49 = vpop.permute.xlu1 %2599 }
0x1c2f   :  { %v2602_v52 = vadd.f32 %v2600_v49, %v2597_v7 }
0x1c31   :  { %v2607_v62 = vadd.f32 %v2605_v50, %v2602_v52 }
0x1c33   :  { %v2612_v63 = vadd.f32 %v2611_v51, %v2607_v62 }
0x1c35   :  { %v2613_v0 = vadd.f32 %v2612_v63, %v5795_v9  ;;  %v2736_v9 = vld [vmem:[%s6241_s8 + $0x28] sm:$0xff]  ;;  %v5939_v63 = vld [vmem:[%s6240_s7 + $0x70] sm:$0xff] }
0x1c37   :  { %v2614_v2 = vsel %vm66_vm1, %v2613_v0, 0.0 }
0x1c38   :  { %2615 = vadd.xlane.f32.xlu1 %v2614_v2  ;;  %v5951_v2 = vld [vmem:[%s6240_s7 + $0x50] sm:$0xff] }
0x1c49   :  { %2649 = vrot.lane.b32.xlu1 %v5758_v55, %s5196_s26  ;;  %v2738_v55 = vld [vmem:[%s6241_s8 + $0x38] sm:$0xff] }
0x1c4a   :  { %4883 = vmatpush3.msra.mxu1 %v2738_v55 }
0x1c4b   :  { %4884 = vmatprep.subr.mxu1 %v5190_v1 }
0x1c4d   :  { %2647 = vrot.lane.b32.xlu1 %v5765_v58, %s5196_s26  ;;  %v2737_v58 = vld [vmem:[%s6241_s8 + $0x30] sm:$0xff] }
0x1c4e   :  { %4885 = vmatpush3.msra.mxu1 %v2737_v58 }
0x1c4f   :  { %4886 = vmatprep.subr.mxu1 %v5190_v1 }
0x1c50   :  { %4887 = vmatpush3.msra.mxu1 %v2736_v9  ;;  %v2838_v9 = vrot.slane %v1500_v14, %v5442_v11 }
0x1c51   :  { %4888 = vmatprep.subr.mxu1 %v5190_v1 }
0x1cc1   :  { %v2616_v3 = vpop.xlane.xlu1 %2615 }
0x1cc2   :  { %v2617_v4 = vmul.f32 0.03125, %v2616_v3  ;;  %v5958_v3 = vld [vmem:[%s6240_s7 + $0x40] sm:$0xff] }
0x1cc4   :  { %v2618_v10 = vsub.f32 %v2613_v0, %v2617_v4  ;;  %v5945_v0 = vld [vmem:[%s6240_s7 + $0x60] sm:$0xff] }
0x1cc5   :  { %v2650_v53 = vpop.permute.xlu1 %2649 }
0x1cc6   :  { %v2619_v12 = vmul.f32 %v2618_v10, %v2618_v10 }
0x1cc8   :  { %v2620_v13 = vsel %vm66_vm1, %v2619_v12, 0.0 }
0x1cc9   :  { %2621 = vadd.xlane.f32.xlu0 %v2620_v13  ;;  %v2648_v19 = vpop.permute.xlu1 %2647  ;;  %v2833_v13 = vrot.slane %v1500_v14, %v5421_v60 }
0x1cdf   :  { %2651 = vrot.lane.b32.xlu0 %v5751_v21, %s5196_s26  ;;  %v2735_v21 = vld [vmem:[%s6241_s8 + $0x20] sm:$0xff] }
0x1ce0   :  { %4889 = vmatpush3.msra.mxu1 %v2735_v21 }
0x1ce1   :  { %4890 = vmatprep.subr.mxu1 %v5190_v1 }
0x1ce3   :  { %2645 = vrot.lane.b32.xlu0 %v5770_v22, %s5196_s26  ;;  %v2734_v22 = vld [vmem:[%s6241_s8 + $0x18] sm:$0xff] }
0x1ce4   :  { %4891 = vmatpush3.msra.mxu1 %v2734_v22 }
0x1ce5   :  { %4892 = vmatprep.subr.mxu1 %v5190_v1 }
0x1ce6   :  { %4893 = vmatpush3.msra.mxu1 %v2733_v37 }
0x1ce7   :  { %4894 = vmatprep.subr.mxu1 %v5190_v1 }
0x1ce8   :  { %4895 = vmatpush3.msra.mxu1 %v2732_v6 }
0x1ce9   :  { %4896 = vmatprep.subr.mxu1 %v5190_v1 }
0x1cea   :  { %4897 = vmatpush3.msra.mxu1 %v2731_v43 }
0x1d52   :  { %v2622_v24 = vpop.xlane.xlu0 %2621 }
0x1d53   :  { %v2623_v15 = vmul.f32 0.03125, %v2622_v24  ;;  %v5972_v24 = vld [vmem:[%s6242_s9 + $0x10] sm:$0xff] }
0x1d55   :  { %v2624_v54 = vadd.f32 1e-05, %v2623_v15 }
0x1d56   :  { %v2652_v18 = vpop.permute.xlu0 %2651 }
0x1d57   :  { %5118 = vrsqrt.f32 %v2624_v54  ;;  %4872 = vmatpush3.msra.mxu0 %v2652_v18 }
0x1d58   :  { %4873 = vmatprep.subr.mxu0 %v5190_v1 }
0x1d59   :  { %4874 = vmatpush3.msra.mxu0 %v2650_v53  ;;  %v2858_v53 = vrot.slane %v5972_v24, %v5292_v8 }
0x1d5a   :  { %4875 = vmatprep.subr.mxu0 %v5190_v1  ;;  %v2646_v61 = vpop.permute.xlu0 %2645 }
0x1d5b   :  { %4876 = vmatpush3.msra.mxu0 %v2648_v19 }
0x1d5c   :  { %4877 = vmatprep.subr.mxu0 %v5190_v1 }
0x1d5d   :  { %4878 = vmatpush3.msra.mxu0 %v2646_v61 }
0x1d5e   :  { %4901 = vmatprep.subr.mxu0 %v5190_v1 }
0x1d64   :  { %v5119_v28 = vpop.eup %5118 }
0x1d65   :  { %v2626_v29 = vmul.f32 %v5119_v28, %v2618_v10 }
0x1d67   :  { %v2631_v35 = vmul.f32 %v2630_v27, %v2626_v29 }
0x1d69   :  { %v2636_v48 = vadd.f32 %v2635_v30, %v2631_v35 }
0x1d6b   :  { %4880 = vmatmul.mubr.msk.f32.vlgmr.msra.gmra.mxu0 %vm66_vm1, %v2636_v48 }
0x1d6c   :  { %4909 = vmatprep.mubr.msk.f32.mxu0 %vm5191_vm0, %v5190_v1  ;;  %4902 = vmatpush3.msra.mxu0 %v5939_v63 }
0x1d6d   :  { %4903 = vmatprep.subr.mxu0 %v5190_v1 }
0x1d6e   :  { %4904 = vmatpush3.msra.mxu0 %v5945_v0 }
0x1d6f   :  { %4905 = vmatprep.subr.mxu0 %v5190_v1 }
0x1d70   :  { %4906 = vmatpush3.msra.mxu0 %v5951_v2 }
0x1d71   :  { %4907 = vmatprep.subr.mxu0 %v5190_v1 }
0x1d72   :  { %4908 = vmatpush3.msra.mxu0 %v5958_v3 }
0x1e2b   :  { %v2726_v20 = vpop.f32.mrf.mxu0 }
0x1e2c   :  { %v2727_v23 = vadd.f32 %v2726_v20, %v2640_v44 }
0x1e2d   :  { %v4881_v56 = vpop.f32.mrf.mxu0 }
0x1e2e   :  { %v2730_v57 = vmax.f32 %v2727_v23, 0.0 }
0x1e30   :  { %4899 = vmatmul.mubr.msk.f32.vlgmr.msra.gmra.mxu1 %vm673_vm3, %v2730_v57 }
0x1ef0   :  { %v2812_v46 = vpop.f32.mrf.mxu1 }
0x1ef1   :  { %v2813_v47 = vadd.f32 %v2812_v46, %v2742_v34 }
0x1ef2   :  { %v4900_v31 = vpop.f32.mrf.mxu1 }
0x1ef3   :  { %v2816_v5 = vadd.f32 %v2813_v47, %v2636_v48 }
0x1ef5   :  { %v2817_v7 = vsel %vm66_vm1, %v2816_v5, 0.0 }
0x1ef6   :  { %2818 = vadd.xlane.f32.xlu1 %v2817_v7 }
0x1f7f   :  { %v2819_v49 = vpop.xlane.xlu1 %2818 }
0x1f80   :  { %v2820_v51 = vmul.f32 0.03125, %v2819_v49 }
0x1f82   :  { %v2821_v52 = vsub.f32 %v2816_v5, %v2820_v51 }
0x1f84   :  { %v2822_v50 = vmul.f32 %v2821_v52, %v2821_v52 }
0x1f86   :  { %v2823_v62 = vsel %vm66_vm1, %v2822_v50, 0.0 }
0x1f87   :  { %2824 = vadd.xlane.f32.xlu0 %v2823_v62 }
0x2010   :  { %v2825_v4 = vpop.xlane.xlu0 %2824 }
0x2011   :  { %v2826_v10 = vmul.f32 0.03125, %v2825_v4 }
0x2013   :  { %v2827_v12 = vadd.f32 1e-05, %v2826_v10 }
0x2015   :  { %5120 = vrsqrt.f32 %v2827_v12 }
0x2022   :  { %v5121_v55 = vpop.eup %5120 }
0x2023   :  { %v2829_v58 = vmul.f32 %v5121_v55, %v2821_v52 }
0x2025   :  { %v2834_v21 = vmul.f32 %v2833_v13, %v2829_v58 }
0x2027   :  { %v5965_v22 = vadd.f32 %v2838_v9, %v2834_v21 }
0x2029   :  { %4910 = vmatmul.mubr.msk.f32.vlgmr.msra.gmra.mxu0 %vm66_vm1, %v5965_v22 }
0x20e9   :  { %v2928_v15 = vpop.f32.mrf.mxu0 }
0x20ea   :  { %v5976_v54 = vadd.f32 %v2928_v15, %v2858_v53 }
0x20eb   :  { %v4911_v18 = vpop.f32.mrf.mxu0 }
0x20ec   :  { %2932 = vxpose.xlu1.b32.start.end [1/1] (short) (narrow) %v5976_v54, 32  ;;  %2965 = vrot.lane.b32.xlu0 %v5976_v54, %s5192_s0 }
0x215e   :  { %v2966_v19 = vpop.permute.xlu0 %2965 }
0x215f   :  { %4912 = vmatprep.subr.mxu0 %v2966_v19 }
0x2160   :  { %4913 = vmatpush3.msra.mxu0 %v2966_v19 }
0x2161   :  { %4934 = vmatprep.subr.mxu0 %v4386_v33 }
0x2168   :  { %v2948_v61 = vpop.trf.xlu1 }
0x2169   :  { %4914 = vmatprep.mubr.msk.f32.mxu0 %vm176_vm2, %v2948_v61 }
0x216c   :  { %v2949_v14 = vpop.trf.xlu1 }
0x216d   :  { %4915 = vmatmul.mubr.msk.f32.vlgmr.msra.gmra.mxu0 %vm176_vm2, %v2949_v14 }
0x216e   :  { %4935 = vmatpush3.msra.mxu0 %v4386_v33 }
0x216f   :  { %4953 = vmatprep.subr.mxu0 %v5190_v1 }
0x2170   :  { %v2950_v27 = vpop.trf.xlu1 }
0x2171   :  { %4917 = vmatprep.mubr.msk.f32.mxu0 %vm176_vm2, %v2950_v27 }
0x2174   :  { %v2951_v28 = vpop.trf.xlu1 }
0x2175   :  { %4918 = vmatmul.mubr.msk.f32.gmra.mxu0 %vm176_vm2, %v2951_v28 }
0x222d   :  { %v4916_v29 = vpop.f32.mrf.mxu0 }
0x222e   :  { %v3066_v30 = vmul.f32 0.17677669, %v4916_v29 }
0x222f   :  { %v3046_v35 = vpop.f32.mrf.mxu0 }
0x2230   :  { %v3070_v48 = vadd.f32 %v5821_v26, %v3066_v30  ;;  %v3065_v37 = vmul.f32 0.17677669, %v3046_v35 }
0x2232   :  { %v3069_v6 = vadd.f32 %v5814_v16, %v3065_v37  ;;  %v3076_v43 = vsel %vm66_vm1, %v3070_v48, -inf }
0x2233   :  { %3077 = vmax.xlane.f32.xlu1 %v3076_v43 }
0x2234   :  { %v3073_v44 = vsel %vm66_vm1, %v3069_v6, -inf }
0x2235   :  { %3074 = vmax.xlane.f32.xlu0 %v3073_v44  ;;  %v4919_v20 = vpop.f32.mrf.mxu0 }
0x2236   :  { %v3068_v56 = vmul.f32 0.17677669, %v4919_v20 }
0x2237   :  { %v3056_v23 = vpop.f32.mrf.mxu0 }
0x2238   :  { %v3067_v57 = vmul.f32 0.17677669, %v3056_v23  ;;  %v3072_v46 = vadd.f32 %v5828_v36, %v3068_v56 }
0x223a   :  { %v3071_v34 = vadd.f32 %v5835_v40, %v3067_v57  ;;  %v3082_v31 = vsel %vm66_vm1, %v3072_v46, -inf }
0x223c   :  { %v3079_v47 = vsel %vm66_vm1, %v3071_v34, -inf }
0x223d   :  { %3080 = vmax.xlane.f32.xlu0 %v3079_v47 }
0x2241   :  { %3083 = vmax.xlane.f32.xlu0 %v3082_v31 }
0x2257   :  { %3125 = vrot.lane.b32.xlu0 %v5976_v54, %s5194_s24 }
0x225b   :  { %3123 = vrot.lane.b32.xlu0 %v5976_v54, %s5195_s25 }
0x225f   :  { %3121 = vrot.lane.b32.xlu0 %v5976_v54, %s5193_s15 }
0x22bc   :  { %v3078_v10 = vpop.xlane.xlu1 %3077 }
0x22bd   :  { %v3086_v12 = vsub.f32 %v3070_v48, %v3078_v10 }
0x22be   :  { %v3075_v5 = vpop.xlane.xlu0 %3074 }
0x22bf   :  { %v3085_v7 = vsub.f32 %v3069_v6, %v3075_v5  ;;  %v3091_v13 = vmul.f32 1.442695, %v3086_v12 }
0x22c1   :  { %v3089_v49 = vmul.f32 1.442695, %v3085_v7 }
0x22c3   :  { %5122 = vpow2.f32 %v3089_v49 }
0x22c4   :  { %5124 = vpow2.f32 %v3091_v13 }
0x22c6   :  { %v3081_v51 = vpop.xlane.xlu0 %3080 }
0x22c7   :  { %v3087_v15 = vsub.f32 %v3071_v34, %v3081_v51  ;;  %v6037_v51 = vld [vmem:[%s6240_s7 + $0x68] sm:$0xff] }
0x22c9   :  { %v3093_v19 = vmul.f32 1.442695, %v3087_v15 }
0x22ca   :  { %v3084_v52 = vpop.xlane.xlu0 %3083 }
0x22cb   :  { %v3088_v53 = vsub.f32 %v3072_v46, %v3084_v52  ;;  %v6044_v52 = vld [vmem:[%s6240_s7 + $0x58] sm:$0xff] }
0x22cd   :  { %v3095_v18 = vmul.f32 1.442695, %v3088_v53 }
0x22ce   :  { %v3126_v50 = vpop.permute.xlu0 %3125 }
0x22cf   :  { %3133 = vrot.lane.b32.xlu1 %v3126_v50, %s5196_s26  ;;  %5126 = vpow2.f32 %v3095_v18  ;;  %v6051_v50 = vld [vmem:[%s6240_s7 + $0x48] sm:$0xff] }
0x22d0   :  { %v5123_v62 = vpop.eup %5122  ;;  %5128 = vpow2.f32 %v3093_v19 }
0x22d1   :  { %v3097_v4 = vsel %vm66_vm1, %v5123_v62, 0.0  ;;  %v5125_v58 = vpop.eup %5124 }
0x22d2   :  { %3098 = vadd.xlane.f32.xlu0 %v3097_v4  ;;  %v3124_v55 = vpop.permute.xlu0 %3123  ;;  %v3100_v9 = vsel %vm66_vm1, %v5125_v58, 0.0 }
0x22d6   :  { %v3122_v21 = vpop.permute.xlu0 %3121 }
0x22dc   :  { %v5127_v61 = vpop.eup %5126 }
0x22dd   :  { %v3106_v14 = vsel %vm66_vm1, %v5127_v61, 0.0  ;;  %v5129_v27 = vpop.eup %5128 }
0x22de   :  { %v3103_v28 = vsel %vm66_vm1, %v5129_v27, 0.0 }
0x22e8   :  { %3131 = vrot.lane.b32.xlu0 %v3124_v55, %s5196_s26 }
0x22f3   :  { %3101 = vadd.xlane.f32.xlu1 %v3100_v9 }
0x2304   :  { %3129 = vrot.lane.b32.xlu1 %v3122_v21, %s5196_s26 }
0x2328   :  { %3107 = vadd.xlane.f32.xlu1 %v3106_v14 }
0x232c   :  { %3104 = vadd.xlane.f32.xlu1 %v3103_v28 }
0x233d   :  { %3127 = vrot.lane.b32.xlu1 %v5976_v54, %s5196_s26 }
0x2341   :  { %v3134_v29 = vpop.permute.xlu1 %3133 }
0x2342   :  { %4920 = vmatprep.subr.mxu1 %v3134_v29 }
0x2343   :  { %4921 = vmatpush3.msra.mxu1 %v3134_v29 }
0x235b   :  { %v3099_v30 = vpop.xlane.xlu0 %3098 }
0x235c   :  { %5130 = vrcp.f32 %v3099_v30 }
0x235f   :  { %v3132_v35 = vpop.permute.xlu0 %3131 }
0x2360   :  { %4922 = vmatprep.subr.mxu1 %v3132_v35 }
0x2361   :  { %4923 = vmatpush3.msra.mxu1 %v3132_v35 }
0x2369   :  { %v5131_v48 = vpop.eup %5130 }
0x236a   :  { %v3113_v37 = vmul.f32 %v5131_v48, %v5123_v62 }
0x236c   :  { %v3117_v6 = vsel %vm1765_vm4, -1e+09, %v3113_v37 }
0x236d   :  { %4928 = vmatprep.mubr.msk.f32.mxu1 %vm66_vm1, %v3117_v6 }
0x237c   :  { %v3102_v43 = vpop.xlane.xlu1 %3101 }
0x237d   :  { %5132 = vrcp.f32 %v3102_v43 }
0x2380   :  { %v3130_v44 = vpop.permute.xlu1 %3129 }
0x2381   :  { %4924 = vmatprep.subr.mxu1 %v3130_v44 }
0x2382   :  { %4925 = vmatpush3.msra.mxu1 %v3130_v44 }
0x238a   :  { %v5133_v20 = vpop.eup %5132 }
0x238b   :  { %v3114_v56 = vmul.f32 %v5133_v20, %v5125_v58 }
0x238d   :  { %v3118_v25 = vsel %vm1766_vm5, -1e+09, %v3114_v56 }
0x23b1   :  { %v3108_v54 = vpop.xlane.xlu1 %3107 }
0x23b2   :  { %5134 = vrcp.f32 %v3108_v54 }
0x23b5   :  { %v3105_v23 = vpop.xlane.xlu1 %3104 }
0x23b6   :  { %5136 = vrcp.f32 %v3105_v23  ;;  %v3370_v23 = vrot.slane %v5972_v24, %v5418_v59 }
0x23b9   :  { %v3128_v57 = vpop.permute.xlu1 %3127 }
0x23ba   :  { %4926 = vmatprep.subr.mxu1 %v3128_v57 }
0x23bb   :  { %4927 = vmatpush3.msra.mxu1 %v3128_v57 }
0x23bc   :  { %4929 = vmatmul.mubr.msk.f32.vlgmr.msra.gmra.mxu1 %vm66_vm1, %v3118_v25  ;;  %4942 = vmatprep.subr.mxu1 %v5190_v1 }
0x23bf   :  { %v5135_v34 = vpop.eup %5134 }
0x23c0   :  { %v3116_v47 = vmul.f32 %v5135_v34, %v5127_v61  ;;  %v3380_v34 = vrot.slane %v5972_v24, %v5442_v11 }
0x23c2   :  { %v3120_v7 = vsel %vm1768_vm7, -1e+09, %v3116_v47 }
0x23c3   :  { %v5137_v46 = vpop.eup %5136 }
0x23c4   :  { %v3115_v31 = vmul.f32 %v5137_v46, %v5129_v27 }
0x23c6   :  { %v3119_v5 = vsel %vm1767_vm6, -1e+09, %v3115_v31 }
0x23c7   :  { %4931 = vmatprep.mubr.msk.f32.mxu1 %vm66_vm1, %v3119_v5 }
0x23c8   :  { %4932 = vmatmul.mubr.msk.f32.gmra.mxu1 %vm66_vm1, %v3120_v7 }
0x23c9   :  { %4950 = vmatprep.mubr.msk.f32.mxu1 %vm5191_vm0, %v5190_v1 }
0x247c   :  { %v4930_v38 = vpop.f32.mrf.mxu1 }
0x247e   :  { %v3217_v49 = vpop.f32.mrf.mxu1 }
0x247f   :  { %4936 = vmatprep.mubr.msk.f32.mxu0 %vm176_vm2, %v3217_v49 }
0x2480   :  { %4937 = vmatmul.mubr.msk.f32.vlgmr.msra.gmra.mxu0 %vm176_vm2, %v4930_v38 }
0x2481   :  { %4954 = vmatpush3.msra.mxu0 %v6030_v39 }
0x2482   :  { %4955 = vmatprep.subr.mxu0 %v5190_v1 }
0x2483   :  { %4956 = vmatpush3.msra.mxu0 %v6037_v51 }
0x2484   :  { %4957 = vmatprep.subr.mxu0 %v5190_v1 }
0x2485   :  { %4958 = vmatpush3.msra.mxu0 %v6044_v52 }
0x2486   :  { %4959 = vmatprep.subr.mxu0 %v5190_v1 }
0x2487   :  { %4960 = vmatpush3.msra.mxu0 %v6051_v50 }
0x2488   :  { %v4933_v62 = vpop.f32.mrf.mxu1 }
0x248a   :  { %v3227_v4 = vpop.f32.mrf.mxu1 }
0x248b   :  { %4939 = vmatprep.mubr.msk.f32.mxu0 %vm176_vm2, %v3227_v4 }
0x248c   :  { %4940 = vmatmul.mubr.msk.f32.gmra.mxu0 %vm176_vm2, %v4933_v62 }
0x248d   :  { %4961 = vmatprep.mubr.msk.f32.mxu0 %vm5191_vm0, %v5190_v1 }
0x2490   :  { %4962 = vmatmul.mubr.msk.f32.vlgmr.msra.gmra.mxu0 %vm66_vm1, %v5786_v45  ;;  %v3351_v45 = vrot.slane %v5972_v24, %v5374_v32 }
0x2540   :  { %v4938_v10 = vpop.f32.mrf.mxu0 }
0x2541   :  { %3334 = vrot.lane.b32.xlu1 %v4938_v10, %s5192_s0 }
0x2542   :  { %v3314_v12 = vpop.f32.mrf.mxu0 }
0x254c   :  { %v4941_v13 = vpop.f32.mrf.mxu0 }
0x254d   :  { %3344 = vrot.lane.b32.xlu1 %v4941_v13, %s5197_s29 }
0x254e   :  { %v3324_v55 = vpop.f32.mrf.mxu0 }
0x254f   :  { %3339 = vrot.lane.b32.xlu0 %v3324_v55, %s5196_s26 }
0x2550   :  { %v3540_v58 = vpop.f32.mrf.mxu0 }
0x2551   :  { %3389 = vrot.lane.b32.xlu1 %v5945_v0, %s5197_s29 }
0x2552   :  { %v4963_v9 = vpop.f32.mrf.mxu0 }
0x25b3   :  { %v3335_v21 = vpop.permute.xlu1 %3334 }
0x25b4   :  { %v3337_v53 = vadd.f32 %v3335_v21, %v3314_v12 }
0x25bf   :  { %v3345_v19 = vpop.permute.xlu1 %3344 }
0x25c1   :  { %v3340_v15 = vpop.permute.xlu0 %3339 }
0x25c2   :  { %v3342_v18 = vadd.f32 %v3340_v15, %v3337_v53 }
0x25c3   :  { %v3390_v48 = vpop.permute.xlu1 %3389 }
0x25c4   :  { %v3347_v61 = vadd.f32 %v3345_v19, %v3342_v18 }
0x25c6   :  { %v3352_v14 = vadd.f32 %v3351_v45, %v3347_v61 }
0x25c8   :  { %v3353_v27 = vadd.f32 %v3352_v14, %v5965_v22 }
0x25ca   :  { %v3354_v28 = vsel %vm66_vm1, %v3353_v27, 0.0 }
0x25cb   :  { %3355 = vadd.xlane.f32.xlu0 %v3354_v28 }
0x25e1   :  { %3391 = vrot.lane.b32.xlu0 %v5939_v63, %s5197_s29  ;;  %v3473_v63 = vrot.slane %v5972_v24, %v5448_v17 }
0x25e3   :  { %v6083_v54 = vadd.f32 %v3540_v58, %v3473_v63 }
0x25e5   :  { %3387 = vrot.lane.b32.xlu0 %v5951_v2, %s5197_s29 }
0x2654   :  { %v3356_v0 = vpop.xlane.xlu0 %3355 }
0x2655   :  { %v3357_v29 = vmul.f32 0.03125, %v3356_v0 }
0x2657   :  { %v3358_v30 = vsub.f32 %v3353_v27, %v3357_v29 }
0x2658   :  { %v3392_v35 = vpop.permute.xlu0 %3391 }
0x2659   :  { %v3359_v37 = vmul.f32 %v3358_v30, %v3358_v30  ;;  %4943 = vmatpush3.msra.mxu1 %v3392_v35 }
0x265a   :  { %4944 = vmatprep.subr.mxu1 %v5190_v1 }
0x265b   :  { %v3360_v22 = vsel %vm66_vm1, %v3359_v37, 0.0  ;;  %4945 = vmatpush3.msra.mxu1 %v3390_v48 }
0x265c   :  { %3361 = vadd.xlane.f32.xlu1 %v3360_v22  ;;  %4946 = vmatprep.subr.mxu1 %v5190_v1  ;;  %v3388_v6 = vpop.permute.xlu0 %3387 }
0x265d   :  { %4947 = vmatpush3.msra.mxu1 %v3388_v6 }
0x265e   :  { %4948 = vmatprep.subr.mxu1 %v5190_v1 }
0x266d   :  { %3385 = vrot.lane.b32.xlu1 %v5958_v3, %s5197_s29  ;;  %v3375_v3 = vrot.slane %v5972_v24, %v5421_v60 }
0x26e5   :  { %v3362_v2 = vpop.xlane.xlu1 %3361 }
0x26e6   :  { %v3363_v43 = vmul.f32 0.03125, %v3362_v2 }
0x26e8   :  { %v3364_v44 = vadd.f32 1e-05, %v3363_v43 }
0x26e9   :  { %v3386_v20 = vpop.permute.xlu1 %3385 }
0x26ea   :  { %5138 = vrsqrt.f32 %v3364_v44  ;;  %4949 = vmatpush3.msra.mxu1 %v3386_v20 }
0x26eb   :  { %4964 = vmatprep.subr.mxu1 %v6083_v54 }
0x26f7   :  { %v5139_v56 = vpop.eup %5138 }
0x26f8   :  { %v3366_v57 = vmul.f32 %v5139_v56, %v3358_v30 }
0x26fa   :  { %v3371_v25 = vmul.f32 %v3370_v23, %v3366_v57 }
0x26fc   :  { %v6090_v17 = vadd.f32 %v3375_v3, %v3371_v25  ;;  %v4387_v3 = vld [vmem:[%s6243_s10 + $0x18] sm:$0xff] }
0x26fe   :  { %4951 = vmatmul.mubr.msk.f32.vlgmr.msra.gmra.mxu1 %vm66_vm1, %v6090_v17 }
0x26ff   :  { %4965 = vmatpush3.msra.mxu1 %v6083_v54 }
0x2700   :  { %4986 = vmatprep.subr.mxu1 %v4387_v3 }
0x27be   :  { %v3466_v46 = vpop.f32.mrf.mxu1 }
0x27bf   :  { %v3467_v47 = vadd.f32 %v3466_v46, %v3380_v34 }
0x27c0   :  { %v4952_v31 = vpop.f32.mrf.mxu1 }
0x27c1   :  { %3544 = vxpose.xlu0.b32.start.end [1/1] (short) (narrow) %v3467_v47, 32 }
0x283d   :  { %v3560_v5 = vpop.trf.xlu0 }
0x283e   :  { %4966 = vmatprep.mubr.msk.f32.mxu1 %vm176_vm2, %v3560_v5 }
0x2841   :  { %v3561_v7 = vpop.trf.xlu0 }
0x2842   :  { %4967 = vmatmul.mubr.msk.f32.vlgmr.msra.gmra.mxu1 %vm176_vm2, %v3561_v7 }
0x2843   :  { %4987 = vmatpush3.msra.mxu1 %v4387_v3 }
0x2844   :  { %5005 = vmatprep.subr.mxu1 %v5190_v1 }
0x2845   :  { %v3562_v33 = vpop.trf.xlu0 }
0x2846   :  { %4969 = vmatprep.mubr.msk.f32.mxu1 %vm176_vm2, %v3562_v33 }
0x2849   :  { %v3563_v38 = vpop.trf.xlu0 }
0x284a   :  { %4970 = vmatmul.mubr.msk.f32.gmra.mxu1 %vm176_vm2, %v3563_v38 }
0x2902   :  { %v4968_v49 = vpop.f32.mrf.mxu1 }
0x2903   :  { %v3674_v62 = vmul.f32 0.17677669, %v4968_v49 }
0x2904   :  { %v3654_v4 = vpop.f32.mrf.mxu1 }
0x2905   :  { %v3678_v10 = vadd.f32 %v5821_v26, %v3674_v62  ;;  %v3673_v12 = vmul.f32 0.17677669, %v3654_v4 }
0x2907   :  { %v3677_v13 = vadd.f32 %v5814_v16, %v3673_v12  ;;  %v3684_v55 = vsel %vm66_vm1, %v3678_v10, -inf }
0x2908   :  { %3685 = vmax.xlane.f32.xlu0 %v3684_v55 }
0x2909   :  { %v3681_v58 = vsel %vm66_vm1, %v3677_v13, -inf }
0x290a   :  { %3682 = vmax.xlane.f32.xlu1 %v3681_v58  ;;  %v4971_v9 = vpop.f32.mrf.mxu1 }
0x290b   :  { %v3676_v53 = vmul.f32 0.17677669, %v4971_v9 }
0x290c   :  { %v3664_v21 = vpop.f32.mrf.mxu1 }
0x290d   :  { %v3675_v15 = vmul.f32 0.17677669, %v3664_v21  ;;  %v3680_v18 = vadd.f32 %v5828_v36, %v3676_v53 }
0x290f   :  { %v3679_v45 = vadd.f32 %v5835_v40, %v3675_v15  ;;  %v3690_v26 = vsel %vm66_vm1, %v3680_v18, -inf }
0x2911   :  { %v3687_v19 = vsel %vm66_vm1, %v3679_v45, -inf }
0x2912   :  { %3688 = vmax.xlane.f32.xlu1 %v3687_v19 }
0x2916   :  { %3691 = vmax.xlane.f32.xlu1 %v3690_v26 }
0x2927   :  { %3730 = vrot.lane.b32.xlu1 %v6083_v54, %s5194_s24 }
0x292b   :  { %3728 = vrot.lane.b32.xlu1 %v6083_v54, %s5195_s25 }
0x292f   :  { %3726 = vrot.lane.b32.xlu1 %v6083_v54, %s5193_s15  ;;  %s5198_s15 = smov [#allocation2]  }
0x2930   :  { %s4287_s10 = sshll.u32 %s5198_s15, 4  ;;  %s4288_s10 = int_to_ptr.vmem [resolvable:$true] %s4287_s10 }
0x2931   :  { %p5173_p1 = scmp.lt.s32.totalorder %s4288_s10, %s4288_s10 }
0x2991   :  { %v3686_v36 = vpop.xlane.xlu0 %3685 }
0x2992   :  { %v3694_v28 = vsub.f32 %v3678_v10, %v3686_v36 }
0x2993   :  { %v3683_v16 = vpop.xlane.xlu1 %3682 }
0x2994   :  { %v3699_v0 = vmul.f32 1.442695, %v3694_v28  ;;  %v3693_v48 = vsub.f32 %v3677_v13, %v3683_v16 }
0x2996   :  { %5140 = vpow2.f32 %v3699_v0  ;;  %v3697_v22 = vmul.f32 1.442695, %v3693_v48 }
0x299b   :  { %v3689_v61 = vpop.xlane.xlu1 %3688 }
0x299c   :  { %v3695_v30 = vsub.f32 %v3679_v45, %v3689_v61  ;;  %v3956_v61 = vrot.slane %v5972_v24, %v5470_v41 }
0x299e   :  { %v3701_v37 = vmul.f32 1.442695, %v3695_v30 }
0x299f   :  { %v3692_v40 = vpop.xlane.xlu1 %3691 }
0x29a0   :  { %v3696_v29 = vsub.f32 %v3680_v18, %v3692_v40 }
0x29a2   :  { %v3703_v35 = vmul.f32 1.442695, %v3696_v29 }
0x29a3   :  { %v3731_v14 = vpop.permute.xlu1 %3730  ;;  %v5141_v6 = vpop.eup %5140 }
0x29a4   :  { %3738 = vrot.lane.b32.xlu0 %v3731_v14, %s5192_s0  ;;  %5142 = vpow2.f32 %v3703_v35  ;;  %v3708_v63 = vsel %vm66_vm1, %v5141_v6, 0.0 }
0x29a5   :  { %5144 = vpow2.f32 %v3701_v37 }
0x29a6   :  { %5146 = vpow2.f32 %v3697_v22 }
0x29a7   :  { %v3729_v27 = vpop.permute.xlu1 %3728 }
0x29a8   :  { %3736 = vrot.lane.b32.xlu1 %v3729_v27, %s5192_s0 }
0x29ab   :  { %v3727_v57 = vpop.permute.xlu1 %3726 }
0x29b1   :  { %v5143_v2 = vpop.eup %5142 }
0x29b2   :  { %v3714_v43 = vsel %vm66_vm1, %v5143_v2, 0.0  ;;  %v5145_v44 = vpop.eup %5144 }
0x29b3   :  { %v5147_v20 = vpop.eup %5146  ;;  %v3711_v23 = vsel %vm66_vm1, %v5145_v44, 0.0 }
0x29b4   :  { %v3705_v56 = vsel %vm66_vm1, %v5147_v20, 0.0 }
0x29c3   :  { %3709 = vadd.xlane.f32.xlu0 %v3708_v63 }
0x29c7   :  { %3715 = vadd.xlane.f32.xlu0 %v3714_v43 }
0x29cb   :  { %3712 = vadd.xlane.f32.xlu0 %v3711_v23  ;;  %v3975_v23 = vrot.slane %v5972_v24, %v5473_v42  ;;  %v4417_v42 = vld [vmem:[%s6241_s8 + $0x48] sm:$0xff] }
0x29cc   :  { %3706 = vadd.xlane.f32.xlu1 %v3705_v56 }
0x29dd   :  { %3732 = vrot.lane.b32.xlu1 %v6083_v54, %s5192_s0 }
0x29e1   :  { %3734 = vrot.lane.b32.xlu0 %v3727_v57, %s5192_s0 }
0x2a16   :  { %v3739_v25 = vpop.permute.xlu0 %3738 }
0x2a17   :  { %4972 = vmatprep.subr.mxu0 %v3739_v25 }
0x2a18   :  { %4973 = vmatpush3.msra.mxu0 %v3739_v25 }
0x2a1a   :  { %v3737_v34 = vpop.permute.xlu1 %3736 }
0x2a1b   :  { %4974 = vmatprep.subr.mxu0 %v3737_v34 }
0x2a1c   :  { %4975 = vmatpush3.msra.mxu0 %v3737_v34 }
0x2a4c   :  { %v3710_v46 = vpop.xlane.xlu0 %3709 }
0x2a4d   :  { %5148 = vrcp.f32 %v3710_v46  ;;  %v4418_v46 = vld [vmem:[%s6241_s8 + $0x50] sm:$0xff] }
0x2a50   :  { %v3716_v47 = vpop.xlane.xlu0 %3715 }
0x2a54   :  { %v3713_v54 = vpop.xlane.xlu0 %3712 }
0x2a55   :  { %5150 = vrcp.f32 %v3713_v54  ;;  %v3707_v31 = vpop.xlane.xlu1 %3706 }
0x2a56   :  { %5152 = vrcp.f32 %v3707_v31 }
0x2a57   :  { %5154 = vrcp.f32 %v3716_v47 }
0x2a58   :  { %v3735_v5 = vpop.permute.xlu0 %3734 }
0x2a59   :  { %4976 = vmatprep.subr.mxu0 %v3735_v5  ;;  %v3733_v7 = vpop.permute.xlu1 %3732 }
0x2a5a   :  { %4977 = vmatpush3.msra.mxu0 %v3735_v5  ;;  %v5149_v33 = vpop.eup %5148 }
0x2a5b   :  { %4978 = vmatprep.subr.mxu0 %v3733_v7  ;;  %v3722_v4 = vmul.f32 %v5149_v33, %v5141_v6 }
0x2a5c   :  { %4979 = vmatpush3.msra.mxu0 %v3733_v7 }
0x2a5d   :  { %4994 = vmatprep.subr.mxu0 %v5190_v1 }
0x2a62   :  { %v5151_v38 = vpop.eup %5150 }
0x2a63   :  { %v5153_v49 = vpop.eup %5152  ;;  %v3723_v12 = vmul.f32 %v5151_v38, %v5145_v44 }
0x2a64   :  { %v3721_v62 = vmul.f32 %v5153_v49, %v5147_v20  ;;  %v5155_v10 = vpop.eup %5154  ;;  %v4385_v20 = vld [vmem:[%s6242_s9 + $0x18] sm:$0x1f] }
0x2a65   :  { %v3724_v13 = vmul.f32 %v5155_v10, %v5143_v2  ;;  %v3980_v3 = vrot.slane %v4385_v20, %v5292_v8  ;;  %v4416_v8 = vld [vmem:[%s6241_s8 + $0x40] sm:$0xff]  ;;  %v3985_v24 = vrot.slane %v4385_v20, %v5374_v32  ;;  %v4088_v7 = vrot.slane %v4385_v20, %v5418_v59  ;;  %v4188_v59 = vld [vmem:[%s6244_s11 + $0x10] sm:$0xff] }
0x2a66   :  { %4980 = vmatprep.mubr.msk.f32.mxu0 %vm66_vm1, %v3721_v62 }
0x2a67   :  { %4981 = vmatmul.mubr.msk.f32.vlgmr.msra.gmra.mxu0 %vm66_vm1, %v3722_v4 }
0x2a68   :  { %4983 = vmatprep.mubr.msk.f32.mxu0 %vm66_vm1, %v3723_v12 }
0x2a6b   :  { %4984 = vmatmul.mubr.msk.f32.gmra.mxu0 %vm66_vm1, %v3724_v13 }
0x2a6c   :  { %5002 = vmatprep.mubr.msk.f32.mxu0 %vm5191_vm0, %v5190_v1 }
0x2b27   :  { %v4982_v55 = vpop.f32.mrf.mxu0 }
0x2b29   :  { %v3822_v58 = vpop.f32.mrf.mxu0 }
0x2b2a   :  { %4988 = vmatprep.mubr.msk.f32.mxu1 %vm176_vm2, %v3822_v58  ;;  %v4189_v58 = vld [vmem:[%s6244_s11 + $0x18] sm:$0xff] }
0x2b2b   :  { %v4985_v9 = vpop.f32.mrf.mxu0  ;;  %4989 = vmatmul.mubr.msk.f32.vlgmr.msra.gmra.mxu1 %vm176_vm2, %v4982_v55 }
0x2b2d   :  { %v3832_v21 = vpop.f32.mrf.mxu0 }
0x2b2e   :  { %4991 = vmatprep.mubr.msk.f32.mxu1 %vm176_vm2, %v3832_v21  ;;  %v4186_v21 = vld [vmem:[%s6244_s11] sm:$0xff] }
0x2b2f   :  { %4992 = vmatmul.mubr.msk.f32.gmra.mxu1 %vm176_vm2, %v4985_v9  ;;  %v4187_v9 = vld [vmem:[%s6244_s11 + $0x8] sm:$0xff] }
0x2b30   :  { %5021 = vmatprep.mubr.msk.f32.mxu1 %vm5191_vm0, %v5190_v1 }
0x2beb   :  { %v4990_v53 = vpop.f32.mrf.mxu1 }
0x2bec   :  { %3939 = vrot.lane.b32.xlu0 %v4990_v53, %s5192_s0 }
0x2bed   :  { %v3919_v15 = vpop.f32.mrf.mxu1 }
0x2bef   :  { %v4993_v45 = vpop.f32.mrf.mxu1 }
0x2bf0   :  { %3949 = vrot.lane.b32.xlu0 %v4993_v45, %s5197_s29 }
0x2bf1   :  { %v3929_v18 = vpop.f32.mrf.mxu1 }
0x2bf2   :  { %3944 = vrot.lane.b32.xlu1 %v3929_v18, %s5196_s26  ;;  %v4179_v18 = vrot.slane %v4385_v20, %v5421_v60 }
0x2c5e   :  { %v3940_v19 = vpop.permute.xlu0 %3939 }
0x2c5f   :  { %v3942_v26 = vadd.f32 %v3940_v19, %v3919_v15 }
0x2c62   :  { %v3950_v14 = vpop.permute.xlu0 %3949 }
0x2c64   :  { %v3945_v16 = vpop.permute.xlu1 %3944 }
0x2c65   :  { %v3947_v40 = vadd.f32 %v3945_v16, %v3942_v26  ;;  %v4184_v16 = vrot.slane %v4385_v20, %v5442_v11 }
0x2c67   :  { %v3952_v36 = vadd.f32 %v3950_v14, %v3947_v40  ;;  %v4425_v14 = vld [vmem:[%s6244_s11 + $0x20] ss:$0 sm:$0xff]  ;;  %s5168_s11 = scalar_lea.vmem %s4288_s10, 128 }
0x2c68   :  { %p5169_p0 = scmp.ne.s32.totalorder %s4288_s10, %s5168_s11  ;;  %p5174_p2 = scmp.lt.s32.totalorder %s5168_s11, %s5168_s11 }
0x2c69   :  { %v3957_v27 = vadd.f32 %v3956_v61, %v3952_v36 }
0x2c6a   :  { %p5175_p3 = por %p5174_p2, %p5173_p1 }
0x2c6b   :  { %v3958_v28 = vadd.f32 %v3957_v27, %v6090_v17  ;;  %v4421_v17 = vld [vmem:[%s6241_s8 + $0x68] sm:$0xff] }
0x2c6c   :  { %p5176_p4 = pnand %p5175_p3, %p5169_p0 }
0x2c6d   :  { %v3959_v0 = vsel %vm66_vm1, %v3958_v28, 0.0 }
0x2c6e   :  { %3960 = vadd.xlane.f32.xlu1 %v3959_v0 }
0x2c7f   :  { %3994 = vrot.lane.b32.xlu1 %v6037_v51, %s5196_s26  ;;  %v4423_v51 = vld [vmem:[%s6241_s8 + $0x78] sm:$0xff] }
0x2c80   :  { %5006 = vmatpush3.msra.mxu1 %v4423_v51 }
0x2c81   :  { %5007 = vmatprep.subr.mxu1 %v5190_v1 }
0x2c83   :  { %3992 = vrot.lane.b32.xlu1 %v6044_v52, %s5196_s26  ;;  %v4422_v52 = vld [vmem:[%s6241_s8 + $0x70] sm:$0xff] }
0x2c84   :  { %5008 = vmatpush3.msra.mxu1 %v4422_v52 }
0x2c85   :  { %5009 = vmatprep.subr.mxu1 %v5190_v1 }
0x2c86   :  { %5010 = vmatpush3.msra.mxu1 %v4421_v17 }
0x2c87   :  { %5011 = vmatprep.subr.mxu1 %v5190_v1 }
0x2cf7   :  { %v3961_v29 = vpop.xlane.xlu1 %3960 }
0x2cf8   :  { %v3962_v30 = vmul.f32 0.03125, %v3961_v29 }
0x2cfa   :  { %v3963_v35 = vsub.f32 %v3958_v28, %v3962_v30 }
0x2cfb   :  { %v3995_v22 = vpop.permute.xlu1 %3994 }
0x2cfc   :  { %v3964_v48 = vmul.f32 %v3963_v35, %v3963_v35 }
0x2cfe   :  { %v3965_v41 = vsel %vm66_vm1, %v3964_v48, 0.0 }
0x2cff   :  { %3966 = vadd.xlane.f32.xlu0 %v3965_v41  ;;  %v3993_v43 = vpop.permute.xlu1 %3992 }
0x2d15   :  { %3996 = vrot.lane.b32.xlu0 %v6030_v39, %s5196_s26  ;;  %v4420_v39 = vld [vmem:[%s6241_s8 + $0x60] sm:$0xff] }
0x2d16   :  { %5012 = vmatpush3.msra.mxu1 %v4420_v39 }
0x2d17   :  { %5013 = vmatprep.subr.mxu1 %v5190_v1 }
0x2d19   :  { %3990 = vrot.lane.b32.xlu0 %v6051_v50, %s5196_s26  ;;  %v4419_v50 = vld [vmem:[%s6241_s8 + $0x58] sm:$0xff] }
0x2d1a   :  { %5014 = vmatpush3.msra.mxu1 %v4419_v50 }
0x2d1b   :  { %5015 = vmatprep.subr.mxu1 %v5190_v1 }
0x2d1c   :  { %5016 = vmatpush3.msra.mxu1 %v4418_v46 }
0x2d1d   :  { %5017 = vmatprep.subr.mxu1 %v5190_v1 }
0x2d1e   :  { %5018 = vmatpush3.msra.mxu1 %v4417_v42 }
0x2d1f   :  { %5019 = vmatprep.subr.mxu1 %v5190_v1 }
0x2d20   :  { %5020 = vmatpush3.msra.mxu1 %v4416_v8 }
0x2d88   :  { %v3967_v37 = vpop.xlane.xlu0 %3966 }
0x2d89   :  { %v3968_v6 = vmul.f32 0.03125, %v3967_v37 }
0x2d8b   :  { %v3969_v63 = vadd.f32 1e-05, %v3968_v6 }
0x2d8c   :  { %v3997_v2 = vpop.permute.xlu0 %3996 }
0x2d8d   :  { %5156 = vrsqrt.f32 %v3969_v63  ;;  %4995 = vmatpush3.msra.mxu0 %v3997_v2 }
0x2d8e   :  { %4996 = vmatprep.subr.mxu0 %v5190_v1 }
0x2d8f   :  { %4997 = vmatpush3.msra.mxu0 %v3995_v22 }
0x2d90   :  { %4998 = vmatprep.subr.mxu0 %v5190_v1  ;;  %v3991_v44 = vpop.permute.xlu0 %3990 }
0x2d91   :  { %4999 = vmatpush3.msra.mxu0 %v3993_v43 }
0x2d92   :  { %5000 = vmatprep.subr.mxu0 %v5190_v1 }
0x2d93   :  { %5001 = vmatpush3.msra.mxu0 %v3991_v44 }
0x2d94   :  { %5024 = vmatprep.subr.mxu0 %v5190_v1 }
0x2d9a   :  { %v5157_v56 = vpop.eup %5156 }
0x2d9b   :  { %v3971_v57 = vmul.f32 %v5157_v56, %v3963_v35 }
0x2d9d   :  { %v3976_v25 = vmul.f32 %v3975_v23, %v3971_v57 }
0x2d9f   :  { %v3981_v34 = vadd.f32 %v3980_v3, %v3976_v25 }
0x2da1   :  { %5003 = vmatmul.mubr.msk.f32.vlgmr.msra.gmra.mxu0 %vm66_vm1, %v3981_v34 }
0x2da2   :  { %5032 = vmatprep.mubr.msk.f32.mxu0 %vm5191_vm0, %v5190_v1  ;;  %5025 = vmatpush3.msra.mxu0 %v4189_v58 }
0x2da3   :  { %5026 = vmatprep.subr.mxu0 %v5190_v1 }
0x2da4   :  { %5027 = vmatpush3.msra.mxu0 %v4188_v59 }
0x2da5   :  { %5028 = vmatprep.subr.mxu0 %v5190_v1 }
0x2da6   :  { %5029 = vmatpush3.msra.mxu0 %v4187_v9 }
0x2da7   :  { %5030 = vmatprep.subr.mxu0 %v5190_v1 }
0x2da8   :  { %5031 = vmatpush3.msra.mxu0 %v4186_v21 }
0x2e61   :  { %v4071_v47 = vpop.f32.mrf.mxu0 }
0x2e62   :  { %v4072_v54 = vadd.f32 %v4071_v47, %v3985_v24 }
0x2e63   :  { %v5004_v31 = vpop.f32.mrf.mxu0 }
0x2e64   :  { %v4075_v5 = vmax.f32 %v4072_v54, 0.0 }
0x2e66   :  { %5022 = vmatmul.mubr.msk.f32.vlgmr.msra.gmra.mxu1 %vm673_vm3, %v4075_v5 }
0x2f26   :  { %v4158_v33 = vpop.f32.mrf.mxu1 }
0x2f27   :  { %v4159_v38 = vadd.f32 %v4158_v33, %v4088_v7 }
0x2f28   :  { %v5023_v49 = vpop.f32.mrf.mxu1 }
0x2f29   :  { %v4162_v62 = vadd.f32 %v4159_v38, %v3981_v34 }
0x2f2b   :  { %v4163_v4 = vsel %vm66_vm1, %v4162_v62, 0.0 }
0x2f2c   :  { %4164 = vadd.xlane.f32.xlu1 %v4163_v4 }
0x2fb5   :  { %v4165_v10 = vpop.xlane.xlu1 %4164 }
0x2fb6   :  { %v4166_v12 = vmul.f32 0.03125, %v4165_v10 }
0x2fb8   :  { %v4167_v13 = vsub.f32 %v4162_v62, %v4166_v12 }
0x2fba   :  { %v4168_v55 = vmul.f32 %v4167_v13, %v4167_v13 }
0x2fbc   :  { %v4169_v32 = vsel %vm66_vm1, %v4168_v55, 0.0 }
0x2fbd   :  { %4170 = vadd.xlane.f32.xlu0 %v4169_v32 }
0x3046   :  { %v4171_v53 = vpop.xlane.xlu0 %4170 }
0x3047   :  { %v4172_v15 = vmul.f32 0.03125, %v4171_v53 }
0x3049   :  { %v4173_v45 = vadd.f32 1e-05, %v4172_v15 }
0x304b   :  { %5158 = vrsqrt.f32 %v4173_v45 }
0x3058   :  { %v5159_v19 = vpop.eup %5158 }
0x3059   :  { %v4175_v26 = vmul.f32 %v5159_v19, %v4167_v13 }
0x305b   :  { %v4180_v61 = vmul.f32 %v4179_v18, %v4175_v26 }
0x305d   :  { %v4185_v40 = vadd.f32 %v4184_v16, %v4180_v61 }
0x305f   :  { %5033 = vmatmul.mubr.msk.f32.vlgmr.msra.gmra.mxu0 %vm66_vm1, %v4185_v40 }
0x311f   :  { %v4264_v1 = vpop.f32.mrf.mxu0 }
0x3120   :  { %v4265_v36 = vadd.f32 %v4425_v14, %v4264_v1 }
0x3121   :  { %v5034_v27 = vpop.f32.mrf.mxu0 }
0x3122   :  { %v4269_v28 = vsel %vm4268_vm8, %v4265_v36, -inf }
0x3123   :  { %4270 = vmax.xlane.f32.xlu0 %v4269_v28 }
0x31ac   :  { %v4271_v60 = vpop.xlane.xlu0 %4270 }
0x31ad   :  { %v4272_v0 = vsub.f32 %v4265_v36, %v4271_v60 }
0x31af   :  { %v4273_v29 = vmul.f32 1.442695, %v4272_v0 }
0x31b1   :  { %5160 = vpow2.f32 %v4273_v29 }
0x31be   :  { %v5161_v11 = vpop.eup %5160 }
0x31bf   :  { %v4275_v30 = vsel %vm4268_vm8, %v5161_v11, 0.0 }
0x31c0   :  { %4276 = vadd.xlane.f32.xlu1 %v4275_v30 }
0x3249   :  { %v4277_v35 = vpop.xlane.xlu1 %4276 }
0x324a   :  { %5162 = vrcp.f32 %v4277_v35 }
0x3257   :  { %v5163_v48 = vpop.eup %5162 }
0x3258   :  { %v4279_v41 = vmul.f32 %v5163_v48, %v5161_v11 }
0x325a   :  { %4280 = vst.msk [vmem:[#allocation2] sm:$0xff] %vm4268_vm8, %v4279_v41 }
0x325b   :  { %5179 = shalt.err (!%p5176_p4)
}
0x325c   :  { %4290 = dma.vmem_to_hbm [thread:$0]  %s4288_s10, 128, %s6245_s12, [#allocation3]  }
0x325d   :  { %5188 = dma.done.wait [#allocation3], 128  }
0x325e   :  { %5189 = vsyncadd [#allocation3], 4294967168 }
0x325f   :  { %4294 = vsyncpa [#allocation3], 1 }

</bundles_post_ra>
